<compile_context>
chip_gen: v7x
topology: tpu7x:2x2x1
jax: 0.10.0
libtpu: 0.0.40
codegen_flags: <defaults>
</compile_context>

<pallas_src>
import functools
import math

import jax
import jax.numpy as jnp
from jax.experimental import pallas as pl
from jax.experimental.pallas import tpu as pltpu


def _round_up(x, m):
    return ((x + m - 1) // m) * m


# ---------------------------------------------------------------------------
# Fused path: whole graph resident in VMEM, k hops + gated combine in one call.
# ---------------------------------------------------------------------------
def _make_fused_kernel(k):
    def kernel(a_ref, x_ref, norm_ref, s_ref, o_ref):
        """out = sum_t sigmoid(h_t @ s) * h_t with
        h_0 = feats,  h_t = norm * (A @ (norm * h_{t-1}))."""
        norm = norm_ref[...]                                    # (n, 1) f32
        s = s_ref[...]                                          # (1, D) f32

        h = x_ref[...]                                          # (n, D) f32
        gate = jax.nn.sigmoid(jnp.sum(h * s, axis=-1, keepdims=True))  # EUP
        acc = gate * h                                          # gated combine

        for _ in range(k):                                      # k small, static
            a = a_ref[...].astype(jnp.float32)                  # bf16 A, exact 0/1
            h = jnp.dot(a, h * norm,
                        preferred_element_type=jnp.float32) * norm     # MXU+VPU
            gate = jax.nn.sigmoid(jnp.sum(h * s, axis=-1, keepdims=True))
            acc = acc + gate * h

        o_ref[...] = acc.astype(o_ref.dtype)

    return kernel


# ---------------------------------------------------------------------------
# Tiled fallback (large graphs): one normalized propagation hop per call.
# ---------------------------------------------------------------------------
def _prop_kernel(a_ref, x_ref, nrow_ref, ncol_ref, o_ref):
    """out_tile = nrow * (A_tile @ (ncol * x_tile)), accumulated over kk.
    Accumulates directly into the resident f32 output block (no scratch)."""
    kk = pl.program_id(1)

    @pl.when(kk == 0)
    def _():
        o_ref[...] = jnp.zeros_like(o_ref)

    x_scaled = x_ref[...] * ncol_ref[...]                       # (tk, D) VPU
    o_ref[...] += jnp.dot(a_ref[...].astype(jnp.float32), x_scaled,
                          preferred_element_type=jnp.float32)    # MXU

    @pl.when(kk == pl.num_programs(1) - 1)
    def _():
        o_ref[...] = o_ref[...] * nrow_ref[...]


def _combine_kernel(h_ref, s_ref, o_ref):
    """S = sigmoid(H @ s); out[n, :] = sum_t S[n, t] * H[t, n, :]."""
    h = h_ref[...]                                              # (k+1, tm, D)
    s = s_ref[...]                                              # (1, D)
    logits = jnp.sum(h * s[None, :, :], axis=-1, keepdims=True)  # XLU
    gate = jax.nn.sigmoid(logits)                                # EUP
    o_ref[...] = jnp.sum(gate * h, axis=0).astype(o_ref.dtype)


# ---------------------------------------------------------------------------
# Wrapper
# ---------------------------------------------------------------------------
def dagnn_conv(adj, feats, s, k, *,
               fused_cap=1024, tile_m=1024, tile_k=512,
               force_tiled=False, vmem_limit_bytes=48 * 1024 * 1024):
    """adj: (N, N) dense adjacency with adj[dst, src] = 1 for edge src->dst.
    feats: (N, D) f32.  s: (D, 1) f32 (DAGNNConv parameter).  k: hops."""
    N, D = feats.shape
    assert adj.shape == (N, N)

    adj_f32 = adj.astype(jnp.float32)
    feats = feats.astype(jnp.float32)
    s_row = s.reshape(1, D).astype(jnp.float32)

    # In-degrees / symmetric norm, matching torch.pow(graph.in_degrees(), -0.5).
    # Zero in-degree -> inf, exactly like the reference (the DAGNN example adds
    # self-loops so this never triggers). Padded rows get 0 AFTER the power.
    degs = jnp.sum(adj_f32, axis=1)
    norm = degs ** -0.5

    use_fused = (not force_tiled) and (N <= fused_cap)

    if use_fused:
        n_pad = _round_up(N, 128)            # one lane/sublane-friendly block
        pad = n_pad - N
        adj_p = jnp.pad(adj_f32, ((0, pad), (0, pad))).astype(jnp.bfloat16)
        feats_p = jnp.pad(feats, ((0, pad), (0, 0)))
        norm_p = jnp.pad(norm, ((0, pad),)).reshape(n_pad, 1)

        out = pl.pallas_call(
            _make_fused_kernel(k),
            out_shape=jax.ShapeDtypeStruct((n_pad, D), jnp.float32),
            in_specs=[pl.BlockSpec(memory_space=pltpu.MemorySpace.VMEM)] * 4,
            out_specs=pl.BlockSpec(memory_space=pltpu.MemorySpace.VMEM),
            compiler_params=pltpu.CompilerParams(
                vmem_limit_bytes=vmem_limit_bytes),
        )(adj_p, feats_p, norm_p, s_row)
        return out[:N]

    # ----------------------------- tiled path ------------------------------
    assert tile_m % 8 == 0 and tile_k % 128 == 0
    # A is square and each hop's output feeds the next hop's input, so rows and
    # cols share one padded extent that both tile sizes must divide.
    step = tile_m * tile_k // math.gcd(tile_m, tile_k)
    n_pad = _round_up(N, step)
    pad = n_pad - N

    adj_p = jnp.pad(adj_f32, ((0, pad), (0, pad))).astype(jnp.bfloat16)
    feats_p = jnp.pad(feats, ((0, pad), (0, 0)))
    norm_p = jnp.pad(norm, ((0, pad),)).reshape(n_pad, 1)

    grid_m = n_pad // tile_m
    grid_k = n_pad // tile_k

    prop = pl.pallas_call(
        _prop_kernel,
        out_shape=jax.ShapeDtypeStruct((n_pad, D), jnp.float32),
        grid_spec=pltpu.PrefetchScalarGridSpec(
            num_scalar_prefetch=0,
            grid=(grid_m, grid_k),
            in_specs=[
                pl.BlockSpec((tile_m, tile_k), lambda i, kk: (i, kk)),  # A (bf16)
                pl.BlockSpec((tile_k, D), lambda i, kk: (kk, 0)),       # feats K tile
                pl.BlockSpec((tile_m, 1), lambda i, kk: (i, 0)),        # norm (out rows)
                pl.BlockSpec((tile_k, 1), lambda i, kk: (kk, 0)),       # norm (K rows)
            ],
            out_specs=pl.BlockSpec((tile_m, D), lambda i, kk: (i, 0)),
        ),
        compiler_params=pltpu.CompilerParams(
            dimension_semantics=("parallel", "arbitrary"),
            vmem_limit_bytes=vmem_limit_bytes,
        ),
    )

    results = [feats_p]
    h = feats_p
    for _ in range(k):
        h = prop(adj_p, h, norm_p, norm_p)
        results.append(h)

    # Hop axis leading so the row tiles stay lane-dense (D last).
    H = jnp.stack(results, axis=0)                              # (k+1, n_pad, D)

    combine = pl.pallas_call(
        _combine_kernel,
        out_shape=jax.ShapeDtypeStruct((n_pad, D), jnp.float32),
        grid_spec=pltpu.PrefetchScalarGridSpec(
            num_scalar_prefetch=0,
            grid=(grid_m,),
            in_specs=[
                pl.BlockSpec((k + 1, tile_m, D), lambda i: (0, i, 0)),
                pl.BlockSpec((1, D), lambda i: (0, 0)),         # tiny resident s
            ],
            out_specs=pl.BlockSpec((tile_m, D), lambda i: (i, 0)),
        ),
        compiler_params=pltpu.CompilerParams(
            dimension_semantics=("parallel",),
            vmem_limit_bytes=vmem_limit_bytes,
        ),
    )

    out = combine(H, s_row)
    return out[:N]


if __name__ == "__main__":
    key = jax.random.PRNGKey(0)
    k_adj, k_feat, k_s = jax.random.split(key, 3)

    N, in_dim, K_HOPS = 200, 128, 3   # small graph; in_dim kept lane-dense

    # Random directed graph with self-loops (in_degree >= 1, like the DAGNN
    # example's add-self-loop preprocessing; avoids inf in degs**-0.5).
    adj = (jax.random.uniform(k_adj, (N, N)) < 0.05).astype(jnp.float32)
    adj = jnp.maximum(adj, jnp.eye(N, dtype=jnp.float32))

    feats = jax.random.normal(k_feat, (N, in_dim), dtype=jnp.float32)

    # Parameter s: xavier_uniform_ with gain = calculate_gain('sigmoid') = 1.0.
    bound = 1.0 * math.sqrt(6.0 / (in_dim + 1))
    s = jax.random.uniform(k_s, (in_dim, 1), minval=-bound, maxval=bound,
                           dtype=jnp.float32)

    # Pure-JAX reference replicating the torch forward exactly.
    def ref_fn(adj, feats, s, k):
        degs = jnp.sum(adj, axis=1)
        norm = (degs ** -0.5)[:, None]
        results = [feats]
        h = feats
        for _ in range(k):
            h = h * norm
            h = adj @ h                    # copy_u + sum message passing
            h = h * norm
            results.append(h)
        H = jnp.stack(results, axis=1)                   # (N, k+1, D)
        S = jax.nn.sigmoid(jnp.matmul(H, s))             # (N, k+1, 1)
        S = jnp.transpose(S, (0, 2, 1))                  # (N, 1, k+1)
        return jnp.squeeze(jnp.matmul(S, H), axis=1)     # (N, D)

    ref = ref_fn(adj, feats, s, K_HOPS)

    # Fused single-kernel path (default for graphs that fit VMEM).
    fused_fn = jax.jit(lambda a, f, w: dagnn_conv(a, f, w, K_HOPS))
    out_fused = jax.block_until_ready(fused_fn(adj, feats, s))
    assert out_fused.shape == (N, in_dim)
    assert jnp.allclose(out_fused, ref, atol=1e-3, rtol=1e-3), \
        float(jnp.max(jnp.abs(out_fused - ref)))

    # Tiled fallback path, exercised with small tiles so grid_k > 1
    # (covers the accumulate-into-output / pl.when init-finalize pattern).
    tiled_fn = jax.jit(lambda a, f, w: dagnn_conv(
        a, f, w, K_HOPS, force_tiled=True, tile_m=128, tile_k=128))
    out_tiled = jax.block_until_ready(tiled_fn(adj, feats, s))
    assert jnp.allclose(out_tiled, ref, atol=1e-3, rtol=1e-3), \
        float(jnp.max(jnp.abs(out_tiled - ref)))

    print("KERNEL_OK")
</pallas_src>

<mosaic_0001>
module attributes {stable_mosaic.version = 11 : i64} {
  func.func @kernel(%arg0: memref<256x256xbf16, #tpu.memory_space<vmem>>, %arg1: memref<256x128xf32, #tpu.memory_space<vmem>>, %arg2: memref<256x1xf32, #tpu.memory_space<vmem>>, %arg3: memref<1x128xf32, #tpu.memory_space<vmem>>, %arg4: memref<256x128xf32, #tpu.memory_space<vmem>>) attributes {dimension_semantics = [], scalar_prefetch = 0 : i64, scratch_operands = 0 : i64, tpu.core_type = #tpu.core_type<tc>} {
    %c0 = arith.constant 0 : index
    %c0_0 = arith.constant 0 : index
    %0 = vector.load %arg2[%c0, %c0_0] : memref<256x1xf32, #tpu.memory_space<vmem>>, vector<256x1xf32>
    %c0_1 = arith.constant 0 : index
    %c0_2 = arith.constant 0 : index
    %1 = vector.load %arg3[%c0_1, %c0_2] : memref<1x128xf32, #tpu.memory_space<vmem>>, vector<1x128xf32>
    %c0_3 = arith.constant 0 : index
    %c0_4 = arith.constant 0 : index
    %2 = vector.load %arg1[%c0_3, %c0_4] : memref<256x128xf32, #tpu.memory_space<vmem>>, vector<256x128xf32>
    %3 = vector.broadcast %1 : vector<1x128xf32> to vector<256x128xf32>
    %4 = arith.mulf %2, %3 : vector<256x128xf32>
    %cst = arith.constant dense<0.000000e+00> : vector<256xf32>
    %5 = vector.multi_reduction <add>, %4, %cst [1] : vector<256x128xf32> to vector<256xf32>
    %6 = vector.shape_cast %5 : vector<256xf32> to vector<256x1xf32>
    %7 = arith.negf %6 : vector<256x1xf32>
    %8 = math.exp %7 : vector<256x1xf32>
    %cst_5 = arith.constant 1.000000e+00 : f32
    %9 = vector.broadcast %cst_5 : f32 to vector<256x1xf32>
    %10 = arith.addf %9, %8 : vector<256x1xf32>
    %11 = arith.divf %9, %10 : vector<256x1xf32>
    %12 = vector.broadcast %11 : vector<256x1xf32> to vector<256x128xf32>
    %13 = arith.mulf %12, %2 : vector<256x128xf32>
    %c0_6 = arith.constant 0 : index
    %c0_7 = arith.constant 0 : index
    %14 = vector.load %arg0[%c0_6, %c0_7] : memref<256x256xbf16, #tpu.memory_space<vmem>>, vector<256x256xbf16>
    %15 = arith.extf %14 : vector<256x256xbf16> to vector<256x256xf32>
    %16 = vector.broadcast %0 : vector<256x1xf32> to vector<256x128xf32>
    %17 = arith.mulf %2, %16 : vector<256x128xf32>
    %cst_8 = arith.constant dense<0.000000e+00> : vector<256x128xf32>
    %18 = tpu.matmul %15, %17, %cst_8 {dimension_numbers = #tpu.dot_dimension_numbers<[1], [0], [0], [1], [0, 0, 1, 1], [], []>} : vector<256x256xf32>, vector<256x128xf32>, vector<256x128xf32> -> vector<256x128xf32>
    %19 = vector.broadcast %0 : vector<256x1xf32> to vector<256x128xf32>
    %20 = arith.mulf %18, %19 : vector<256x128xf32>
    %21 = vector.broadcast %1 : vector<1x128xf32> to vector<256x128xf32>
    %22 = arith.mulf %20, %21 : vector<256x128xf32>
    %cst_9 = arith.constant dense<0.000000e+00> : vector<256xf32>
    %23 = vector.multi_reduction <add>, %22, %cst_9 [1] : vector<256x128xf32> to vector<256xf32>
    %24 = vector.shape_cast %23 : vector<256xf32> to vector<256x1xf32>
    %25 = arith.negf %24 : vector<256x1xf32>
    %26 = math.exp %25 : vector<256x1xf32>
    %cst_10 = arith.constant 1.000000e+00 : f32
    %27 = vector.broadcast %cst_10 : f32 to vector<256x1xf32>
    %28 = arith.addf %27, %26 : vector<256x1xf32>
    %29 = arith.divf %27, %28 : vector<256x1xf32>
    %30 = vector.broadcast %29 : vector<256x1xf32> to vector<256x128xf32>
    %31 = arith.mulf %30, %20 : vector<256x128xf32>
    %32 = arith.addf %13, %31 : vector<256x128xf32>
    %c0_11 = arith.constant 0 : index
    %c0_12 = arith.constant 0 : index
    %33 = vector.load %arg0[%c0_11, %c0_12] : memref<256x256xbf16, #tpu.memory_space<vmem>>, vector<256x256xbf16>
    %34 = arith.extf %33 : vector<256x256xbf16> to vector<256x256xf32>
    %35 = vector.broadcast %0 : vector<256x1xf32> to vector<256x128xf32>
    %36 = arith.mulf %20, %35 : vector<256x128xf32>
    %cst_13 = arith.constant dense<0.000000e+00> : vector<256x128xf32>
    %37 = tpu.matmul %34, %36, %cst_13 {dimension_numbers = #tpu.dot_dimension_numbers<[1], [0], [0], [1], [0, 0, 1, 1], [], []>} : vector<256x256xf32>, vector<256x128xf32>, vector<256x128xf32> -> vector<256x128xf32>
    %38 = vector.broadcast %0 : vector<256x1xf32> to vector<256x128xf32>
    %39 = arith.mulf %37, %38 : vector<256x128xf32>
    %40 = vector.broadcast %1 : vector<1x128xf32> to vector<256x128xf32>
    %41 = arith.mulf %39, %40 : vector<256x128xf32>
    %cst_14 = arith.constant dense<0.000000e+00> : vector<256xf32>
    %42 = vector.multi_reduction <add>, %41, %cst_14 [1] : vector<256x128xf32> to vector<256xf32>
    %43 = vector.shape_cast %42 : vector<256xf32> to vector<256x1xf32>
    %44 = arith.negf %43 : vector<256x1xf32>
    %45 = math.exp %44 : vector<256x1xf32>
    %cst_15 = arith.constant 1.000000e+00 : f32
    %46 = vector.broadcast %cst_15 : f32 to vector<256x1xf32>
    %47 = arith.addf %46, %45 : vector<256x1xf32>
    %48 = arith.divf %46, %47 : vector<256x1xf32>
    %49 = vector.broadcast %48 : vector<256x1xf32> to vector<256x128xf32>
    %50 = arith.mulf %49, %39 : vector<256x128xf32>
    %51 = arith.addf %32, %50 : vector<256x128xf32>
    %c0_16 = arith.constant 0 : index
    %c0_17 = arith.constant 0 : index
    %52 = vector.load %arg0[%c0_16, %c0_17] : memref<256x256xbf16, #tpu.memory_space<vmem>>, vector<256x256xbf16>
    %53 = arith.extf %52 : vector<256x256xbf16> to vector<256x256xf32>
    %54 = vector.broadcast %0 : vector<256x1xf32> to vector<256x128xf32>
    %55 = arith.mulf %39, %54 : vector<256x128xf32>
    %cst_18 = arith.constant dense<0.000000e+00> : vector<256x128xf32>
    %56 = tpu.matmul %53, %55, %cst_18 {dimension_numbers = #tpu.dot_dimension_numbers<[1], [0], [0], [1], [0, 0, 1, 1], [], []>} : vector<256x256xf32>, vector<256x128xf32>, vector<256x128xf32> -> vector<256x128xf32>
    %57 = vector.broadcast %0 : vector<256x1xf32> to vector<256x128xf32>
    %58 = arith.mulf %56, %57 : vector<256x128xf32>
    %59 = vector.broadcast %1 : vector<1x128xf32> to vector<256x128xf32>
    %60 = arith.mulf %58, %59 : vector<256x128xf32>
    %cst_19 = arith.constant dense<0.000000e+00> : vector<256xf32>
    %61 = vector.multi_reduction <add>, %60, %cst_19 [1] : vector<256x128xf32> to vector<256xf32>
    %62 = vector.shape_cast %61 : vector<256xf32> to vector<256x1xf32>
    %63 = arith.negf %62 : vector<256x1xf32>
    %64 = math.exp %63 : vector<256x1xf32>
    %cst_20 = arith.constant 1.000000e+00 : f32
    %65 = vector.broadcast %cst_20 : f32 to vector<256x1xf32>
    %66 = arith.addf %65, %64 : vector<256x1xf32>
    %67 = arith.divf %65, %66 : vector<256x1xf32>
    %68 = vector.broadcast %67 : vector<256x1xf32> to vector<256x128xf32>
    %69 = arith.mulf %68, %58 : vector<256x128xf32>
    %70 = arith.addf %51, %69 : vector<256x128xf32>
    %c0_21 = arith.constant 0 : index
    %c0_22 = arith.constant 0 : index
    %71 = vector.load %arg4[%c0_21, %c0_22] : memref<256x128xf32, #tpu.memory_space<vmem>>, vector<256x128xf32>
    tpu.vector_store %arg4[%c0_21, %c0_22], %70 {strides = array<i32>} : memref<256x128xf32, #tpu.memory_space<vmem>>, vector<256x128xf32>,
    return
  }
}

</mosaic_0001>

<bundles_post_ra>
// kernel: _lambda_.1
= control target key start
LH: loop header
LB: loop body
LE: loop exit
PB: predicated region body
PF: predicated region fallthrough
CT: control target
= control target key end

     0   :  { %v3479_v0 = vmov 0   ;;  %v5616_v7 = vmov 0.0|0.0   ;;  %s5611_s2 = inlined_call_operand.vmem [shape: f32[256,1], index: 2, kind: input, shape index: {}]   ;;  %s5612_s0 = inlined_call_operand.vmem [shape: bf16[256,256], index: 0, kind: input, shape index: {}]   ;;  %s5613_s1 = inlined_call_operand.vmem [shape: f32[256,128], index: 1, kind: input, shape index: {}]   ;;  %s5614_s3 = inlined_call_operand.vmem [shape: f32[1,128], index: 3, kind: input, shape index: {}]   ;;  %s5615_s4 = inlined_call_operand.vmem [shape: f32[256,128], index: 4, kind: output, shape index: {}]  }
   0x1   :  { %2931 = vset.pattern.permute.xlu1 %v3479_v0  ;;  %2930 = vset.pattern.permute.xlu0 %v3479_v0  ;;  %v19_v1 = vld [vmem:[%s5611_s2 + $0x10] sm:$0xff]  ;;  %v17_v2 = vld [vmem:[%s5611_s2] sm:$0xff]  ;;  %v20_v3 = vld [vmem:[%s5611_s2 + $0x18] sm:$0xff] }
   0x2   :  { %516 = vperm.xlu1 %2931, %v19_v1   ;;  %506 = vperm.xlu0 %2930, %v17_v2   ;;  %v18_v4 = vld [vmem:[%s5611_s2 + $0x8] sm:$0xff]  ;;  %v21_v6 = vld [vmem:[%s5611_s2 + $0x20] sm:$0xff]  ;;  %v24_v8 = vld [vmem:[%s5611_s2 + $0x38] sm:$0xff] }
   0x3   :  { %v22_v5 = vld [vmem:[%s5611_s2 + $0x28] sm:$0xff]  ;;  %2752 = vmatprep.subr.bf16.mxu0 %v5616_v7  ;;  %2896 = vmatprep.subr.bf16.mxu1 %v5616_v7  ;;  %v23_v9 = vld [vmem:[%s5611_s2 + $0x30] sm:$0xff]  ;;  %v25_v11 = vld [vmem:[%s5611_s2 + $0x40] sm:$0xff] }
   0x4   :  { %v26_v10 = vld [vmem:[%s5611_s2 + $0x48] sm:$0xff]  ;;  %v28_v12 = vld [vmem:[%s5611_s2 + $0x58] sm:$0xff]  ;;  %v27_v13 = vld [vmem:[%s5611_s2 + $0x50] sm:$0xff] }
   0x5   :  { %v30_v14 = vld [vmem:[%s5611_s2 + $0x68] sm:$0xff]  ;;  %v29_v15 = vld [vmem:[%s5611_s2 + $0x60] sm:$0xff]  ;;  %v32_v16 = vld [vmem:[%s5611_s2 + $0x78] sm:$0xff] }
   0x6   :  { %521 = vperm.xlu1 %2931, %v20_v3   ;;  %511 = vperm.xlu0 %2930, %v18_v4   ;;  %v31_v17 = vld [vmem:[%s5611_s2 + $0x70] sm:$0xff]  ;;  %v34_v18 = vld [vmem:[%s5611_s2 + $0x88] sm:$0xff]  ;;  %v33_v19 = vld [vmem:[%s5611_s2 + $0x80] sm:$0xff] }
   0x7   :  { %v36_v20 = vld [vmem:[%s5611_s2 + $0x98] sm:$0xff]  ;;  %v35_v21 = vld [vmem:[%s5611_s2 + $0x90] sm:$0xff]  ;;  %v38_v22 = vld [vmem:[%s5611_s2 + $0xa8] sm:$0xff] }
   0x8   :  { %v37_v23 = vld [vmem:[%s5611_s2 + $0xa0] sm:$0xff]  ;;  %v40_v24 = vld [vmem:[%s5611_s2 + $0xb8] sm:$0xff]  ;;  %v39_v25 = vld [vmem:[%s5611_s2 + $0xb0] sm:$0xff] }
   0x9   :  { %v42_v26 = vld [vmem:[%s5611_s2 + $0xc8] sm:$0xff]  ;;  %v41_v27 = vld [vmem:[%s5611_s2 + $0xc0] sm:$0xff]  ;;  %v44_v28 = vld [vmem:[%s5611_s2 + $0xd8] sm:$0xff] }
   0xa   :  { %531 = vperm.xlu1 %2931, %v22_v5   ;;  %526 = vperm.xlu0 %2930, %v21_v6   ;;  %v43_v29 = vld [vmem:[%s5611_s2 + $0xd0] sm:$0xff]  ;;  %v46_v30 = vld [vmem:[%s5611_s2 + $0xe8] sm:$0xff]  ;;  %v45_v31 = vld [vmem:[%s5611_s2 + $0xe0] sm:$0xff] }
   0xb   :  { %v48_v32 = vld [vmem:[%s5611_s2 + $0xf8] sm:$0xff]  ;;  %v47_v33 = vld [vmem:[%s5611_s2 + $0xf0] sm:$0xff]  ;;  %v3607_v34 = vld [vmem:[%s5612_s0] sm:$0xff] }
   0xc   :  { %v3612_v35 = vld [vmem:[%s5612_s0 + $0x80] sm:$0xff]  ;;  %v3615_v36 = vunpack.c.h.bf16 %v3607_v34  ;;  %v51_v41 = vld [vmem:[%s5613_s1 + $0x8] sm:$0xff]  ;;  %v52_v44 = vld [vmem:[%s5613_s1 + $0x10] sm:$0xff] }
   0xd   :  { %v3618_v37 = vunpack.c.h.bf16 %v3612_v35  ;;  %v50_v40 = vld [vmem:[%s5613_s1] sm:$0xff]  ;;  %v53_v45 = vld [vmem:[%s5613_s1 + $0x18] sm:$0xff]  ;;  %v55_v57 = vld [vmem:[%s5613_s1 + $0x28] sm:$0xff] }
   0xe   :  { %541 = vperm.xlu1 %2931, %v24_v8   ;;  %536 = vperm.xlu0 %2930, %v23_v9   ;;  %v3647_v48 = vld [vmem:[%s5614_s3] ss:$0 sm:$0xff]  ;;  %v56_v63 = vld [vmem:[%s5613_s1 + $0x30] sm:$0xff]  ;;  %v57_v2 = vld [vmem:[%s5613_s1 + $0x38] sm:$0xff] }
   0xf   :  { %5859 = vst [vmem:[#allocation2_spill] sm:$0xff] %v3618_v37  ;;  %760 = vmatprep.mubr.f32.mxu0 %v3615_v36  ;;  %840 = vmatprep.mubr.f32.mxu1 %v3618_v37  ;;  %v88_v49 = vmul.f32 %v3647_v48, %v50_v40  ;;  %v89_v50 = vmul.f32 %v3647_v48, %v51_v41  ;;  %v54_v54 = vld [vmem:[%s5613_s1 + $0x20] sm:$0xff]  ;;  %v418_v37 = vld [vmem:[%s5612_s0 + $0x50] sm:$0xff] }
  0x10   :  { %v90_v58 = vmul.f32 %v3647_v48, %v52_v44  ;;  %v92_v59 = vmul.f32 %v3647_v48, %v54_v54  ;;  %v91_v3 = vmul.f32 %v3647_v48, %v53_v45  ;;  %v94_v4 = vmul.f32 %v3647_v48, %v56_v63  ;;  %v58_v9 = vld [vmem:[%s5613_s1 + $0x40] sm:$0xff] }
  0x12   :  { %551 = vperm.xlu1 %2931, %v26_v10   ;;  %546 = vperm.xlu0 %2930, %v25_v11  }
  0x16   :  { %561 = vperm.xlu1 %2931, %v28_v12   ;;  %556 = vperm.xlu0 %2930, %v27_v13   ;;  %v59_v12 = vld [vmem:[%s5613_s1 + $0x48] sm:$0xff]  ;;  %v93_v13 = vmul.f32 %v3647_v48, %v55_v57 }
  0x1a   :  { %571 = vperm.xlu1 %2931, %v30_v14   ;;  %566 = vperm.xlu0 %2930, %v29_v15   ;;  %v96_v14 = vmul.f32 %v3647_v48, %v58_v9 }
  0x1e   :  { %581 = vperm.xlu1 %2931, %v32_v16   ;;  %576 = vperm.xlu0 %2930, %v31_v17  }
  0x22   :  { %591 = vperm.xlu1 %2931, %v34_v18   ;;  %586 = vperm.xlu0 %2930, %v33_v19   ;;  %v60_v18 = vld [vmem:[%s5613_s1 + $0x50] sm:$0xff] }
  0x26   :  { %601 = vperm.xlu1 %2931, %v36_v20   ;;  %596 = vperm.xlu0 %2930, %v35_v21   ;;  %v61_v21 = vld [vmem:[%s5613_s1 + $0x58] sm:$0xff] }
  0x2a   :  { %611 = vperm.xlu1 %2931, %v38_v22   ;;  %606 = vperm.xlu0 %2930, %v37_v23   ;;  %v95_v22 = vmul.f32 %v3647_v48, %v57_v2  ;;  %v98_v23 = vmul.f32 %v3647_v48, %v60_v18 }
  0x2e   :  { %621 = vperm.xlu1 %2931, %v40_v24   ;;  %616 = vperm.xlu0 %2930, %v39_v25  }
  0x32   :  { %631 = vperm.xlu1 %2931, %v42_v26   ;;  %626 = vperm.xlu0 %2930, %v41_v27   ;;  %v62_v27 = vld [vmem:[%s5613_s1 + $0x60] sm:$0xff] }
  0x36   :  { %641 = vperm.xlu1 %2931, %v44_v28   ;;  %636 = vperm.xlu0 %2930, %v43_v29  }
  0x3a   :  { %651 = vperm.xlu1 %2931, %v46_v30   ;;  %646 = vperm.xlu0 %2930, %v45_v31   ;;  %v63_v30 = vld [vmem:[%s5613_s1 + $0x68] sm:$0xff]  ;;  %v97_v31 = vmul.f32 %v3647_v48, %v59_v12 }
  0x3e   :  { %661 = vperm.xlu1 %2931, %v48_v32   ;;  %656 = vperm.xlu0 %2930, %v47_v33   ;;  %v100_v32 = vmul.f32 %v3647_v48, %v62_v27 }
  0x5d   :  { %120 = vadd.xlane.f32.xlu0 %v88_v49  ;;  %v99_v49 = vmul.f32 %v3647_v48, %v61_v21 }
  0x61   :  { %124 = vadd.xlane.f32.xlu0 %v90_v58 }
  0x62   :  { %122 = vadd.xlane.f32.xlu1 %v89_v50 }
  0x65   :  { %126 = vadd.xlane.f32.xlu0 %v91_v3  ;;  %v68_v3 = vld [vmem:[%s5613_s1 + $0x90] sm:$0xff] }
  0x66   :  { %128 = vadd.xlane.f32.xlu1 %v92_v59  ;;  %v67_v59 = vld [vmem:[%s5613_s1 + $0x88] sm:$0xff] }
  0x69   :  { %130 = vadd.xlane.f32.xlu0 %v93_v13 }
  0x6a   :  { %132 = vadd.xlane.f32.xlu1 %v94_v4 }
  0x6d   :  { %134 = vadd.xlane.f32.xlu0 %v95_v22 }
  0x6e   :  { %136 = vadd.xlane.f32.xlu1 %v96_v14 }
  0x71   :  { %138 = vadd.xlane.f32.xlu0 %v97_v31  ;;  %v73_v31 = vld [vmem:[%s5613_s1 + $0xb8] sm:$0xff] }
  0x72   :  { %140 = vadd.xlane.f32.xlu1 %v98_v23 }
  0x75   :  { %142 = vadd.xlane.f32.xlu0 %v99_v49 }
  0x76   :  { %144 = vadd.xlane.f32.xlu1 %v100_v32 }
  0x81   :  { %v3622_v38 = vpop.permute.xlu1 %516  ;;  %v3624_v39 = vpop.permute.xlu0 %506 }
  0x82   :  { %5860 = vst [vmem:[#allocation3_spill] sm:$0xff] %v3622_v38  ;;  %5861 = vst [vmem:[#allocation4_spill] sm:$0xff] %v3624_v39  ;;  %v664_v46 = vmul.f32 %v3624_v39, %v50_v40  ;;  %v666_v52 = vmul.f32 %v3622_v38, %v52_v44  ;;  %v64_v44 = vld [vmem:[%s5613_s1 + $0x70] sm:$0xff] }
  0x83   :  { %v102_v50 = vmul.f32 %v3647_v48, %v64_v44 }
  0x85   :  { %v3632_v42 = vpop.permute.xlu1 %521  ;;  %v3634_v43 = vpop.permute.xlu0 %511  ;;  %148 = vadd.xlane.f32.xlu1 %v102_v50 }
  0x86   :  { %5862 = vst [vmem:[#allocation5_spill] sm:$0xff] %v3632_v42  ;;  %5863 = vst [vmem:[#allocation6_spill] sm:$0xff] %v3634_v43  ;;  %v665_v47 = vmul.f32 %v3634_v43, %v51_v41  ;;  %v667_v53 = vmul.f32 %v3632_v42, %v53_v45 }
  0x88   :  { %v2753_v51 = vpack.c.bf16 %v665_v47, %v664_v46  ;;  %v2756_v60 = vpack.c.bf16 %v667_v53, %v666_v52  ;;  %v65_v47 = vld [vmem:[%s5613_s1 + $0x78] sm:$0xff] }
  0x89   :  { %v3656_v55 = vpop.permute.xlu1 %531  ;;  %v3658_v56 = vpop.permute.xlu0 %526 }
  0x8a   :  { %5864 = vst [vmem:[#allocation7_spill] sm:$0xff] %v3656_v55  ;;  %5865 = vst [vmem:[#allocation8_spill] sm:$0xff] %v3658_v56  ;;  %2754 = vmatpush1.bf16.msra.mxu0 %v2753_v51  ;;  %2912 = vmatpush1.bf16.msra.mxu1 %v2753_v51  ;;  %v668_v61 = vmul.f32 %v3658_v56, %v54_v54  ;;  %v669_v62 = vmul.f32 %v3656_v55, %v55_v57  ;;  %v66_v54 = vld [vmem:[%s5613_s1 + $0x80] sm:$0xff] }
  0x8b   :  { %2755 = vmatprep.subr.bf16.mxu0 %v5616_v7  ;;  %2897 = vmatprep.subr.bf16.mxu1 %v5616_v7 }
  0x8c   :  { %v2759_v5 = vpack.c.bf16 %v669_v62, %v668_v61  ;;  %v104_v61 = vmul.f32 %v3647_v48, %v66_v54 }
  0x8d   :  { %v3672_v0 = vpop.permute.xlu1 %541  ;;  %v3674_v1 = vpop.permute.xlu0 %536 }
  0x8e   :  { %5866 = vst [vmem:[#allocation9_spill] sm:$0xff] %v3672_v0  ;;  %5867 = vst [vmem:[#allocation10_spill] sm:$0xff] %v3674_v1  ;;  %2757 = vmatpush1.bf16.msra.mxu0 %v2756_v60  ;;  %2913 = vmatpush1.bf16.msra.mxu1 %v2756_v60  ;;  %v670_v6 = vmul.f32 %v3674_v1, %v56_v63  ;;  %v671_v8 = vmul.f32 %v3672_v0, %v57_v2 }
  0x8f   :  { %2758 = vmatprep.subr.bf16.mxu0 %v5616_v7  ;;  %2898 = vmatprep.subr.bf16.mxu1 %v5616_v7  ;;  %v101_v60 = vmul.f32 %v3647_v48, %v63_v30 }
  0x90   :  { %v2762_v15 = vpack.c.bf16 %v671_v8, %v670_v6  ;;  %v69_v6 = vld [vmem:[%s5613_s1 + $0x98] sm:$0xff]  ;;  %152 = vadd.xlane.f32.xlu1 %v104_v61  ;;  %v103_v8 = vmul.f32 %v3647_v48, %v65_v47  ;;  %v76_v61 = vld [vmem:[%s5613_s1 + $0xd0] sm:$0xff] }
  0x91   :  { %v3688_v10 = vpop.permute.xlu1 %551  ;;  %v3690_v11 = vpop.permute.xlu0 %546  ;;  %146 = vadd.xlane.f32.xlu0 %v101_v60  ;;  %v107_v32 = vmul.f32 %v3647_v48, %v69_v6 }
  0x92   :  { %5868 = vst [vmem:[#allocation11_spill] sm:$0xff] %v3688_v10  ;;  %5869 = vst [vmem:[#allocation12_spill] sm:$0xff] %v3690_v11  ;;  %2760 = vmatpush1.bf16.msra.mxu0 %v2759_v5  ;;  %2914 = vmatpush1.bf16.msra.mxu1 %v2759_v5  ;;  %v672_v16 = vmul.f32 %v3690_v11, %v58_v9  ;;  %v673_v17 = vmul.f32 %v3688_v10, %v59_v12 }
  0x93   :  { %2761 = vmatprep.subr.bf16.mxu0 %v5616_v7  ;;  %2899 = vmatprep.subr.bf16.mxu1 %v5616_v7  ;;  %v106_v9 = vmul.f32 %v3647_v48, %v68_v3 }
  0x94   :  { %v2765_v24 = vpack.c.bf16 %v673_v17, %v672_v16 }
  0x95   :  { %v3704_v19 = vpop.permute.xlu1 %561  ;;  %v3706_v20 = vpop.permute.xlu0 %556  ;;  %150 = vadd.xlane.f32.xlu0 %v103_v8  ;;  %156 = vadd.xlane.f32.xlu1 %v106_v9 }
  0x96   :  { %5870 = vst [vmem:[#allocation13_spill] sm:$0xff] %v3704_v19  ;;  %5871 = vst [vmem:[#allocation14_spill] sm:$0xff] %v3706_v20  ;;  %2763 = vmatpush1.bf16.msra.mxu0 %v2762_v15  ;;  %2915 = vmatpush1.bf16.msra.mxu1 %v2762_v15  ;;  %v674_v25 = vmul.f32 %v3706_v20, %v60_v18  ;;  %v675_v26 = vmul.f32 %v3704_v19, %v61_v21  ;;  %v70_v15 = vld [vmem:[%s5613_s1 + $0xa0] sm:$0xff]  ;;  %v71_v18 = vld [vmem:[%s5613_s1 + $0xa8] sm:$0xff] }
  0x97   :  { %2764 = vmatprep.subr.bf16.mxu0 %v5616_v7  ;;  %2900 = vmatprep.subr.bf16.mxu1 %v5616_v7  ;;  %v105_v21 = vmul.f32 %v3647_v48, %v67_v59  ;;  %v108_v22 = vmul.f32 %v3647_v48, %v70_v15 }
  0x98   :  { %v2768_v33 = vpack.c.bf16 %v675_v26, %v674_v25  ;;  %v72_v26 = vld [vmem:[%s5613_s1 + $0xb0] sm:$0xff] }
  0x99   :  { %v3720_v28 = vpop.permute.xlu1 %571  ;;  %v3722_v29 = vpop.permute.xlu0 %566  ;;  %154 = vadd.xlane.f32.xlu0 %v105_v21  ;;  %160 = vadd.xlane.f32.xlu1 %v108_v22 }
  0x9a   :  { %5872 = vst [vmem:[#allocation15_spill] sm:$0xff] %v3720_v28  ;;  %5873 = vst [vmem:[#allocation16_spill] sm:$0xff] %v3722_v29  ;;  %2766 = vmatpush1.bf16.msra.mxu0 %v2765_v24  ;;  %2916 = vmatpush1.bf16.msra.mxu1 %v2765_v24  ;;  %v676_v40 = vmul.f32 %v3722_v29, %v62_v27  ;;  %v677_v41 = vmul.f32 %v3720_v28, %v63_v30 }
  0x9b   :  { %2767 = vmatprep.subr.bf16.mxu0 %v5616_v7  ;;  %2901 = vmatprep.subr.bf16.mxu1 %v5616_v7 }
  0x9c   :  { %v2771_v51 = vpack.c.bf16 %v677_v41, %v676_v40 }
  0x9d   :  { %v3736_v45 = vpop.permute.xlu1 %581  ;;  %v3738_v46 = vpop.permute.xlu0 %576  ;;  %158 = vadd.xlane.f32.xlu0 %v107_v32  ;;  %v3871_v32 = vld [vmem:[%s5613_s1 + $0xf0] sm:$0xff] }
  0x9e   :  { %5874 = vst [vmem:[#allocation17_spill] sm:$0xff] %v3736_v45  ;;  %5875 = vst [vmem:[#allocation18_spill] sm:$0xff] %v3738_v46  ;;  %2769 = vmatpush1.bf16.msra.mxu0 %v2768_v33  ;;  %2917 = vmatpush1.bf16.msra.mxu1 %v2768_v33  ;;  %v678_v52 = vmul.f32 %v3738_v46, %v64_v44  ;;  %v679_v53 = vmul.f32 %v3736_v45, %v65_v47  ;;  %v74_v47 = vld [vmem:[%s5613_s1 + $0xc0] sm:$0xff] }
  0x9f   :  { %2770 = vmatprep.subr.bf16.mxu0 %v5616_v7  ;;  %2902 = vmatprep.subr.bf16.mxu1 %v5616_v7  ;;  %v110_v33 = vmul.f32 %v3647_v48, %v72_v26 }
  0xa0   :  { %v2774_v62 = vpack.c.bf16 %v679_v53, %v678_v52  ;;  %v109_v52 = vmul.f32 %v3647_v48, %v71_v18  ;;  %v112_v53 = vmul.f32 %v3647_v48, %v74_v47 }
  0xa1   :  { %v3752_v57 = vpop.permute.xlu1 %591  ;;  %v3754_v58 = vpop.permute.xlu0 %586  ;;  %164 = vadd.xlane.f32.xlu1 %v110_v33  ;;  %v3876_v33 = vld [vmem:[%s5613_s1 + $0xf8] sm:$0xff] }
  0xa2   :  { %5876 = vst [vmem:[#allocation19_spill] sm:$0xff] %v3752_v57  ;;  %5877 = vst [vmem:[#allocation20_spill] sm:$0xff] %v3754_v58  ;;  %2772 = vmatpush1.bf16.msra.mxu0 %v2771_v51  ;;  %2918 = vmatpush1.bf16.msra.mxu1 %v2771_v51  ;;  %v680_v63 = vmul.f32 %v3754_v58, %v66_v54  ;;  %v681_v2 = vmul.f32 %v3752_v57, %v67_v59  ;;  %v75_v51 = vld [vmem:[%s5613_s1 + $0xc8] sm:$0xff] }
  0xa3   :  { %2773 = vmatprep.subr.bf16.mxu0 %v5616_v7  ;;  %2903 = vmatprep.subr.bf16.mxu1 %v5616_v7  ;;  %v113_v21 = vmul.f32 %v3647_v48, %v75_v51 }
  0xa4   :  { %v2777_v12 = vpack.c.bf16 %v681_v2, %v680_v63  ;;  %v77_v2 = vld [vmem:[%s5613_s1 + $0xd8] sm:$0xff]  ;;  %162 = vadd.xlane.f32.xlu0 %v109_v52  ;;  %v425_v52 = vld [vmem:[%s5612_s0 + $0x88] sm:$0xff] }
  0xa5   :  { %v3768_v4 = vpop.permute.xlu1 %601  ;;  %v3770_v5 = vpop.permute.xlu0 %596  ;;  %168 = vadd.xlane.f32.xlu1 %v112_v53 }
  0xa6   :  { %5878 = vst [vmem:[#allocation21_spill] sm:$0xff] %v3768_v4  ;;  %5879 = vst [vmem:[#allocation22_spill] sm:$0xff] %v3770_v5  ;;  %2775 = vmatpush1.bf16.msra.mxu0 %v2774_v62  ;;  %2919 = vmatpush1.bf16.msra.mxu1 %v2774_v62  ;;  %v682_v13 = vmul.f32 %v3770_v5, %v68_v3  ;;  %v683_v14 = vmul.f32 %v3768_v4, %v69_v6 }
  0xa7   :  { %2776 = vmatprep.subr.bf16.mxu0 %v5616_v7  ;;  %2904 = vmatprep.subr.bf16.mxu1 %v5616_v7  ;;  %v111_v3 = vmul.f32 %v3647_v48, %v73_v31  ;;  %v114_v6 = vmul.f32 %v3647_v48, %v76_v61 }
  0xa8   :  { %v2780_v23 = vpack.c.bf16 %v683_v14, %v682_v13  ;;  %v78_v13 = vld [vmem:[%s5613_s1 + $0xe0] sm:$0xff] }
  0xa9   :  { %v3784_v16 = vpop.permute.xlu1 %611  ;;  %v3786_v17 = vpop.permute.xlu0 %606  ;;  %166 = vadd.xlane.f32.xlu0 %v111_v3  ;;  %172 = vadd.xlane.f32.xlu1 %v114_v6  ;;  %v116_v22 = vmul.f32 %v3647_v48, %v78_v13  ;;  %v426_v3 = vld [vmem:[%s5612_s0 + $0x90] sm:$0xff] }
  0xaa   :  { %5880 = vst [vmem:[#allocation23_spill] sm:$0xff] %v3784_v16  ;;  %5881 = vst [vmem:[#allocation24_spill] sm:$0xff] %v3786_v17  ;;  %2778 = vmatpush1.bf16.msra.mxu0 %v2777_v12  ;;  %2920 = vmatpush1.bf16.msra.mxu1 %v2777_v12  ;;  %v684_v24 = vmul.f32 %v3786_v17, %v70_v15  ;;  %v685_v25 = vmul.f32 %v3784_v16, %v71_v18  ;;  %v3855_v18 = vld [vmem:[%s5613_s1 + $0xe8] sm:$0xff] }
  0xab   :  { %2779 = vmatprep.subr.bf16.mxu0 %v5616_v7  ;;  %2905 = vmatprep.subr.bf16.mxu1 %v5616_v7 }
  0xac   :  { %v2783_v40 = vpack.c.bf16 %v685_v25, %v684_v24 }
  0xad   :  { %v3800_v27 = vpop.permute.xlu1 %621  ;;  %v3802_v30 = vpop.permute.xlu0 %616  ;;  %170 = vadd.xlane.f32.xlu0 %v113_v21  ;;  %176 = vadd.xlane.f32.xlu1 %v116_v22  ;;  %v3933_v21 = vunpack.c.l.bf16 %v426_v3 }
  0xae   :  { %5882 = vst [vmem:[#allocation25_spill] sm:$0xff] %v3800_v27  ;;  %5883 = vst [vmem:[#allocation26_spill] sm:$0xff] %v3802_v30  ;;  %2781 = vmatpush1.bf16.msra.mxu0 %v2780_v23  ;;  %2921 = vmatpush1.bf16.msra.mxu1 %v2780_v23  ;;  %v686_v41 = vmul.f32 %v3802_v30, %v72_v26  ;;  %v687_v44 = vmul.f32 %v3800_v27, %v73_v31 }
  0xaf   :  { %2782 = vmatprep.subr.bf16.mxu0 %v5616_v7  ;;  %2906 = vmatprep.subr.bf16.mxu1 %v5616_v7  ;;  %5896 = vst [vmem:[#allocation39_spill] sm:$0xff] %v3933_v21 }
  0xb0   :  { %v2786_v54 = vpack.c.bf16 %v687_v44, %v686_v41 }
  0xb1   :  { %v3816_v49 = vpop.permute.xlu1 %631  ;;  %v3818_v50 = vpop.permute.xlu0 %626 }
  0xb2   :  { %5884 = vst [vmem:[#allocation27_spill] sm:$0xff] %v3816_v49  ;;  %5885 = vst [vmem:[#allocation28_spill] sm:$0xff] %v3818_v50  ;;  %2784 = vmatpush1.bf16.msra.mxu0 %v2783_v40  ;;  %2922 = vmatpush1.bf16.msra.mxu1 %v2783_v40  ;;  %v688_v59 = vmul.f32 %v3818_v50, %v74_v47  ;;  %v689_v60 = vmul.f32 %v3816_v49, %v75_v51  ;;  %v409_v51 = vld [vmem:[%s5612_s0 + $0x8] sm:$0xff] }
  0xb3   :  { %2785 = vmatprep.subr.bf16.mxu0 %v5616_v7  ;;  %2907 = vmatprep.subr.bf16.mxu1 %v5616_v7  ;;  %v115_v40 = vmul.f32 %v3647_v48, %v77_v2 }
  0xb4   :  { %v2789_v8 = vpack.c.bf16 %v689_v60, %v688_v59  ;;  %v3897_v59 = vunpack.c.l.bf16 %v3612_v35  ;;  %v3899_v60 = vunpack.c.h.bf16 %v409_v51  ;;  %v3915_v35 = vunpack.c.l.bf16 %v425_v52 }
  0xb5   :  { %v3832_v62 = vpop.permute.xlu1 %641  ;;  %v3834_v63 = vpop.permute.xlu0 %636  ;;  %174 = vadd.xlane.f32.xlu0 %v115_v40 }
  0xb6   :  { %5886 = vst [vmem:[#allocation29_spill] sm:$0xff] %v3832_v62  ;;  %5887 = vst [vmem:[#allocation30_spill] sm:$0xff] %v3834_v63  ;;  %2787 = vmatpush1.bf16.msra.mxu0 %v2786_v54  ;;  %2923 = vmatpush1.bf16.msra.mxu1 %v2786_v54  ;;  %v690_v9 = vmul.f32 %v3834_v63, %v76_v61  ;;  %v691_v12 = vmul.f32 %v3832_v62, %v77_v2  ;;  %v3894_v54 = vunpack.c.l.bf16 %v3607_v34  ;;  %v410_v2 = vld [vmem:[%s5612_s0 + $0x10] sm:$0xff] }
  0xb7   :  { %2788 = vmatprep.subr.bf16.mxu0 %v5616_v7  ;;  %2908 = vmatprep.subr.bf16.mxu1 %v5616_v7  ;;  %5892 = vst [vmem:[#allocation35_spill] sm:$0xff] %v3897_v59  ;;  %v3901_v61 = vunpack.c.h.bf16 %v425_v52  ;;  %v3913_v34 = vunpack.c.l.bf16 %v409_v51  ;;  %5894 = vst [vmem:[#allocation37_spill] sm:$0xff] %v3915_v35  ;;  %v3919_v6 = vunpack.c.h.bf16 %v410_v2  ;;  %v413_v51 = vld [vmem:[%s5612_s0 + $0x28] sm:$0xff] }
  0xb8   :  { %v2792_v23 = vpack.c.bf16 %v691_v12, %v690_v9  ;;  %v411_v9 = vld [vmem:[%s5612_s0 + $0x18] sm:$0xff]  ;;  %v429_v52 = vld [vmem:[%s5612_s0 + $0xa8] sm:$0xff] }
  0xb9   :  { %v3848_v14 = vpop.permute.xlu1 %651  ;;  %v3850_v15 = vpop.permute.xlu0 %646  ;;  %5893 = vst [vmem:[#allocation36_spill] sm:$0xff] %v3901_v61  ;;  %v427_v12 = vld [vmem:[%s5612_s0 + $0x98] sm:$0xff]  ;;  %v3937_v22 = vunpack.c.h.bf16 %v411_v9  ;;  %v3949_v40 = vunpack.c.l.bf16 %v411_v9  ;;  %v3975_v9 = vunpack.c.h.bf16 %v429_v52 }
  0xba   :  { %5888 = vst [vmem:[#allocation31_spill] sm:$0xff] %v3848_v14  ;;  %5889 = vst [vmem:[#allocation32_spill] sm:$0xff] %v3850_v15  ;;  %2790 = vmatpush1.bf16.msra.mxu0 %v2789_v8  ;;  %2924 = vmatpush1.bf16.msra.mxu1 %v2789_v8  ;;  %v692_v24 = vmul.f32 %v3850_v15, %v78_v13  ;;  %v693_v25 = vmul.f32 %v3848_v14, %v3855_v18  ;;  %v3921_v8 = vunpack.c.h.bf16 %v426_v3 }
  0xbb   :  { %2791 = vmatprep.subr.bf16.mxu0 %v5616_v7  ;;  %2909 = vmatprep.subr.bf16.mxu1 %v5616_v7  ;;  %v3931_v13 = vunpack.c.l.bf16 %v410_v2  ;;  %5898 = vst [vmem:[#allocation41_spill] sm:$0xff] %v3949_v40  ;;  %v3973_v3 = vunpack.c.h.bf16 %v413_v51  ;;  %5905 = vst [vmem:[#allocation48_spill] sm:$0xff] %v3975_v9 }
  0xbc   :  { %v2795_v41 = vpack.c.bf16 %v693_v25, %v692_v24  ;;  %5895 = vst [vmem:[#allocation38_spill] sm:$0xff] %v3921_v8  ;;  %v412_v24 = vld [vmem:[%s5612_s0 + $0x20] sm:$0xff] }
  0xbd   :  { %v3864_v26 = vpop.permute.xlu1 %661  ;;  %v3866_v31 = vpop.permute.xlu0 %656  ;;  %v428_v25 = vld [vmem:[%s5612_s0 + $0xa0] sm:$0xff]  ;;  %5904 = vst [vmem:[#allocation47_spill] sm:$0xff] %v3973_v3 }
  0xbe   :  { %5890 = vst [vmem:[#allocation33_spill] sm:$0xff] %v3864_v26  ;;  %5891 = vst [vmem:[#allocation34_spill] sm:$0xff] %v3866_v31  ;;  %2793 = vmatpush1.bf16.msra.mxu0 %v2792_v23  ;;  %2925 = vmatpush1.bf16.msra.mxu1 %v2792_v23  ;;  %v694_v44 = vmul.f32 %v3866_v31, %v3871_v32  ;;  %v695_v47 = vmul.f32 %v3864_v26, %v3876_v33  ;;  %v3939_v23 = vunpack.c.h.bf16 %v427_v12 }
  0xbf   :  { %2794 = vmatprep.subr.bf16.mxu0 %v5616_v7  ;;  %2910 = vmatprep.subr.bf16.mxu1 %v5616_v7  ;;  %v3969_v2 = vunpack.c.l.bf16 %v428_v25 }
  0xc0   :  { %v2798_v53 = vpack.c.bf16 %v695_v47, %v694_v44  ;;  %5897 = vst [vmem:[#allocation40_spill] sm:$0xff] %v3939_v23  ;;  %v3955_v44 = vunpack.c.h.bf16 %v412_v24  ;;  %v3957_v47 = vunpack.c.h.bf16 %v428_v25  ;;  %v3987_v25 = vunpack.c.l.bf16 %v429_v52 }
  0xc1   :  { %5903 = vst [vmem:[#allocation46_spill] sm:$0xff] %v3969_v2 }
  0xc2   :  { %2796 = vmatpush1.bf16.msra.mxu0 %v2795_v41  ;;  %2926 = vmatpush1.bf16.msra.mxu1 %v2795_v41  ;;  %v3951_v41 = vunpack.c.l.bf16 %v427_v12  ;;  %5900 = vst [vmem:[#allocation43_spill] sm:$0xff] %v3955_v44  ;;  %5901 = vst [vmem:[#allocation44_spill] sm:$0xff] %v3957_v47  ;;  %v414_v12 = vld [vmem:[%s5612_s0 + $0x30] sm:$0xff] }
  0xc3   :  { %2797 = vmatprep.subr.bf16.mxu0 %v5616_v7  ;;  %2911 = vmatprep.subr.bf16.mxu1 %v5616_v7  ;;  %5907 = vst [vmem:[#allocation50_spill] sm:$0xff] %v3987_v25 }
  0xc4   :  { %5899 = vst [vmem:[#allocation42_spill] sm:$0xff] %v3951_v41 }
  0xc6   :  { %2799 = vmatpush1.bf16.msra.mxu0 %v2798_v53  ;;  %2927 = vmatpush1.bf16.msra.mxu1 %v2798_v53  ;;  %v3967_v53 = vunpack.c.l.bf16 %v412_v24  ;;  %v3985_v24 = vunpack.c.l.bf16 %v413_v51  ;;  %v4003_v51 = vunpack.c.l.bf16 %v414_v12 }
  0xc7   :  { %2800 = vmatprep.subr.bf16.mxu1 %v5616_v7  ;;  %2848 = vmatprep.subr.bf16.mxu0 %v5616_v7  ;;  %v430_v7 = vld [vmem:[%s5612_s0 + $0xb0] sm:$0xff] }
  0xc8   :  { %5902 = vst [vmem:[#allocation45_spill] sm:$0xff] %v3967_v53  ;;  %5906 = vst [vmem:[#allocation49_spill] sm:$0xff] %v3985_v24  ;;  %v4005_v52 = vunpack.c.l.bf16 %v430_v7 }
  0xc9   :  { %761 = vmatmul.mubr.f32.vlgmr.msra.gmra.mrb[0].mxu0 %v3894_v54  ;;  %841 = vmatmul.mubr.f32.vlgmr.msra.gmra.mrb[0].mxu1 %v3897_v59  ;;  %5910 = vst [vmem:[#allocation53_spill] sm:$0xff] %v4003_v51 }
  0xca   :  { %765 = vmatprep.mubr.f32.mxu0 %v3899_v60  ;;  %845 = vmatprep.mubr.f32.mxu1 %v3901_v61  ;;  %5911 = vst [vmem:[#allocation54_spill] sm:$0xff] %v4005_v52  ;;  %v417_v61 = vld [vmem:[%s5612_s0 + $0x48] sm:$0xff] }
  0xcd   :  { %766 = vmatmul.mubr.f32.gmra.mrb[2].mxu0 %v3913_v34  ;;  %846 = vmatmul.mubr.f32.gmra.mrb[2].mxu1 %v3915_v35 }
  0xce   :  { %770 = vmatprep.mubr.f32.mxu0 %v3919_v6  ;;  %850 = vmatprep.mubr.f32.mxu1 %v3921_v8  ;;  %v416_v8 = vld [vmem:[%s5612_s0 + $0x40] sm:$0xff] }
  0xd1   :  { %771 = vmatmul.mubr.f32.gmra.mrb[4].mxu0 %v3931_v13  ;;  %851 = vmatmul.mubr.f32.gmra.mrb[4].mxu1 %v3933_v21 }
  0xd2   :  { %775 = vmatprep.mubr.f32.mxu0 %v3937_v22  ;;  %855 = vmatprep.mubr.f32.mxu1 %v3939_v23  ;;  %v415_v23 = vld [vmem:[%s5612_s0 + $0x38] sm:$0xff] }
  0xd5   :  { %776 = vmatmul.mubr.f32.gmra.mrb[6].mxu0 %v3949_v40  ;;  %856 = vmatmul.mubr.f32.gmra.mrb[6].mxu1 %v3951_v41  ;;  %v3993_v41 = vunpack.c.h.bf16 %v430_v7  ;;  %v4021_v7 = vunpack.c.l.bf16 %v415_v23 }
  0xd6   :  { %780 = vmatprep.mubr.f32.mxu0 %v3955_v44  ;;  %860 = vmatprep.mubr.f32.mxu1 %v3957_v47  ;;  %v3991_v47 = vunpack.c.h.bf16 %v414_v12 }
  0xd7   :  { %5909 = vst [vmem:[#allocation52_spill] sm:$0xff] %v3993_v41  ;;  %5914 = vst [vmem:[#allocation57_spill] sm:$0xff] %v4021_v7 }
  0xd8   :  { %5908 = vst [vmem:[#allocation51_spill] sm:$0xff] %v3991_v47 }
  0xd9   :  { %781 = vmatmul.mubr.f32.gmra.mrb[8].mxu0 %v3967_v53  ;;  %861 = vmatmul.mubr.f32.gmra.mrb[8].mxu1 %v3969_v2  ;;  %v431_v2 = vld [vmem:[%s5612_s0 + $0xb8] sm:$0xff] }
  0xda   :  { %785 = vmatprep.mubr.f32.mxu0 %v3973_v3  ;;  %865 = vmatprep.mubr.f32.mxu1 %v3975_v9  ;;  %v4009_v9 = vunpack.c.h.bf16 %v415_v23  ;;  %v4011_v21 = vunpack.c.h.bf16 %v431_v2  ;;  %v4023_v12 = vunpack.c.l.bf16 %v431_v2  ;;  %v4039_v23 = vunpack.c.l.bf16 %v416_v8 }
  0xdc   :  { %5912 = vst [vmem:[#allocation55_spill] sm:$0xff] %v4009_v9  ;;  %5913 = vst [vmem:[#allocation56_spill] sm:$0xff] %v4011_v21 }
  0xdd   :  { %786 = vmatmul.mubr.f32.gmra.mrb[10].mxu0 %v3985_v24  ;;  %866 = vmatmul.mubr.f32.gmra.mrb[10].mxu1 %v3987_v25  ;;  %v432_v25 = vld [vmem:[%s5612_s0 + $0xc0] sm:$0xff]  ;;  %5915 = vst [vmem:[#allocation58_spill] sm:$0xff] %v4023_v12  ;;  %5918 = vst [vmem:[#allocation61_spill] sm:$0xff] %v4039_v23 }
  0xde   :  { %790 = vmatprep.mubr.f32.mxu0 %v3991_v47  ;;  %870 = vmatprep.mubr.f32.mxu1 %v3993_v41  ;;  %v4027_v41 = vunpack.c.h.bf16 %v416_v8  ;;  %v4029_v35 = vunpack.c.h.bf16 %v432_v25  ;;  %v4041_v2 = vunpack.c.l.bf16 %v432_v25  ;;  %v4057_v8 = vunpack.c.l.bf16 %v417_v61 }
  0xe0   :  { %5916 = vst [vmem:[#allocation59_spill] sm:$0xff] %v4027_v41  ;;  %5917 = vst [vmem:[#allocation60_spill] sm:$0xff] %v4029_v35 }
  0xe1   :  { %791 = vmatmul.mubr.f32.gmra.mrb[12].mxu0 %v4003_v51  ;;  %871 = vmatmul.mubr.f32.gmra.mrb[12].mxu1 %v4005_v52  ;;  %v433_v52 = vld [vmem:[%s5612_s0 + $0xc8] sm:$0xff]  ;;  %5919 = vst [vmem:[#allocation62_spill] sm:$0xff] %v4041_v2  ;;  %5922 = vst [vmem:[#allocation65_spill] sm:$0xff] %v4057_v8 }
  0xe2   :  { %795 = vmatprep.mubr.f32.mxu0 %v4009_v9  ;;  %875 = vmatprep.mubr.f32.mxu1 %v4011_v21  ;;  %v4045_v21 = vunpack.c.h.bf16 %v417_v61  ;;  %v4047_v59 = vunpack.c.h.bf16 %v433_v52  ;;  %v4059_v25 = vunpack.c.l.bf16 %v433_v52  ;;  %v4075_v61 = vunpack.c.l.bf16 %v418_v37 }
  0xe4   :  { %5920 = vst [vmem:[#allocation63_spill] sm:$0xff] %v4045_v21  ;;  %5921 = vst [vmem:[#allocation64_spill] sm:$0xff] %v4047_v59 }
  0xe5   :  { %796 = vmatmul.mubr.f32.gmra.mrb[14].mxu0 %v4021_v7  ;;  %876 = vmatmul.mubr.f32.gmra.mrb[14].mxu1 %v4023_v12  ;;  %v434_v12 = vld [vmem:[%s5612_s0 + $0xd0] sm:$0xff]  ;;  %5923 = vst [vmem:[#allocation66_spill] sm:$0xff] %v4059_v25  ;;  %v419_v7 = vld [vmem:[%s5612_s0 + $0x58] sm:$0xff]  ;;  %5926 = vst [vmem:[#allocation69_spill] sm:$0xff] %v4075_v61 }
  0xe6   :  { %800 = vmatprep.mubr.f32.mxu0 %v4027_v41  ;;  %880 = vmatprep.mubr.f32.mxu1 %v4029_v35  ;;  %v4063_v35 = vunpack.c.h.bf16 %v418_v37  ;;  %v4065_v41 = vunpack.c.h.bf16 %v434_v12  ;;  %v4077_v52 = vunpack.c.l.bf16 %v434_v12  ;;  %v4093_v37 = vunpack.c.l.bf16 %v419_v7 }
  0xe8   :  { %5924 = vst [vmem:[#allocation67_spill] sm:$0xff] %v4063_v35  ;;  %5925 = vst [vmem:[#allocation68_spill] sm:$0xff] %v4065_v41 }
  0xe9   :  { %801 = vmatmul.mubr.f32.gmra.mrb[16].mxu0 %v4039_v23  ;;  %881 = vmatmul.mubr.f32.gmra.mrb[16].mxu1 %v4041_v2  ;;  %v435_v2 = vld [vmem:[%s5612_s0 + $0xd8] sm:$0xff]  ;;  %5927 = vst [vmem:[#allocation70_spill] sm:$0xff] %v4077_v52  ;;  %v420_v23 = vld [vmem:[%s5612_s0 + $0x60] sm:$0xff]  ;;  %5930 = vst [vmem:[#allocation73_spill] sm:$0xff] %v4093_v37 }
  0xea   :  { %805 = vmatprep.mubr.f32.mxu0 %v4045_v21  ;;  %885 = vmatprep.mubr.f32.mxu1 %v4047_v59  ;;  %v4081_v59 = vunpack.c.h.bf16 %v419_v7  ;;  %v4083_v21 = vunpack.c.h.bf16 %v435_v2  ;;  %v4095_v12 = vunpack.c.l.bf16 %v435_v2  ;;  %v4111_v7 = vunpack.c.l.bf16 %v420_v23 }
  0xec   :  { %5928 = vst [vmem:[#allocation71_spill] sm:$0xff] %v4081_v59  ;;  %5929 = vst [vmem:[#allocation72_spill] sm:$0xff] %v4083_v21 }
  0xed   :  { %806 = vmatmul.mubr.f32.gmra.mrb[18].mxu0 %v4057_v8  ;;  %886 = vmatmul.mubr.f32.gmra.mrb[18].mxu1 %v4059_v25  ;;  %v436_v25 = vld [vmem:[%s5612_s0 + $0xe0] sm:$0xff]  ;;  %5931 = vst [vmem:[#allocation74_spill] sm:$0xff] %v4095_v12  ;;  %v421_v8 = vld [vmem:[%s5612_s0 + $0x68] sm:$0xff]  ;;  %5934 = vst [vmem:[#allocation77_spill] sm:$0xff] %v4111_v7 }
  0xee   :  { %810 = vmatprep.mubr.f32.mxu0 %v4063_v35  ;;  %890 = vmatprep.mubr.f32.mxu1 %v4065_v41  ;;  %v4099_v41 = vunpack.c.h.bf16 %v420_v23  ;;  %v4101_v35 = vunpack.c.h.bf16 %v436_v25  ;;  %v4113_v2 = vunpack.c.l.bf16 %v436_v25  ;;  %v4129_v23 = vunpack.c.l.bf16 %v421_v8 }
  0xf0   :  { %5932 = vst [vmem:[#allocation75_spill] sm:$0xff] %v4099_v41  ;;  %5933 = vst [vmem:[#allocation76_spill] sm:$0xff] %v4101_v35 }
  0xf1   :  { %811 = vmatmul.mubr.f32.gmra.mrb[20].mxu0 %v4075_v61  ;;  %891 = vmatmul.mubr.f32.gmra.mrb[20].mxu1 %v4077_v52  ;;  %v437_v52 = vld [vmem:[%s5612_s0 + $0xe8] sm:$0xff]  ;;  %5935 = vst [vmem:[#allocation78_spill] sm:$0xff] %v4113_v2  ;;  %v422_v61 = vld [vmem:[%s5612_s0 + $0x70] sm:$0xff]  ;;  %5938 = vst [vmem:[#allocation81_spill] sm:$0xff] %v4129_v23 }
  0xf2   :  { %815 = vmatprep.mubr.f32.mxu0 %v4081_v59  ;;  %895 = vmatprep.mubr.f32.mxu1 %v4083_v21  ;;  %v4117_v21 = vunpack.c.h.bf16 %v421_v8  ;;  %v4119_v59 = vunpack.c.h.bf16 %v437_v52  ;;  %v4131_v25 = vunpack.c.l.bf16 %v437_v52  ;;  %v4147_v8 = vunpack.c.l.bf16 %v422_v61 }
  0xf4   :  { %5936 = vst [vmem:[#allocation79_spill] sm:$0xff] %v4117_v21  ;;  %5937 = vst [vmem:[#allocation80_spill] sm:$0xff] %v4119_v59 }
  0xf5   :  { %816 = vmatmul.mubr.f32.gmra.mrb[22].mxu0 %v4093_v37  ;;  %896 = vmatmul.mubr.f32.gmra.mrb[22].mxu1 %v4095_v12  ;;  %v438_v12 = vld [vmem:[%s5612_s0 + $0xf0] sm:$0xff]  ;;  %5939 = vst [vmem:[#allocation82_spill] sm:$0xff] %v4131_v25  ;;  %v423_v37 = vld [vmem:[%s5612_s0 + $0x78] sm:$0xff]  ;;  %5942 = vst [vmem:[#allocation85_spill] sm:$0xff] %v4147_v8 }
  0xf6   :  { %820 = vmatprep.mubr.f32.mxu0 %v4099_v41  ;;  %900 = vmatprep.mubr.f32.mxu1 %v4101_v35  ;;  %v4135_v35 = vunpack.c.h.bf16 %v422_v61  ;;  %v4137_v41 = vunpack.c.h.bf16 %v438_v12  ;;  %v4149_v52 = vunpack.c.l.bf16 %v438_v12  ;;  %v118_v61 = vmul.f32 %v3647_v48, %v3871_v32 }
  0xf7   :  { %v119_v12 = vmul.f32 %v3647_v48, %v3876_v33 }
  0xf8   :  { %5940 = vst [vmem:[#allocation83_spill] sm:$0xff] %v4135_v35  ;;  %5941 = vst [vmem:[#allocation84_spill] sm:$0xff] %v4137_v41  ;;  %180 = vadd.xlane.f32.xlu1 %v118_v61 }
  0xf9   :  { %821 = vmatmul.mubr.f32.gmra.mrb[24].mxu0 %v4111_v7  ;;  %901 = vmatmul.mubr.f32.gmra.mrb[24].mxu1 %v4113_v2  ;;  %v439_v2 = vld [vmem:[%s5612_s0 + $0xf8] sm:$0xff]  ;;  %5943 = vst [vmem:[#allocation86_spill] sm:$0xff] %v4149_v52  ;;  %v4159_v7 = vunpack.c.l.bf16 %v423_v37 }
  0xfa   :  { %825 = vmatprep.mubr.f32.mxu0 %v4117_v21  ;;  %905 = vmatprep.mubr.f32.mxu1 %v4119_v59  ;;  %v4153_v59 = vunpack.c.h.bf16 %v423_v37  ;;  %v4155_v21 = vunpack.c.h.bf16 %v439_v2  ;;  %v117_v37 = vmul.f32 %v3647_v48, %v3855_v18 }
  0xfb   :  { %5946 = vst [vmem:[#allocation89_spill] sm:$0xff] %v4159_v7 }
  0xfc   :  { %5944 = vst [vmem:[#allocation87_spill] sm:$0xff] %v4153_v59  ;;  %5945 = vst [vmem:[#allocation88_spill] sm:$0xff] %v4155_v21  ;;  %178 = vadd.xlane.f32.xlu0 %v117_v37 }
  0xfd   :  { %826 = vmatmul.mubr.f32.gmra.mrb[26].mxu0 %v4129_v23  ;;  %906 = vmatmul.mubr.f32.gmra.mrb[26].mxu1 %v4131_v25  ;;  %v4161_v23 = vunpack.c.l.bf16 %v439_v2 }
  0xfe   :  { %830 = vmatprep.mubr.f32.mxu0 %v4135_v35  ;;  %910 = vmatprep.mubr.f32.mxu1 %v4137_v41 }
  0xff   :  { %5947 = vst [vmem:[#allocation90_spill] sm:$0xff] %v4161_v23 }
 0x100   :  { %182 = vadd.xlane.f32.xlu0 %v119_v12 }
 0x101   :  { %831 = vmatmul.mubr.f32.gmra.mrb[28].mxu0 %v4147_v8  ;;  %911 = vmatmul.mubr.f32.gmra.mrb[28].mxu1 %v4149_v52 }
 0x102   :  { %835 = vmatprep.mubr.f32.mxu0 %v4153_v59  ;;  %915 = vmatprep.mubr.f32.mxu1 %v4155_v21 }
 0x105   :  { %836 = vmatmul.mubr.f32.gmra.mrb[30].mxu0 %v4159_v7  ;;  %916 = vmatmul.mubr.f32.gmra.mrb[30].mxu1 %v4161_v23 }
 0x106   :  { %1401 = vmatprep.mubr.f32.mxu1 %v3615_v36  ;;  %2042 = vmatprep.mubr.f32.mxu0 %v3615_v36 }
 0x19c   :  { %v762_v2 = vpop.f32.mrb[0].mxu0  ;;  %v842_v21 = vpop.f32.mrb[0].mxu1 }
 0x19d   :  { %v4176_v23 = vmul.f32 %v762_v2, %v3624_v39  ;;  %v764_v52 = vpop.f32.mrb[1].mxu0  ;;  %v844_v41 = vpop.f32.mrb[1].mxu1  ;;  %v4179_v36 = vmul.f32 %v842_v21, %v3754_v58 }
 0x19f   :  { %5948 = vst [vmem:[#allocation91_spill] sm:$0xff] %v4176_v23  ;;  %5949 = vst [vmem:[#allocation92_spill] sm:$0xff] %v4179_v36  ;;  %v953_v32 = vmul.f32 %v3647_v48, %v4176_v23  ;;  %v1305_v2 = vmul.f32 %v4176_v23, %v3624_v39  ;;  %v969_v21 = vmul.f32 %v3647_v48, %v4179_v36 }
 0x1a0   :  { %v767_v18 = vpop.f32.mrb[2].mxu0  ;;  %v847_v61 = vpop.f32.mrb[2].mxu1 }
 0x1a1   :  { %v4184_v37 = vmul.f32 %v767_v18, %v3634_v43  ;;  %985 = vadd.xlane.f32.xlu1 %v953_v32  ;;  %v769_v33 = vpop.f32.mrb[3].mxu0  ;;  %v849_v12 = vpop.f32.mrb[3].mxu1  ;;  %v4195_v25 = vmul.f32 %v847_v61, %v3752_v57 }
 0x1a3   :  { %5950 = vst [vmem:[#allocation93_spill] sm:$0xff] %v4184_v37  ;;  %v1306_v41 = vmul.f32 %v4184_v37, %v3634_v43  ;;  %v954_v52 = vmul.f32 %v3647_v48, %v4184_v37  ;;  %5951 = vst [vmem:[#allocation94_spill] sm:$0xff] %v4195_v25  ;;  %v970_v59 = vmul.f32 %v3647_v48, %v4195_v25 }
 0x1a4   :  { %v772_v18 = vpop.f32.mrb[4].mxu0  ;;  %v852_v7 = vpop.f32.mrb[4].mxu1 }
 0x1a5   :  { %v2801_v32 = vpack.c.bf16 %v1306_v41, %v1305_v2  ;;  %v4198_v33 = vmul.f32 %v772_v18, %v3622_v38  ;;  %1017 = vadd.xlane.f32.xlu1 %v969_v21  ;;  %v774_v12 = vpop.f32.mrb[5].mxu0  ;;  %v854_v23 = vpop.f32.mrb[5].mxu1  ;;  %987 = vadd.xlane.f32.xlu0 %v954_v52  ;;  %v4201_v43 = vmul.f32 %v852_v7, %v3770_v5  ;;  %v5954_v2 = vmov 0.0|0.0  }
 0x1a7   :  { %5952 = vst [vmem:[#allocation95_spill] sm:$0xff] %v4198_v33  ;;  %5953 = vst [vmem:[#allocation96_spill] sm:$0xff] %v4201_v43  ;;  %2802 = vmatpush1.bf16.msra.mxu1 %v2801_v32  ;;  %v955_v37 = vmul.f32 %v3647_v48, %v4198_v33  ;;  %v1307_v7 = vmul.f32 %v4198_v33, %v3622_v38  ;;  %v971_v18 = vmul.f32 %v3647_v48, %v4201_v43 }
 0x1a8   :  { %v777_v39 = vpop.f32.mrb[6].mxu0  ;;  %v857_v61 = vpop.f32.mrb[6].mxu1  ;;  %2803 = vmatprep.subr.bf16.mxu1 %v5954_v2 }
 0x1a9   :  { %v4209_v41 = vmul.f32 %v777_v39, %v3632_v42  ;;  %989 = vadd.xlane.f32.xlu1 %v955_v37  ;;  %v779_v23 = vpop.f32.mrb[7].mxu0  ;;  %v859_v21 = vpop.f32.mrb[7].mxu1  ;;  %1019 = vadd.xlane.f32.xlu0 %v970_v59  ;;  %v4220_v12 = vmul.f32 %v857_v61, %v3768_v4 }
 0x1ab   :  { %5955 = vst [vmem:[#allocation97_spill] sm:$0xff] %v4209_v41  ;;  %v1308_v52 = vmul.f32 %v4209_v41, %v3632_v42  ;;  %v956_v32 = vmul.f32 %v3647_v48, %v4209_v41  ;;  %5956 = vst [vmem:[#allocation98_spill] sm:$0xff] %v4220_v12  ;;  %v972_v8 = vmul.f32 %v3647_v48, %v4220_v12 }
 0x1ac   :  { %v782_v39 = vpop.f32.mrb[8].mxu0  ;;  %v862_v37 = vpop.f32.mrb[8].mxu1 }
 0x1ad   :  { %v2804_v23 = vpack.c.bf16 %v1308_v52, %v1307_v7  ;;  %v4223_v59 = vmul.f32 %v782_v39, %v3658_v56  ;;  %1021 = vadd.xlane.f32.xlu1 %v971_v18  ;;  %v784_v21 = vpop.f32.mrb[9].mxu0  ;;  %v864_v33 = vpop.f32.mrb[9].mxu1  ;;  %991 = vadd.xlane.f32.xlu0 %v956_v32  ;;  %v4226_v42 = vmul.f32 %v862_v37, %v3786_v17 }
 0x1af   :  { %5957 = vst [vmem:[#allocation99_spill] sm:$0xff] %v4223_v59  ;;  %5958 = vst [vmem:[#allocation100_spill] sm:$0xff] %v4226_v42  ;;  %2805 = vmatpush1.bf16.msra.mxu1 %v2804_v23  ;;  %v957_v41 = vmul.f32 %v3647_v48, %v4223_v59  ;;  %v1309_v18 = vmul.f32 %v4223_v59, %v3658_v56  ;;  %v973_v39 = vmul.f32 %v3647_v48, %v4226_v42 }
 0x1b0   :  { %v787_v38 = vpop.f32.mrb[10].mxu0  ;;  %v867_v61 = vpop.f32.mrb[10].mxu1  ;;  %2806 = vmatprep.subr.bf16.mxu1 %v5954_v2 }
 0x1b1   :  { %v4234_v7 = vmul.f32 %v787_v38, %v3656_v55  ;;  %993 = vadd.xlane.f32.xlu1 %v957_v41  ;;  %v789_v33 = vpop.f32.mrb[11].mxu0  ;;  %v869_v52 = vpop.f32.mrb[11].mxu1  ;;  %1023 = vadd.xlane.f32.xlu0 %v972_v8  ;;  %v4245_v23 = vmul.f32 %v867_v61, %v3784_v16 }
 0x1b3   :  { %5959 = vst [vmem:[#allocation101_spill] sm:$0xff] %v4234_v7  ;;  %v1310_v32 = vmul.f32 %v4234_v7, %v3656_v55  ;;  %v958_v37 = vmul.f32 %v3647_v48, %v4234_v7  ;;  %5960 = vst [vmem:[#allocation102_spill] sm:$0xff] %v4245_v23  ;;  %v974_v56 = vmul.f32 %v3647_v48, %v4245_v23 }
 0x1b4   :  { %v792_v38 = vpop.f32.mrb[12].mxu0  ;;  %v872_v41 = vpop.f32.mrb[12].mxu1 }
 0x1b5   :  { %v2807_v21 = vpack.c.bf16 %v1310_v32, %v1309_v18  ;;  %v4248_v8 = vmul.f32 %v792_v38, %v3674_v1  ;;  %1025 = vadd.xlane.f32.xlu1 %v973_v39  ;;  %v794_v33 = vpop.f32.mrb[13].mxu0  ;;  %v874_v52 = vpop.f32.mrb[13].mxu1  ;;  %995 = vadd.xlane.f32.xlu0 %v958_v37  ;;  %v4251_v59 = vmul.f32 %v872_v41, %v3802_v30 }
 0x1b7   :  { %5961 = vst [vmem:[#allocation103_spill] sm:$0xff] %v4248_v8  ;;  %5962 = vst [vmem:[#allocation104_spill] sm:$0xff] %v4251_v59  ;;  %2808 = vmatpush1.bf16.msra.mxu1 %v2807_v21  ;;  %v959_v7 = vmul.f32 %v3647_v48, %v4248_v8  ;;  %v1311_v37 = vmul.f32 %v4248_v8, %v3674_v1  ;;  %v975_v41 = vmul.f32 %v3647_v48, %v4251_v59 }
 0x1b8   :  { %v797_v55 = vpop.f32.mrb[14].mxu0  ;;  %v877_v61 = vpop.f32.mrb[14].mxu1  ;;  %2809 = vmatprep.subr.bf16.mxu1 %v5954_v2 }
 0x1b9   :  { %v4259_v18 = vmul.f32 %v797_v55, %v3672_v0  ;;  %997 = vadd.xlane.f32.xlu1 %v959_v7  ;;  %v799_v32 = vpop.f32.mrb[15].mxu0  ;;  %v879_v39 = vpop.f32.mrb[15].mxu1  ;;  %1027 = vadd.xlane.f32.xlu0 %v974_v56  ;;  %v4270_v33 = vmul.f32 %v877_v61, %v3800_v27 }
 0x1bb   :  { %5963 = vst [vmem:[#allocation105_spill] sm:$0xff] %v4259_v18  ;;  %v1312_v38 = vmul.f32 %v4259_v18, %v3672_v0  ;;  %v960_v21 = vmul.f32 %v3647_v48, %v4259_v18  ;;  %5964 = vst [vmem:[#allocation106_spill] sm:$0xff] %v4270_v33  ;;  %v976_v1 = vmul.f32 %v3647_v48, %v4270_v33 }
 0x1bc   :  { %v802_v55 = vpop.f32.mrb[16].mxu0  ;;  %v882_v7 = vpop.f32.mrb[16].mxu1 }
 0x1bd   :  { %v2810_v52 = vpack.c.bf16 %v1312_v38, %v1311_v37  ;;  %v4273_v56 = vmul.f32 %v802_v55, %v3690_v11  ;;  %1029 = vadd.xlane.f32.xlu1 %v975_v41  ;;  %v804_v32 = vpop.f32.mrb[17].mxu0  ;;  %v884_v39 = vpop.f32.mrb[17].mxu1  ;;  %999 = vadd.xlane.f32.xlu0 %v960_v21  ;;  %v4276_v8 = vmul.f32 %v882_v7, %v3818_v50 }
 0x1bf   :  { %5965 = vst [vmem:[#allocation107_spill] sm:$0xff] %v4273_v56  ;;  %5966 = vst [vmem:[#allocation108_spill] sm:$0xff] %v4276_v8  ;;  %2811 = vmatpush1.bf16.msra.mxu1 %v2810_v52  ;;  %v961_v18 = vmul.f32 %v3647_v48, %v4273_v56  ;;  %v1313_v21 = vmul.f32 %v4273_v56, %v3690_v11  ;;  %v977_v7 = vmul.f32 %v3647_v48, %v4276_v8 }
 0x1c0   :  { %v807_v0 = vpop.f32.mrb[18].mxu0  ;;  %v887_v61 = vpop.f32.mrb[18].mxu1  ;;  %2812 = vmatprep.subr.bf16.mxu1 %v5954_v2 }
 0x1c1   :  { %v4284_v37 = vmul.f32 %v807_v0, %v3688_v10  ;;  %1001 = vadd.xlane.f32.xlu1 %v961_v18  ;;  %v809_v38 = vpop.f32.mrb[19].mxu0  ;;  %v889_v41 = vpop.f32.mrb[19].mxu1  ;;  %1031 = vadd.xlane.f32.xlu0 %v976_v1  ;;  %v4295_v32 = vmul.f32 %v887_v61, %v3816_v49 }
 0x1c3   :  { %5967 = vst [vmem:[#allocation109_spill] sm:$0xff] %v4284_v37  ;;  %v1314_v55 = vmul.f32 %v4284_v37, %v3688_v10  ;;  %v962_v52 = vmul.f32 %v3647_v48, %v4284_v37  ;;  %5968 = vst [vmem:[#allocation110_spill] sm:$0xff] %v4295_v32  ;;  %v4306_v48 = vld [vmem:[%s5614_s3] ss:$0 sm:$0xff] }
 0x1c4   :  { %v812_v0 = vpop.f32.mrb[20].mxu0  ;;  %v892_v18 = vpop.f32.mrb[20].mxu1 }
 0x1c5   :  { %v2813_v39 = vpack.c.bf16 %v1314_v55, %v1313_v21  ;;  %v4298_v1 = vmul.f32 %v812_v0, %v3706_v20  ;;  %1033 = vadd.xlane.f32.xlu1 %v977_v7  ;;  %v814_v38 = vpop.f32.mrb[21].mxu0  ;;  %v894_v41 = vpop.f32.mrb[21].mxu1  ;;  %1003 = vadd.xlane.f32.xlu0 %v962_v52  ;;  %v4301_v56 = vmul.f32 %v892_v18, %v3834_v63 }
 0x1c6   :  { %v978_v7 = vmul.f32 %v4306_v48, %v4295_v32 }
 0x1c7   :  { %5969 = vst [vmem:[#allocation111_spill] sm:$0xff] %v4298_v1  ;;  %5970 = vst [vmem:[#allocation112_spill] sm:$0xff] %v4301_v56  ;;  %2814 = vmatpush1.bf16.msra.mxu1 %v2813_v39  ;;  %v963_v61 = vmul.f32 %v4306_v48, %v4298_v1  ;;  %v1315_v39 = vmul.f32 %v4298_v1, %v3706_v20  ;;  %v979_v41 = vmul.f32 %v4306_v48, %v4301_v56 }
 0x1c8   :  { %v817_v21 = vpop.f32.mrb[22].mxu0  ;;  %v897_v55 = vpop.f32.mrb[22].mxu1  ;;  %2815 = vmatprep.subr.bf16.mxu1 %v5954_v2 }
 0x1c9   :  { %v4314_v52 = vmul.f32 %v817_v21, %v3704_v19  ;;  %1005 = vadd.xlane.f32.xlu1 %v963_v61  ;;  %v819_v0 = vpop.f32.mrb[23].mxu0  ;;  %v899_v18 = vpop.f32.mrb[23].mxu1  ;;  %1035 = vadd.xlane.f32.xlu0 %v978_v7  ;;  %v4325_v10 = vmul.f32 %v897_v55, %v3832_v62 }
 0x1cb   :  { %5971 = vst [vmem:[#allocation113_spill] sm:$0xff] %v4314_v52  ;;  %v1316_v38 = vmul.f32 %v4314_v52, %v3704_v19  ;;  %v964_v37 = vmul.f32 %v4306_v48, %v4314_v52  ;;  %5972 = vst [vmem:[#allocation114_spill] sm:$0xff] %v4325_v10  ;;  %v980_v11 = vmul.f32 %v4306_v48, %v4325_v10 }
 0x1cc   :  { %v822_v21 = vpop.f32.mrb[24].mxu0  ;;  %v902_v61 = vpop.f32.mrb[24].mxu1 }
 0x1cd   :  { %v2816_v0 = vpack.c.bf16 %v1316_v38, %v1315_v39  ;;  %v4328_v7 = vmul.f32 %v822_v21, %v3722_v29  ;;  %1037 = vadd.xlane.f32.xlu1 %v979_v41  ;;  %v824_v18 = vpop.f32.mrb[25].mxu0  ;;  %v904_v1 = vpop.f32.mrb[25].mxu1  ;;  %1007 = vadd.xlane.f32.xlu0 %v964_v37  ;;  %v4331_v19 = vmul.f32 %v902_v61, %v3850_v15 }
 0x1cf   :  { %5973 = vst [vmem:[#allocation115_spill] sm:$0xff] %v4328_v7  ;;  %5974 = vst [vmem:[#allocation116_spill] sm:$0xff] %v4331_v19  ;;  %2817 = vmatpush1.bf16.msra.mxu1 %v2816_v0  ;;  %v965_v52 = vmul.f32 %v4306_v48, %v4328_v7  ;;  %v1317_v38 = vmul.f32 %v4328_v7, %v3722_v29  ;;  %v981_v21 = vmul.f32 %v4306_v48, %v4331_v19 }
 0x1d0   :  { %v827_v20 = vpop.f32.mrb[26].mxu0  ;;  %v907_v55 = vpop.f32.mrb[26].mxu1  ;;  %2818 = vmatprep.subr.bf16.mxu1 %v5954_v2 }
 0x1d1   :  { %v4339_v39 = vmul.f32 %v827_v20, %v3720_v28  ;;  %1009 = vadd.xlane.f32.xlu1 %v965_v52  ;;  %v829_v1 = vpop.f32.mrb[27].mxu0  ;;  %v909_v37 = vpop.f32.mrb[27].mxu1  ;;  %1039 = vadd.xlane.f32.xlu0 %v980_v11  ;;  %v4350_v0 = vmul.f32 %v907_v55, %v3848_v14 }
 0x1d3   :  { %5975 = vst [vmem:[#allocation117_spill] sm:$0xff] %v4339_v39  ;;  %v1318_v41 = vmul.f32 %v4339_v39, %v3720_v28  ;;  %v966_v61 = vmul.f32 %v4306_v48, %v4339_v39  ;;  %5976 = vst [vmem:[#allocation118_spill] sm:$0xff] %v4350_v0  ;;  %v982_v29 = vmul.f32 %v4306_v48, %v4350_v0 }
 0x1d4   :  { %v832_v20 = vpop.f32.mrb[28].mxu0  ;;  %v912_v52 = vpop.f32.mrb[28].mxu1 }
 0x1d5   :  { %v2819_v18 = vpack.c.bf16 %v1318_v41, %v1317_v38  ;;  %v4353_v11 = vmul.f32 %v832_v20, %v3738_v46  ;;  %1041 = vadd.xlane.f32.xlu1 %v981_v21  ;;  %v834_v1 = vpop.f32.mrb[29].mxu0  ;;  %v914_v37 = vpop.f32.mrb[29].mxu1  ;;  %1011 = vadd.xlane.f32.xlu0 %v966_v61  ;;  %v4356_v7 = vmul.f32 %v912_v52, %v3866_v31 }
 0x1d7   :  { %5977 = vst [vmem:[#allocation119_spill] sm:$0xff] %v4353_v11  ;;  %5978 = vst [vmem:[#allocation120_spill] sm:$0xff] %v4356_v7  ;;  %2820 = vmatpush1.bf16.msra.mxu1 %v2819_v18  ;;  %v967_v39 = vmul.f32 %v4306_v48, %v4353_v11  ;;  %v1319_v61 = vmul.f32 %v4353_v11, %v3738_v46  ;;  %v983_v52 = vmul.f32 %v4306_v48, %v4356_v7  ;;  %v6009_v11 = vld [vmem:[#allocation52_spill] sm:$0xff] }
 0x1d8   :  { %v837_v28 = vpop.f32.mrb[30].mxu0  ;;  %v917_v55 = vpop.f32.mrb[30].mxu1  ;;  %2821 = vmatprep.subr.bf16.mxu1 %v5954_v2 }
 0x1d9   :  { %v4364_v38 = vmul.f32 %v837_v28, %v3736_v45  ;;  %1013 = vadd.xlane.f32.xlu1 %v967_v39  ;;  %v839_v41 = vpop.f32.mrb[31].mxu0  ;;  %v919_v21 = vpop.f32.mrb[31].mxu1  ;;  %1043 = vadd.xlane.f32.xlu0 %v982_v29  ;;  %v4375_v1 = vmul.f32 %v917_v55, %v3864_v26  ;;  %v1322_v28 = vmul.f32 %v4195_v25, %v3752_v57  ;;  %v6006_v25 = vld [vmem:[#allocation46_spill] sm:$0xff] }
 0x1da   :  { %v1321_v29 = vmul.f32 %v4179_v36, %v3754_v58  ;;  %v1324_v55 = vmul.f32 %v4220_v12, %v3768_v4  ;;  %v1323_v21 = vmul.f32 %v4201_v43, %v3770_v5  ;;  %v6004_v12 = vld [vmem:[#allocation42_spill] sm:$0xff]  ;;  %v6005_v43 = vld [vmem:[#allocation44_spill] sm:$0xff] }
 0x1db   :  { %5979 = vst [vmem:[#allocation121_spill] sm:$0xff] %v4364_v38  ;;  %v1320_v20 = vmul.f32 %v4364_v38, %v3736_v45  ;;  %v968_v18 = vmul.f32 %v4306_v48, %v4364_v38  ;;  %5980 = vst [vmem:[#allocation122_spill] sm:$0xff] %v4375_v1  ;;  %v984_v37 = vmul.f32 %v4306_v48, %v4375_v1  ;;  %v6007_v36 = vld [vmem:[#allocation48_spill] sm:$0xff]  ;;  %v6008_v38 = vld [vmem:[#allocation50_spill] sm:$0xff] }
 0x1dc   :  { %v2825_v41 = vpack.c.bf16 %v1322_v28, %v1321_v29  ;;  %v1328_v28 = vmul.f32 %v4270_v33, %v3800_v27  ;;  %v6000_v33 = vld [vmem:[#allocation37_spill] sm:$0xff] }
 0x1dd   :  { %v2822_v39 = vpack.c.bf16 %v1320_v20, %v1319_v61  ;;  %1045 = vadd.xlane.f32.xlu1 %v983_v52  ;;  %1015 = vadd.xlane.f32.xlu0 %v968_v18  ;;  %v2828_v61 = vpack.c.bf16 %v1324_v55, %v1323_v21  ;;  %v1326_v20 = vmul.f32 %v4245_v23, %v3784_v16  ;;  %v6002_v23 = vld [vmem:[#allocation39_spill] sm:$0xff] }
 0x1de   :  { %v1325_v52 = vmul.f32 %v4226_v42, %v3786_v17  ;;  %v1332_v21 = vmul.f32 %v4325_v10, %v3832_v62  ;;  %v5996_v10 = vld [vmem:[#allocation89_spill] sm:$0xff]  ;;  %v6003_v42 = vld [vmem:[#allocation40_spill] sm:$0xff] }
 0x1df   :  { %2823 = vmatpush1.bf16.msra.mxu1 %v2822_v39  ;;  %v1327_v39 = vmul.f32 %v4251_v59, %v3802_v30  ;;  %v6001_v59 = vld [vmem:[#allocation38_spill] sm:$0xff] }
 0x1e0   :  { %2824 = vmatprep.subr.bf16.mxu1 %v5954_v2  ;;  %v2831_v18 = vpack.c.bf16 %v1326_v20, %v1325_v52  ;;  %v1334_v52 = vmul.f32 %v4350_v0, %v3848_v14  ;;  %v5994_v0 = vld [vmem:[#allocation85_spill] sm:$0xff] }
 0x1e1   :  { %1047 = vadd.xlane.f32.xlu0 %v984_v37  ;;  %v2834_v29 = vpack.c.bf16 %v1328_v28, %v1327_v39  ;;  %v1330_v37 = vmul.f32 %v4295_v32, %v3816_v49  ;;  %v1336_v39 = vmul.f32 %v4375_v1, %v3864_v26  ;;  %v5992_v1 = vld [vmem:[#allocation79_spill] sm:$0xff] }
 0x1e2   :  { %v5998_v32 = vld [vmem:[#allocation35_spill] sm:$0xff] }
 0x1e3   :  { %2826 = vmatpush1.bf16.msra.mxu1 %v2825_v41  ;;  %v1329_v41 = vmul.f32 %v4276_v8, %v3818_v50  ;;  %v5999_v8 = vld [vmem:[#allocation36_spill] sm:$0xff] }
 0x1e4   :  { %2827 = vmatprep.subr.bf16.mxu1 %v5954_v2 }
 0x1e5   :  { %v2837_v55 = vpack.c.bf16 %v1330_v37, %v1329_v41  ;;  %v5981_v41 = vld [vmem:[#allocation57_spill] sm:$0xff] }
 0x1e7   :  { %2829 = vmatpush1.bf16.msra.mxu1 %v2828_v61  ;;  %v1331_v61 = vmul.f32 %v4301_v56, %v3834_v63  ;;  %v5997_v56 = vld [vmem:[#allocation2_spill] sm:$0xff] }
 0x1e8   :  { %2830 = vmatprep.subr.bf16.mxu1 %v5954_v2 }
 0x1e9   :  { %v2840_v20 = vpack.c.bf16 %v1332_v21, %v1331_v61  ;;  %v5983_v21 = vld [vmem:[#allocation61_spill] sm:$0xff]  ;;  %v5984_v61 = vld [vmem:[#allocation63_spill] sm:$0xff] }
 0x1eb   :  { %2832 = vmatpush1.bf16.msra.mxu1 %v2831_v18  ;;  %v1333_v18 = vmul.f32 %v4331_v19, %v3850_v15  ;;  %v5995_v19 = vld [vmem:[#allocation87_spill] sm:$0xff] }
 0x1ec   :  { %2833 = vmatprep.subr.bf16.mxu1 %v5954_v2 }
 0x1ed   :  { %v2843_v28 = vpack.c.bf16 %v1334_v52, %v1333_v18  ;;  %v5986_v52 = vld [vmem:[#allocation67_spill] sm:$0xff]  ;;  %v5987_v18 = vld [vmem:[#allocation69_spill] sm:$0xff] }
 0x1ef   :  { %2835 = vmatpush1.bf16.msra.mxu1 %v2834_v29  ;;  %v1335_v29 = vmul.f32 %v4356_v7, %v3866_v31  ;;  %v5993_v7 = vld [vmem:[#allocation81_spill] sm:$0xff] }
 0x1f0   :  { %2836 = vmatprep.subr.bf16.mxu1 %v5954_v2 }
 0x1f1   :  { %v2846_v37 = vpack.c.bf16 %v1336_v39, %v1335_v29  ;;  %v5989_v39 = vld [vmem:[#allocation73_spill] sm:$0xff]  ;;  %v5990_v29 = vld [vmem:[#allocation75_spill] sm:$0xff] }
 0x1f3   :  { %2838 = vmatpush1.bf16.msra.mxu1 %v2837_v55  ;;  %v5982_v55 = vld [vmem:[#allocation59_spill] sm:$0xff] }
 0x1f4   :  { %2839 = vmatprep.subr.bf16.mxu1 %v5954_v2 }
 0x1f7   :  { %2841 = vmatpush1.bf16.msra.mxu1 %v2840_v20  ;;  %v5985_v20 = vld [vmem:[#allocation65_spill] sm:$0xff] }
 0x1f8   :  { %2842 = vmatprep.subr.bf16.mxu1 %v5954_v2 }
 0x1fb   :  { %2844 = vmatpush1.bf16.msra.mxu1 %v2843_v28  ;;  %v5988_v28 = vld [vmem:[#allocation71_spill] sm:$0xff] }
 0x1fc   :  { %2845 = vmatprep.subr.bf16.mxu1 %v5954_v2 }
 0x1ff   :  { %2847 = vmatpush1.bf16.msra.mxu1 %v2846_v37  ;;  %v5991_v37 = vld [vmem:[#allocation77_spill] sm:$0xff] }
 0x202   :  { %1402 = vmatmul.mubr.f32.vlgmr.msra.gmra.mrb[32].mxu1 %v3894_v54 }
 0x203   :  { %1406 = vmatprep.mubr.f32.mxu1 %v3899_v60 }
 0x206   :  { %1407 = vmatmul.mubr.f32.gmra.mrb[34].mxu1 %v3913_v34 }
 0x207   :  { %1411 = vmatprep.mubr.f32.mxu1 %v3919_v6 }
 0x20a   :  { %1412 = vmatmul.mubr.f32.gmra.mrb[36].mxu1 %v3931_v13 }
 0x20b   :  { %1416 = vmatprep.mubr.f32.mxu1 %v3937_v22 }
 0x20e   :  { %1417 = vmatmul.mubr.f32.gmra.mrb[38].mxu1 %v3949_v40  ;;  %v6053_v40 = vld [vmem:[#allocation14_spill] sm:$0xff] }
 0x20f   :  { %1421 = vmatprep.mubr.f32.mxu1 %v3955_v44 }
 0x212   :  { %1422 = vmatmul.mubr.f32.gmra.mrb[40].mxu1 %v3967_v53  ;;  %v6047_v53 = vld [vmem:[#allocation12_spill] sm:$0xff] }
 0x213   :  { %1426 = vmatprep.mubr.f32.mxu1 %v3973_v3 }
 0x216   :  { %1427 = vmatmul.mubr.f32.gmra.mrb[42].mxu1 %v3985_v24 }
 0x217   :  { %1431 = vmatprep.mubr.f32.mxu1 %v3991_v47  ;;  %v6043_v47 = vld [vmem:[#allocation10_spill] sm:$0xff] }
 0x21a   :  { %1432 = vmatmul.mubr.f32.gmra.mrb[44].mxu1 %v4003_v51 }
 0x21b   :  { %1436 = vmatprep.mubr.f32.mxu1 %v4009_v9 }
 0x21e   :  { %1437 = vmatmul.mubr.f32.gmra.mrb[46].mxu1 %v5981_v41  ;;  %v6039_v41 = vld [vmem:[#allocation8_spill] sm:$0xff] }
 0x21f   :  { %1441 = vmatprep.mubr.f32.mxu1 %v5982_v55 }
 0x222   :  { %1442 = vmatmul.mubr.f32.gmra.mrb[48].mxu1 %v5983_v21  ;;  %v6035_v21 = vld [vmem:[#allocation3_spill] sm:$0xff] }
 0x223   :  { %1446 = vmatprep.mubr.f32.mxu1 %v5984_v61 }
 0x226   :  { %1447 = vmatmul.mubr.f32.gmra.mrb[50].mxu1 %v5985_v20 }
 0x227   :  { %1451 = vmatprep.mubr.f32.mxu1 %v5986_v52 }
 0x22a   :  { %1452 = vmatmul.mubr.f32.gmra.mrb[52].mxu1 %v5987_v18 }
 0x22b   :  { %1456 = vmatprep.mubr.f32.mxu1 %v5988_v28 }
 0x22e   :  { %1457 = vmatmul.mubr.f32.gmra.mrb[54].mxu1 %v5989_v39 }
 0x22f   :  { %1461 = vmatprep.mubr.f32.mxu1 %v5990_v29 }
 0x232   :  { %1462 = vmatmul.mubr.f32.gmra.mrb[56].mxu1 %v5991_v37  ;;  %v6033_v37 = vld [vmem:[#allocation6_spill] sm:$0xff] }
 0x233   :  { %1466 = vmatprep.mubr.f32.mxu1 %v5992_v1 }
 0x236   :  { %1467 = vmatmul.mubr.f32.gmra.mrb[58].mxu1 %v5993_v7 }
 0x237   :  { %1471 = vmatprep.mubr.f32.mxu1 %v4135_v35 }
 0x23a   :  { %1472 = vmatmul.mubr.f32.gmra.mrb[60].mxu1 %v5994_v0 }
 0x23b   :  { %1476 = vmatprep.mubr.f32.mxu1 %v5995_v19 }
 0x23e   :  { %1477 = vmatmul.mubr.f32.gmra.mrb[62].mxu1 %v5996_v10  ;;  %v6031_v10 = vld [vmem:[#allocation4_spill] sm:$0xff] }
 0x23f   :  { %1481 = vmatprep.mubr.f32.mxu1 %v5997_v56 }
 0x242   :  { %1482 = vmatmul.mubr.f32.gmra.mrb[64].mxu1 %v5998_v32 }
 0x243   :  { %1486 = vmatprep.mubr.f32.mxu1 %v5999_v8  ;;  %v6010_v8 = vld [vmem:[#allocation54_spill] sm:$0xff] }
 0x246   :  { %1487 = vmatmul.mubr.f32.gmra.mrb[66].mxu1 %v6000_v33  ;;  %v6011_v33 = vld [vmem:[#allocation56_spill] sm:$0xff] }
 0x247   :  { %1491 = vmatprep.mubr.f32.mxu1 %v6001_v59  ;;  %v6012_v59 = vld [vmem:[#allocation58_spill] sm:$0xff] }
 0x24a   :  { %1492 = vmatmul.mubr.f32.gmra.mrb[68].mxu1 %v6002_v23  ;;  %v6013_v23 = vld [vmem:[#allocation60_spill] sm:$0xff] }
 0x24b   :  { %1496 = vmatprep.mubr.f32.mxu1 %v6003_v42  ;;  %v6014_v42 = vld [vmem:[#allocation62_spill] sm:$0xff] }
 0x24e   :  { %1497 = vmatmul.mubr.f32.gmra.mrb[70].mxu1 %v6004_v12  ;;  %v6015_v12 = vld [vmem:[#allocation64_spill] sm:$0xff] }
 0x24f   :  { %1501 = vmatprep.mubr.f32.mxu1 %v6005_v43  ;;  %v6016_v43 = vld [vmem:[#allocation66_spill] sm:$0xff] }
 0x252   :  { %1502 = vmatmul.mubr.f32.gmra.mrb[72].mxu1 %v6006_v25  ;;  %v6017_v25 = vld [vmem:[#allocation68_spill] sm:$0xff] }
 0x253   :  { %1506 = vmatprep.mubr.f32.mxu1 %v6007_v36  ;;  %v6018_v36 = vld [vmem:[#allocation70_spill] sm:$0xff] }
 0x256   :  { %1507 = vmatmul.mubr.f32.gmra.mrb[74].mxu1 %v6008_v38  ;;  %v6019_v38 = vld [vmem:[#allocation72_spill] sm:$0xff] }
 0x257   :  { %1511 = vmatprep.mubr.f32.mxu1 %v6009_v11  ;;  %v6020_v11 = vld [vmem:[#allocation74_spill] sm:$0xff] }
 0x25a   :  { %1512 = vmatmul.mubr.f32.gmra.mrb[76].mxu1 %v6010_v8  ;;  %v6021_v8 = vld [vmem:[#allocation76_spill] sm:$0xff] }
 0x25b   :  { %1516 = vmatprep.mubr.f32.mxu1 %v6011_v33  ;;  %v6022_v33 = vld [vmem:[#allocation78_spill] sm:$0xff] }
 0x25e   :  { %1517 = vmatmul.mubr.f32.gmra.mrb[78].mxu1 %v6012_v59  ;;  %v6023_v59 = vld [vmem:[#allocation80_spill] sm:$0xff] }
 0x25f   :  { %1521 = vmatprep.mubr.f32.mxu1 %v6013_v23  ;;  %v6024_v23 = vld [vmem:[#allocation82_spill] sm:$0xff] }
 0x262   :  { %1522 = vmatmul.mubr.f32.gmra.mrb[80].mxu1 %v6014_v42  ;;  %v6025_v42 = vld [vmem:[#allocation84_spill] sm:$0xff] }
 0x263   :  { %1526 = vmatprep.mubr.f32.mxu1 %v6015_v12  ;;  %v6026_v12 = vld [vmem:[#allocation86_spill] sm:$0xff] }
 0x266   :  { %1527 = vmatmul.mubr.f32.gmra.mrb[82].mxu1 %v6016_v43  ;;  %v6027_v43 = vld [vmem:[#allocation88_spill] sm:$0xff] }
 0x267   :  { %1531 = vmatprep.mubr.f32.mxu1 %v6017_v25  ;;  %v6028_v25 = vld [vmem:[#allocation90_spill] sm:$0xff] }
 0x26a   :  { %1532 = vmatmul.mubr.f32.gmra.mrb[84].mxu1 %v6018_v36  ;;  %v4482_v36 = vpop.xlane.xlu0 %120 }
 0x26b   :  { %1536 = vmatprep.mubr.f32.mxu1 %v6019_v38  ;;  %6029 = vst [vmem:[#allocation123_spill] sm:$0xff] %v4482_v36 }
 0x26e   :  { %1537 = vmatmul.mubr.f32.gmra.mrb[86].mxu1 %v6020_v11  ;;  %v4484_v38 = vpop.xlane.xlu0 %124  ;;  %v4486_v11 = vpop.xlane.xlu1 %122 }
 0x26f   :  { %1541 = vmatprep.mubr.f32.mxu1 %v6021_v8  ;;  %6030 = vst [vmem:[#allocation124_spill] sm:$0xff] %v4486_v11 }
 0x272   :  { %1542 = vmatmul.mubr.f32.gmra.mrb[88].mxu1 %v6022_v33  ;;  %v4488_v8 = vpop.xlane.xlu0 %126  ;;  %v4490_v33 = vpop.xlane.xlu1 %128 }
 0x273   :  { %1546 = vmatprep.mubr.f32.mxu1 %v6023_v59 }
 0x276   :  { %1547 = vmatmul.mubr.f32.gmra.mrb[90].mxu1 %v6024_v23  ;;  %v4492_v59 = vpop.xlane.xlu0 %130  ;;  %v4494_v23 = vpop.xlane.xlu1 %132 }
 0x277   :  { %1551 = vmatprep.mubr.f32.mxu1 %v6025_v42 }
 0x27a   :  { %1552 = vmatmul.mubr.f32.gmra.mrb[92].mxu1 %v6026_v12  ;;  %v4496_v42 = vpop.xlane.xlu0 %134  ;;  %v4498_v12 = vpop.xlane.xlu1 %136 }
 0x27b   :  { %1556 = vmatprep.mubr.f32.mxu1 %v6027_v43 }
 0x27e   :  { %1557 = vmatmul.mubr.f32.gmra.mrb[94].mxu1 %v6028_v25  ;;  %v4500_v43 = vpop.xlane.xlu0 %138  ;;  %v4502_v25 = vpop.xlane.xlu1 %140 }
 0x282   :  { %v4504_v36 = vpop.xlane.xlu0 %142  ;;  %v4506_v32 = vpop.xlane.xlu1 %144 }
 0x286   :  { %v4508_v11 = vpop.xlane.xlu0 %146  ;;  %v4513_v35 = vpop.xlane.xlu1 %148 }
 0x28a   :  { %v4520_v28 = vpop.xlane.xlu0 %150  ;;  %v4528_v52 = vpop.xlane.xlu1 %152 }
 0x2d5   :  { %v1403_v56 = vpop.f32.mrb[32].mxu1 }
 0x2d6   :  { %v4511_v19 = vmul.f32 %v1403_v56, %v6031_v10  ;;  %v1405_v0 = vpop.f32.mrb[33].mxu1 }
 0x2d8   :  { %6032 = vst [vmem:[#allocation125_spill] sm:$0xff] %v4511_v19  ;;  %v1594_v7 = vmul.f32 %v4306_v48, %v4511_v19  ;;  %v1946_v18 = vmul.f32 %v4511_v19, %v6031_v10  ;;  %v4535_v19 = vpop.xlane.xlu0 %154 }
 0x2d9   :  { %v1408_v1 = vpop.f32.mrb[34].mxu1 }
 0x2da   :  { %v4518_v29 = vmul.f32 %v1408_v1, %v6033_v37  ;;  %1626 = vadd.xlane.f32.xlu1 %v1594_v7  ;;  %v1410_v39 = vpop.f32.mrb[35].mxu1 }
 0x2dc   :  { %6034 = vst [vmem:[#allocation126_spill] sm:$0xff] %v4518_v29  ;;  %v1947_v56 = vmul.f32 %v4518_v29, %v6033_v37  ;;  %v1595_v0 = vmul.f32 %v4306_v48, %v4518_v29  ;;  %v6037_v37 = vld [vmem:[#allocation5_spill] sm:$0xff] }
 0x2dd   :  { %v1413_v20 = vpop.f32.mrb[36].mxu1 }
 0x2de   :  { %v2849_v61 = vpack.c.bf16 %v1947_v56, %v1946_v18  ;;  %v4531_v1 = vmul.f32 %v1413_v20, %v6035_v21  ;;  %v1415_v7 = vpop.f32.mrb[37].mxu1  ;;  %1628 = vadd.xlane.f32.xlu0 %v1595_v0  ;;  %v4541_v18 = vpop.xlane.xlu1 %156 }
 0x2e0   :  { %6036 = vst [vmem:[#allocation127_spill] sm:$0xff] %v4531_v1  ;;  %2850 = vmatpush1.bf16.msra.mxu0 %v2849_v61  ;;  %v1596_v39 = vmul.f32 %v4306_v48, %v4531_v1  ;;  %v1948_v20 = vmul.f32 %v4531_v1, %v6035_v21 }
 0x2e1   :  { %v1418_v10 = vpop.f32.mrb[38].mxu1  ;;  %2851 = vmatprep.subr.bf16.mxu0 %v5954_v2 }
 0x2e2   :  { %v4539_v29 = vmul.f32 %v1418_v10, %v6037_v37  ;;  %1630 = vadd.xlane.f32.xlu1 %v1596_v39  ;;  %v1420_v55 = vpop.f32.mrb[39].mxu1  ;;  %v4552_v39 = vpop.xlane.xlu0 %158 }
 0x2e3   :  { %v4556_v21 = vpop.xlane.xlu1 %160 }
 0x2e4   :  { %6038 = vst [vmem:[#allocation128_spill] sm:$0xff] %v4539_v29  ;;  %v1949_v61 = vmul.f32 %v4539_v29, %v6037_v37  ;;  %v1597_v56 = vmul.f32 %v4306_v48, %v4539_v29  ;;  %v6041_v37 = vld [vmem:[#allocation7_spill] sm:$0xff] }
 0x2e5   :  { %v1423_v0 = vpop.f32.mrb[40].mxu1 }
 0x2e6   :  { %v2852_v7 = vpack.c.bf16 %v1949_v61, %v1948_v20  ;;  %v4550_v9 = vmul.f32 %v1423_v0, %v6039_v41  ;;  %v1425_v10 = vpop.f32.mrb[41].mxu1  ;;  %1632 = vadd.xlane.f32.xlu0 %v1597_v56 }
 0x2e8   :  { %6040 = vst [vmem:[#allocation129_spill] sm:$0xff] %v4550_v9  ;;  %2853 = vmatpush1.bf16.msra.mxu0 %v2852_v7  ;;  %v1598_v55 = vmul.f32 %v4306_v48, %v4550_v9  ;;  %v1950_v61 = vmul.f32 %v4550_v9, %v6039_v41  ;;  %v4568_v7 = vpop.xlane.xlu0 %162 }
 0x2e9   :  { %v1428_v1 = vpop.f32.mrb[42].mxu1  ;;  %2854 = vmatprep.subr.bf16.mxu0 %v5954_v2 }
 0x2ea   :  { %v4560_v29 = vmul.f32 %v1428_v1, %v6041_v37  ;;  %1634 = vadd.xlane.f32.xlu1 %v1598_v55  ;;  %v1430_v20 = vpop.f32.mrb[43].mxu1  ;;  %v4573_v55 = vpop.xlane.xlu1 %164 }
 0x2ec   :  { %6042 = vst [vmem:[#allocation130_spill] sm:$0xff] %v4560_v29  ;;  %v1951_v56 = vmul.f32 %v4560_v29, %v6041_v37  ;;  %v1599_v0 = vmul.f32 %v4306_v48, %v4560_v29  ;;  %v6045_v37 = vld [vmem:[#allocation9_spill] sm:$0xff] }
 0x2ed   :  { %v1433_v10 = vpop.f32.mrb[44].mxu1 }
 0x2ee   :  { %v2855_v51 = vpack.c.bf16 %v1951_v56, %v1950_v61  ;;  %v4571_v24 = vmul.f32 %v1433_v10, %v6043_v47  ;;  %v1435_v1 = vpop.f32.mrb[45].mxu1  ;;  %1636 = vadd.xlane.f32.xlu0 %v1599_v0  ;;  %v4581_v61 = vpop.xlane.xlu0 %166 }
 0x2ef   :  { %v4589_v10 = vpop.xlane.xlu1 %168 }
 0x2f0   :  { %6044 = vst [vmem:[#allocation131_spill] sm:$0xff] %v4571_v24  ;;  %2856 = vmatpush1.bf16.msra.mxu0 %v2855_v51  ;;  %v1600_v20 = vmul.f32 %v4306_v48, %v4571_v24  ;;  %v1952_v56 = vmul.f32 %v4571_v24, %v6043_v47 }
 0x2f1   :  { %v1438_v41 = vpop.f32.mrb[46].mxu1  ;;  %2857 = vmatprep.subr.bf16.mxu0 %v5954_v2 }
 0x2f2   :  { %v4579_v29 = vmul.f32 %v1438_v41, %v6045_v37  ;;  %1638 = vadd.xlane.f32.xlu1 %v1600_v20  ;;  %v1440_v9 = vpop.f32.mrb[47].mxu1  ;;  %v4596_v47 = vpop.xlane.xlu0 %170 }
 0x2f3   :  { %6049 = vst [vmem:[#allocation134_spill] sm:$0xff] %v4596_v47 }
 0x2f4   :  { %6046 = vst [vmem:[#allocation132_spill] sm:$0xff] %v4579_v29  ;;  %v1953_v0 = vmul.f32 %v4579_v29, %v6045_v37  ;;  %v1601_v51 = vmul.f32 %v4306_v48, %v4579_v29  ;;  %v6050_v37 = vld [vmem:[#allocation11_spill] sm:$0xff] }
 0x2f5   :  { %v1443_v1 = vpop.f32.mrb[48].mxu1 }
 0x2f6   :  { %v2858_v3 = vpack.c.bf16 %v1953_v0, %v1952_v56  ;;  %v4592_v41 = vmul.f32 %v1443_v1, %v6047_v53  ;;  %v1445_v20 = vpop.f32.mrb[49].mxu1  ;;  %1640 = vadd.xlane.f32.xlu0 %v1601_v51  ;;  %v4602_v56 = vpop.xlane.xlu1 %172 }
 0x2f7   :  { %6052 = vst [vmem:[#allocation136_spill] sm:$0xff] %v4602_v56 }
 0x2f8   :  { %6048 = vst [vmem:[#allocation133_spill] sm:$0xff] %v4592_v41  ;;  %2859 = vmatpush1.bf16.msra.mxu0 %v2858_v3  ;;  %v1602_v9 = vmul.f32 %v4306_v48, %v4592_v41  ;;  %v1954_v0 = vmul.f32 %v4592_v41, %v6047_v53 }
 0x2f9   :  { %v1448_v24 = vpop.f32.mrb[50].mxu1  ;;  %2860 = vmatprep.subr.bf16.mxu0 %v5954_v2 }
 0x2fa   :  { %v4600_v29 = vmul.f32 %v1448_v24, %v6050_v37  ;;  %1642 = vadd.xlane.f32.xlu1 %v1602_v9  ;;  %v1450_v44 = vpop.f32.mrb[51].mxu1  ;;  %v4613_v9 = vpop.xlane.xlu0 %174 }
 0x2fb   :  { %6055 = vst [vmem:[#allocation138_spill] sm:$0xff] %v4613_v9  ;;  %v4617_v53 = vpop.xlane.xlu1 %176 }
 0x2fc   :  { %6051 = vst [vmem:[#allocation135_spill] sm:$0xff] %v4600_v29  ;;  %v1955_v3 = vmul.f32 %v4600_v29, %v6050_v37  ;;  %v1603_v51 = vmul.f32 %v4306_v48, %v4600_v29  ;;  %6056 = vst [vmem:[#allocation139_spill] sm:$0xff] %v4617_v53  ;;  %v6057_v37 = vld [vmem:[#allocation13_spill] sm:$0xff]  ;;  %v6059_v53 = vld [vmem:[#allocation16_spill] sm:$0xff] }
 0x2fd   :  { %v1453_v1 = vpop.f32.mrb[52].mxu1 }
 0x2fe   :  { %v2861_v20 = vpack.c.bf16 %v1955_v3, %v1954_v0  ;;  %v4611_v47 = vmul.f32 %v1453_v1, %v6053_v40  ;;  %v1455_v24 = vpop.f32.mrb[53].mxu1  ;;  %1644 = vadd.xlane.f32.xlu0 %v1603_v51 }
 0x300   :  { %6054 = vst [vmem:[#allocation137_spill] sm:$0xff] %v4611_v47  ;;  %2862 = vmatpush1.bf16.msra.mxu0 %v2861_v20  ;;  %v1604_v44 = vmul.f32 %v4306_v48, %v4611_v47  ;;  %v1956_v3 = vmul.f32 %v4611_v47, %v6053_v40  ;;  %v4629_v20 = vpop.xlane.xlu0 %178 }
 0x301   :  { %v1458_v41 = vpop.f32.mrb[54].mxu1  ;;  %2863 = vmatprep.subr.bf16.mxu0 %v5954_v2 }
 0x302   :  { %v4621_v29 = vmul.f32 %v1458_v41, %v6057_v37  ;;  %1646 = vadd.xlane.f32.xlu1 %v1604_v44  ;;  %v1460_v0 = vpop.f32.mrb[55].mxu1  ;;  %v4634_v44 = vpop.xlane.xlu1 %180 }
 0x303   :  { %6061 = vst [vmem:[#allocation142_spill] sm:$0xff] %v4634_v44 }
 0x304   :  { %6058 = vst [vmem:[#allocation140_spill] sm:$0xff] %v4621_v29  ;;  %v1957_v51 = vmul.f32 %v4621_v29, %v6057_v37  ;;  %v1605_v1 = vmul.f32 %v4306_v48, %v4621_v29  ;;  %v6062_v37 = vld [vmem:[#allocation15_spill] sm:$0xff] }
 0x305   :  { %v1463_v24 = vpop.f32.mrb[56].mxu1 }
 0x306   :  { %v2864_v9 = vpack.c.bf16 %v1957_v51, %v1956_v3  ;;  %v4632_v56 = vmul.f32 %v1463_v24, %v6059_v53  ;;  %v1465_v41 = vpop.f32.mrb[57].mxu1  ;;  %1648 = vadd.xlane.f32.xlu0 %v1605_v1  ;;  %v4642_v3 = vpop.xlane.xlu0 %182 }
 0x307   :  { %6064 = vst [vmem:[#allocation144_spill] sm:$0xff] %v4642_v3  ;;  %v4650_v24 = vpop.xlane.xlu1 %985 }
 0x308   :  { %6060 = vst [vmem:[#allocation141_spill] sm:$0xff] %v4632_v56  ;;  %2865 = vmatpush1.bf16.msra.mxu0 %v2864_v9  ;;  %v1606_v0 = vmul.f32 %v4306_v48, %v4632_v56  ;;  %v1958_v51 = vmul.f32 %v4632_v56, %v6059_v53  ;;  %6065 = vst [vmem:[#allocation145_spill] sm:$0xff] %v4650_v24 }
 0x309   :  { %v1468_v40 = vpop.f32.mrb[58].mxu1  ;;  %2866 = vmatprep.subr.bf16.mxu0 %v5954_v2 }
 0x30a   :  { %v4640_v29 = vmul.f32 %v1468_v40, %v6062_v37  ;;  %1650 = vadd.xlane.f32.xlu1 %v1606_v0  ;;  %v1470_v47 = vpop.f32.mrb[59].mxu1  ;;  %v4657_v3 = vpop.xlane.xlu0 %987 }
 0x30b   :  { %6067 = vst [vmem:[#allocation147_spill] sm:$0xff] %v4657_v3 }
 0x30c   :  { %6063 = vst [vmem:[#allocation143_spill] sm:$0xff] %v4640_v29  ;;  %v1959_v1 = vmul.f32 %v4640_v29, %v6062_v37  ;;  %v1607_v9 = vmul.f32 %v4306_v48, %v4640_v29 }
 0x30d   :  { %v1473_v41 = vpop.f32.mrb[60].mxu1 }
 0x30e   :  { %v2867_v44 = vpack.c.bf16 %v1959_v1, %v1958_v51  ;;  %v4653_v40 = vmul.f32 %v1473_v41, %v3738_v46  ;;  %v1475_v0 = vpop.f32.mrb[61].mxu1  ;;  %1652 = vadd.xlane.f32.xlu0 %v1607_v9  ;;  %v4663_v51 = vpop.xlane.xlu1 %1017 }
 0x310   :  { %6066 = vst [vmem:[#allocation146_spill] sm:$0xff] %v4653_v40  ;;  %2868 = vmatpush1.bf16.msra.mxu0 %v2867_v44  ;;  %v1608_v47 = vmul.f32 %v4306_v48, %v4653_v40  ;;  %v1960_v1 = vmul.f32 %v4653_v40, %v3738_v46 }
 0x311   :  { %v1478_v53 = vpop.f32.mrb[62].mxu1  ;;  %2869 = vmatprep.subr.bf16.mxu0 %v5954_v2 }
 0x312   :  { %v4661_v37 = vmul.f32 %v1478_v53, %v3736_v45  ;;  %1654 = vadd.xlane.f32.xlu1 %v1608_v47  ;;  %v1480_v24 = vpop.f32.mrb[63].mxu1  ;;  %v4674_v47 = vpop.xlane.xlu0 %1019 }
 0x313   :  { %v4678_v46 = vpop.xlane.xlu1 %989 }
 0x314   :  { %6068 = vst [vmem:[#allocation148_spill] sm:$0xff] %v4661_v37  ;;  %v1961_v44 = vmul.f32 %v4661_v37, %v3736_v45  ;;  %v1609_v9 = vmul.f32 %v4306_v48, %v4661_v37 }
 0x315   :  { %v1483_v41 = vpop.f32.mrb[64].mxu1 }
 0x316   :  { %v2870_v0 = vpack.c.bf16 %v1961_v44, %v1960_v1  ;;  %v4672_v3 = vmul.f32 %v1483_v41, %v3754_v58  ;;  %v1485_v53 = vpop.f32.mrb[65].mxu1  ;;  %1656 = vadd.xlane.f32.xlu0 %v1609_v9 }
 0x318   :  { %6069 = vst [vmem:[#allocation149_spill] sm:$0xff] %v4672_v3  ;;  %2871 = vmatpush1.bf16.msra.mxu0 %v2870_v0  ;;  %v1610_v24 = vmul.f32 %v4306_v48, %v4672_v3  ;;  %v1962_v44 = vmul.f32 %v4672_v3, %v3754_v58  ;;  %v4690_v0 = vpop.xlane.xlu0 %991 }
 0x319   :  { %v1488_v40 = vpop.f32.mrb[66].mxu1  ;;  %2872 = vmatprep.subr.bf16.mxu0 %v5954_v2 }
 0x31a   :  { %v4682_v45 = vmul.f32 %v1488_v40, %v3752_v57  ;;  %1658 = vadd.xlane.f32.xlu1 %v1610_v24  ;;  %v1490_v1 = vpop.f32.mrb[67].mxu1  ;;  %v4695_v24 = vpop.xlane.xlu1 %1021 }
 0x31c   :  { %6070 = vst [vmem:[#allocation150_spill] sm:$0xff] %v4682_v45  ;;  %v1963_v9 = vmul.f32 %v4682_v45, %v3752_v57  ;;  %v1611_v41 = vmul.f32 %v4306_v48, %v4682_v45 }
 0x31d   :  { %v1493_v53 = vpop.f32.mrb[68].mxu1 }
 0x31e   :  { %v2873_v37 = vpack.c.bf16 %v1963_v9, %v1962_v44  ;;  %v4693_v29 = vmul.f32 %v1493_v53, %v3770_v5  ;;  %v1495_v40 = vpop.f32.mrb[69].mxu1  ;;  %1660 = vadd.xlane.f32.xlu0 %v1611_v41  ;;  %v4703_v44 = vpop.xlane.xlu0 %1023 }
 0x31f   :  { %v4711_v53 = vpop.xlane.xlu1 %993 }
 0x320   :  { %6071 = vst [vmem:[#allocation151_spill] sm:$0xff] %v4693_v29  ;;  %2874 = vmatpush1.bf16.msra.mxu0 %v2873_v37  ;;  %v1612_v1 = vmul.f32 %v4306_v48, %v4693_v29  ;;  %v1964_v9 = vmul.f32 %v4693_v29, %v3770_v5 }
 0x321   :  { %v1498_v58 = vpop.f32.mrb[70].mxu1  ;;  %2875 = vmatprep.subr.bf16.mxu0 %v5954_v2 }
 0x322   :  { %v4701_v57 = vmul.f32 %v1498_v58, %v3768_v4  ;;  %1662 = vadd.xlane.f32.xlu1 %v1612_v1  ;;  %v1500_v45 = vpop.f32.mrb[71].mxu1  ;;  %v4718_v5 = vpop.xlane.xlu0 %995 }
 0x324   :  { %6072 = vst [vmem:[#allocation152_spill] sm:$0xff] %v4701_v57  ;;  %v1965_v41 = vmul.f32 %v4701_v57, %v3768_v4  ;;  %v1613_v37 = vmul.f32 %v4306_v48, %v4701_v57 }
 0x325   :  { %v1503_v40 = vpop.f32.mrb[72].mxu1 }
 0x326   :  { %v2876_v3 = vpack.c.bf16 %v1965_v41, %v1964_v9  ;;  %v4714_v58 = vmul.f32 %v1503_v40, %v3786_v17  ;;  %v1505_v1 = vpop.f32.mrb[73].mxu1  ;;  %1664 = vadd.xlane.f32.xlu0 %v1613_v37  ;;  %v4724_v9 = vpop.xlane.xlu1 %1025 }
 0x327   :  { %v2626_v1 = vmul.f32 -1.442695, %v4484_v38  ;;  %v2627_v38 = vmul.f32 -1.442695, %v4488_v8 }
 0x328   :  { %6073 = vst [vmem:[#allocation153_spill] sm:$0xff] %v4714_v58  ;;  %2877 = vmatpush1.bf16.msra.mxu0 %v2876_v3  ;;  %v1614_v45 = vmul.f32 %v4306_v48, %v4714_v58  ;;  %v1966_v41 = vmul.f32 %v4714_v58, %v3786_v17 }
 0x329   :  { %v1508_v29 = vpop.f32.mrb[74].mxu1  ;;  %2878 = vmatprep.subr.bf16.mxu0 %v5954_v2  ;;  %2932 = vpow2.f32 %v2626_v1 }
 0x32a   :  { %v4722_v4 = vmul.f32 %v1508_v29, %v3784_v16  ;;  %1666 = vadd.xlane.f32.xlu1 %v1614_v45  ;;  %v1510_v57 = vpop.f32.mrb[75].mxu1  ;;  %v4741_v58 = vpop.xlane.xlu1 %997 }
 0x32b   :  { %v4736_v57 = vpop.xlane.xlu0 %1027 }
 0x32c   :  { %6074 = vst [vmem:[#allocation154_spill] sm:$0xff] %v4722_v4  ;;  %v1967_v3 = vmul.f32 %v4722_v4, %v3784_v16  ;;  %v1615_v37 = vmul.f32 %v4306_v48, %v4722_v4  ;;  %v2628_v16 = vmul.f32 -1.442695, %v4490_v33 }
 0x32d   :  { %v1513_v40 = vpop.f32.mrb[76].mxu1 }
 0x32e   :  { %v2879_v56 = vpack.c.bf16 %v1967_v3, %v1966_v41  ;;  %v4734_v29 = vmul.f32 %v1513_v40, %v3802_v30  ;;  %v1515_v45 = vpop.f32.mrb[77].mxu1  ;;  %1668 = vadd.xlane.f32.xlu0 %v1615_v37  ;;  %2934 = vpow2.f32 %v2628_v16  ;;  %v2630_v40 = vmul.f32 -1.442695, %v4494_v23 }
 0x32f   :  { %v4755_v1 = vpop.xlane.xlu0 %999  ;;  %2936 = vpow2.f32 %v2627_v38  ;;  %v2632_v38 = vmul.f32 -1.442695, %v4498_v12 }
 0x330   :  { %6075 = vst [vmem:[#allocation155_spill] sm:$0xff] %v4734_v29  ;;  %2880 = vmatpush1.bf16.msra.mxu0 %v2879_v56  ;;  %v1616_v17 = vmul.f32 %v4306_v48, %v4734_v29  ;;  %v1968_v56 = vmul.f32 %v4734_v29, %v3802_v30  ;;  %2938 = vpow2.f32 %v2630_v40 }
 0x331   :  { %v1518_v4 = vpop.f32.mrb[78].mxu1  ;;  %2881 = vmatprep.subr.bf16.mxu0 %v5954_v2 }
 0x332   :  { %v4746_v41 = vmul.f32 %v1518_v4, %v3800_v27  ;;  %1670 = vadd.xlane.f32.xlu1 %v1616_v17  ;;  %v1520_v3 = vpop.f32.mrb[79].mxu1 }
 0x333   :  { %v4760_v3 = vpop.xlane.xlu1 %1029 }
 0x334   :  { %6076 = vst [vmem:[#allocation156_spill] sm:$0xff] %v4746_v41  ;;  %v1969_v37 = vmul.f32 %v4746_v41, %v3800_v27  ;;  %v1617_v33 = vmul.f32 %v4306_v48, %v4746_v41  ;;  %v2629_v27 = vmul.f32 -1.442695, %v4492_v59 }
 0x335   :  { %v1523_v8 = vpop.f32.mrb[80].mxu1 }
 0x336   :  { %v2882_v4 = vpack.c.bf16 %v1969_v37, %v1968_v56  ;;  %v4758_v17 = vmul.f32 %v1523_v8, %v3818_v50  ;;  %v1525_v45 = vpop.f32.mrb[81].mxu1  ;;  %1672 = vadd.xlane.f32.xlu0 %v1617_v33  ;;  %v4770_v33 = vpop.xlane.xlu0 %1031  ;;  %2940 = vpow2.f32 %v2629_v27 }
 0x337   :  { %v2933_v8 = vpop.eup %2932  ;;  %v4778_v45 = vpop.xlane.xlu1 %1001  ;;  %2942 = vpow2.f32 %v2632_v38 }
 0x338   :  { %6077 = vst [vmem:[#allocation157_spill] sm:$0xff] %v4758_v17  ;;  %2883 = vmatpush1.bf16.msra.mxu0 %v2882_v4  ;;  %v1618_v16 = vmul.f32 %v4306_v48, %v4758_v17  ;;  %v1970_v59 = vmul.f32 %v4758_v17, %v3818_v50  ;;  %v2935_v27 = vpop.eup %2934  ;;  %v282_v30 = vadd.f32 1.0, %v2933_v8  ;;  %v2631_v50 = vmul.f32 -1.442695, %v4496_v42 }
 0x339   :  { %v1528_v23 = vpop.f32.mrb[82].mxu1  ;;  %2884 = vmatprep.subr.bf16.mxu0 %v5954_v2  ;;  %v2937_v41 = vpop.eup %2936 }
 0x33a   :  { %v4768_v56 = vmul.f32 %v1528_v23, %v3816_v49  ;;  %1674 = vadd.xlane.f32.xlu1 %v1618_v16  ;;  %v1530_v37 = vpop.f32.mrb[83].mxu1  ;;  %v4787_v17 = vpop.xlane.xlu0 %1003  ;;  %2944 = vrcp.f32 %v282_v30  ;;  %v283_v42 = vadd.f32 1.0, %v2937_v41 }
 0x33b   :  { %2946 = vpow2.f32 %v2631_v50 }
 0x33c   :  { %6078 = vst [vmem:[#allocation158_spill] sm:$0xff] %v4768_v56  ;;  %v1971_v40 = vmul.f32 %v4768_v56, %v3816_v49  ;;  %v1619_v4 = vmul.f32 %v4306_v48, %v4768_v56  ;;  %v2634_v56 = vmul.f32 -1.442695, %v4502_v25 }
 0x33d   :  { %v1533_v12 = vpop.f32.mrb[84].mxu1 }
 0x33e   :  { %v2885_v23 = vpack.c.bf16 %v1971_v40, %v1970_v59  ;;  %v4781_v16 = vmul.f32 %v1533_v12, %v3834_v63  ;;  %v1535_v37 = vpop.f32.mrb[85].mxu1  ;;  %1676 = vadd.xlane.f32.xlu0 %v1619_v4  ;;  %v284_v59 = vadd.f32 1.0, %v2935_v27  ;;  %v2939_v4 = vpop.eup %2938  ;;  %v2633_v12 = vmul.f32 -1.442695, %v4500_v43 }
 0x33f   :  { %2948 = vpow2.f32 %v2634_v56  ;;  %v286_v41 = vadd.f32 1.0, %v2939_v4 }
 0x340   :  { %6079 = vst [vmem:[#allocation159_spill] sm:$0xff] %v4781_v16  ;;  %2886 = vmatpush1.bf16.msra.mxu0 %v2885_v23  ;;  %v1620_v49 = vmul.f32 %v4306_v48, %v4781_v16  ;;  %v4794_v23 = vpop.xlane.xlu1 %1033  ;;  %v1972_v25 = vmul.f32 %v4781_v16, %v3834_v63  ;;  %v2941_v30 = vpop.eup %2940  ;;  %2950 = vrcp.f32 %v284_v59  ;;  %v2635_v63 = vmul.f32 -1.442695, %v4504_v36 }
 0x341   :  { %v1538_v38 = vpop.f32.mrb[86].mxu1  ;;  %2887 = vmatprep.subr.bf16.mxu0 %v5954_v2  ;;  %2952 = vrcp.f32 %v283_v42  ;;  %v2943_v16 = vpop.eup %2942  ;;  %v285_v56 = vadd.f32 1.0, %v2941_v30  ;;  %v2638_v42 = vmul.f32 -1.442695, %v4513_v35  ;;  %v2640_v35 = vmul.f32 -1.442695, %v4528_v52 }
 0x342   :  { %v4791_v40 = vmul.f32 %v1538_v38, %v3832_v62  ;;  %1678 = vadd.xlane.f32.xlu1 %v1620_v49  ;;  %v1540_v8 = vpop.f32.mrb[87].mxu1  ;;  %v2636_v49 = vmul.f32 -1.442695, %v4506_v32  ;;  %2954 = vpow2.f32 %v2633_v12  ;;  %v288_v12 = vadd.f32 1.0, %v2943_v16 }
 0x344   :  { %6080 = vst [vmem:[#allocation160_spill] sm:$0xff] %v4791_v40  ;;  %v1973_v37 = vmul.f32 %v4791_v40, %v3832_v62  ;;  %v1621_v27 = vmul.f32 %v4306_v48, %v4791_v40  ;;  %v4807_v62 = vpop.xlane.xlu0 %1035  ;;  %2956 = vpow2.f32 %v2636_v49  ;;  %v4811_v59 = vpop.xlane.xlu1 %1005 }
 0x345   :  { %v1543_v38 = vpop.f32.mrb[88].mxu1  ;;  %2958 = vrcp.f32 %v286_v41  ;;  %v4825_v30 = vpop.eup %2944 }
 0x346   :  { %v2888_v43 = vpack.c.bf16 %v1973_v37, %v1972_v25  ;;  %v4804_v8 = vmul.f32 %v1543_v38, %v3850_v15  ;;  %v1545_v50 = vpop.f32.mrb[89].mxu1  ;;  %1680 = vadd.xlane.f32.xlu0 %v1621_v27  ;;  %2960 = vpow2.f32 %v2635_v63  ;;  %v2637_v37 = vmul.f32 -1.442695, %v4508_v11  ;;  %v2947_v63 = vpop.eup %2946 }
 0x347   :  { %2962 = vrcp.f32 %v285_v56  ;;  %v2639_v11 = vmul.f32 -1.442695, %v4520_v28 }
 0x348   :  { %6081 = vst [vmem:[#allocation161_spill] sm:$0xff] %v4804_v8  ;;  %2889 = vmatpush1.bf16.msra.mxu0 %v2888_v43  ;;  %v1622_v32 = vmul.f32 %v4306_v48, %v4804_v8  ;;  %v1974_v27 = vmul.f32 %v4804_v8, %v3850_v15  ;;  %v4828_v41 = vpop.xlane.xlu0 %1007  ;;  %2964 = vpow2.f32 %v2638_v42  ;;  %v4835_v56 = vpop.xlane.xlu1 %1037 }
 0x349   :  { %v1548_v4 = vpop.f32.mrb[90].mxu1  ;;  %2890 = vmatprep.subr.bf16.mxu0 %v5954_v2  ;;  %2966 = vrcp.f32 %v288_v12 }
 0x34a   :  { %v4816_v36 = vmul.f32 %v1548_v4, %v3848_v14  ;;  %1682 = vadd.xlane.f32.xlu1 %v1622_v32  ;;  %v1550_v25 = vpop.f32.mrb[91].mxu1  ;;  %v2949_v4 = vpop.eup %2948  ;;  %2968 = vpow2.f32 %v2637_v37 }
 0x34b   :  { %v2642_v25 = vmul.f32 -1.442695, %v4541_v18  ;;  %v4837_v52 = vpop.eup %2950  ;;  %2970 = vpow2.f32 %v2640_v35  ;;  %v2644_v18 = vmul.f32 -1.442695, %v4556_v21 }
 0x34c   :  { %6082 = vst [vmem:[#allocation162_spill] sm:$0xff] %v4816_v36  ;;  %v1975_v49 = vmul.f32 %v4816_v36, %v3848_v14  ;;  %v1623_v38 = vmul.f32 %v4306_v48, %v4816_v36  ;;  %v4841_v28 = vpop.eup %2952  ;;  %2972 = vpow2.f32 %v2639_v11  ;;  %v3445_v11 = vld [vmem:[%s5614_s3] ss:$0 sm:$0xff] }
 0x34d   :  { %v1553_v16 = vpop.f32.mrb[92].mxu1  ;;  %v2955_v12 = vpop.eup %2954  ;;  %2974 = vpow2.f32 %v2642_v25  ;;  %v290_v25 = vadd.f32 1.0, %v2949_v4 }
 0x34e   :  { %v2891_v43 = vpack.c.bf16 %v1975_v49, %v1974_v27  ;;  %v4832_v50 = vmul.f32 %v1553_v16, %v3866_v31  ;;  %v1555_v32 = vpop.f32.mrb[93].mxu1  ;;  %1684 = vadd.xlane.f32.xlu0 %v1623_v38  ;;  %v2641_v27 = vmul.f32 -1.442695, %v4535_v19  ;;  %v2957_v16 = vpop.eup %2956  ;;  %v2643_v19 = vmul.f32 -1.442695, %v4552_v39 }
 0x34f   :  { %v4851_v35 = vpop.eup %2958  ;;  %v2646_v39 = vmul.f32 -1.442695, %v4573_v55  ;;  %v292_v4 = vadd.f32 1.0, %v2957_v16  ;;  %v2648_v55 = vmul.f32 -1.442695, %v4589_v10 }
 0x350   :  { %6083 = vst [vmem:[#allocation163_spill] sm:$0xff] %v4832_v50  ;;  %2892 = vmatpush1.bf16.msra.mxu0 %v2891_v43  ;;  %v1624_v42 = vmul.f32 %v4306_v48, %v4832_v50  ;;  %v287_v43 = vadd.f32 1.0, %v2947_v63  ;;  %v4849_v48 = vpop.xlane.xlu0 %1039  ;;  %v2961_v63 = vpop.eup %2960  ;;  %2976 = vpow2.f32 %v2641_v27 }
 0x351   :  { %v1558_v49 = vpop.f32.mrb[94].mxu1  ;;  %2893 = vmatprep.subr.bf16.mxu0 %v5954_v2  ;;  %v1976_v2 = vmul.f32 %v4832_v50, %v3866_v31  ;;  %2978 = vpow2.f32 %v2644_v18  ;;  %v289_v50 = vadd.f32 1.0, %v2955_v12  ;;  %v2645_v31 = vmul.f32 -1.442695, %v4568_v7 }
 0x352   :  { %v4847_v38 = vmul.f32 %v1558_v49, %v3864_v26  ;;  %1686 = vadd.xlane.f32.xlu1 %v1624_v42  ;;  %v1560_v37 = vpop.f32.mrb[95].mxu1  ;;  %v4862_v42 = vpop.xlane.xlu1 %1009  ;;  %2980 = vrcp.f32 %v287_v43  ;;  %v2647_v7 = vmul.f32 -1.442695, %v4581_v61 }
 0x353   :  { %v4865_v37 = vpop.eup %2962  ;;  %2982 = vpow2.f32 %v2643_v19 }
 0x354   :  { %6084 = vst [vmem:[#allocation164_spill] sm:$0xff] %v4847_v38  ;;  %v1977_v21 = vmul.f32 %v4847_v38, %v3864_v26  ;;  %v1625_v32 = vmul.f32 %v3445_v11, %v4847_v38  ;;  %v2965_v26 = vpop.eup %2964  ;;  %2984 = vrcp.f32 %v290_v25  ;;  %v4870_v27 = vpop.xlane.xlu0 %1011 }
 0x355   :  { %v4868_v11 = vpop.eup %2966  ;;  %2986 = vpow2.f32 %v2646_v39  ;;  %v294_v19 = vadd.f32 1.0, %v2965_v26 }
 0x356   :  { %v2894_v49 = vpack.c.bf16 %v1977_v21, %v1976_v2  ;;  %1688 = vadd.xlane.f32.xlu0 %v1625_v32  ;;  %v2969_v18 = vpop.eup %2968  ;;  %2988 = vrcp.f32 %v289_v50  ;;  %v291_v21 = vadd.f32 1.0, %v2961_v63  ;;  %v4873_v43 = vpop.xlane.xlu1 %1041 }
 0x357   :  { %v2971_v2 = vpop.eup %2970  ;;  %2990 = vpow2.f32 %v2645_v31  ;;  %v293_v32 = vadd.f32 1.0, %v2969_v18  ;;  %v2658_v18 = vmul.f32 -1.442695, %v4678_v46 }
 0x358   :  { %2895 = vmatpush1.bf16.msra.mxu0 %v2894_v49  ;;  %v2973_v12 = vpop.eup %2972  ;;  %2992 = vrcp.f32 %v292_v4  ;;  %v296_v10 = vadd.f32 1.0, %v2971_v2  ;;  %v4878_v50 = vpop.xlane.xlu0 %1043 }
 0x359   :  { %v2975_v16 = vpop.eup %2974  ;;  %2994 = vpow2.f32 %v2648_v55 }
 0x35a   :  { %v2977_v25 = vpop.eup %2976  ;;  %2996 = vrcp.f32 %v291_v21  ;;  %v4884_v61 = vpop.xlane.xlu1 %1013 }
 0x35b   :  { %2043 = vmatmul.mubr.f32.vlgmr.msra.gmra.mrb[32].mxu0 %v3894_v54  ;;  %v2979_v63 = vpop.eup %2978  ;;  %v295_v54 = vadd.f32 1.0, %v2973_v12  ;;  %2998 = vpow2.f32 %v2647_v7  ;;  %v297_v39 = vadd.f32 1.0, %v2977_v25  ;;  %v6085_v12 = vld [vmem:[#allocation134_spill] sm:$0xff]  ;;  %v6088_v25 = vld [vmem:[#allocation43_spill] sm:$0xff] }
 0x35c   :  { %2047 = vmatprep.mubr.f32.mxu0 %v3899_v60  ;;  %v4882_v31 = vpop.eup %2980  ;;  %3000 = vrcp.f32 %v294_v19  ;;  %v298_v60 = vadd.f32 1.0, %v2975_v16  ;;  %v300_v4 = vadd.f32 1.0, %v2979_v63  ;;  %v4893_v2 = vpop.xlane.xlu0 %1015  ;;  %v2649_v7 = vmul.f32 -1.442695, %v6085_v12 }
 0x35d   :  { %v2983_v26 = vpop.eup %2982  ;;  %3002 = vrcp.f32 %v293_v32  ;;  %v6087_v32 = vld [vmem:[#allocation41_spill] sm:$0xff] }
 0x35e   :  { %v4886_v49 = vpop.eup %2984  ;;  %3004 = vrcp.f32 %v296_v10  ;;  %v299_v55 = vadd.f32 1.0, %v2983_v26  ;;  %v4898_v19 = vpop.xlane.xlu1 %1045 }
 0x35f   :  { %2048 = vmatmul.mubr.f32.gmra.mrb[34].mxu0 %v3913_v34  ;;  %v2987_v34 = vpop.eup %2986  ;;  %3006 = vrcp.f32 %v295_v54  ;;  %6086 = vst [vmem:[#allocation134_spill] sm:$0xff] %v4898_v19 }
 0x360   :  { %2052 = vmatprep.mubr.f32.mxu0 %v3919_v6  ;;  %v4891_v6 = vpop.eup %2988  ;;  %3008 = vrcp.f32 %v298_v60  ;;  %v6089_v60 = vld [vmem:[#allocation136_spill] sm:$0xff] }
 0x361   :  { %v2991_v21 = vpop.eup %2990  ;;  %3010 = vrcp.f32 %v297_v39  ;;  %v2650_v26 = vmul.f32 -1.442695, %v6089_v60 }
 0x362   :  { %v4896_v16 = vpop.eup %2992  ;;  %3012 = vrcp.f32 %v300_v4  ;;  %v301_v63 = vadd.f32 1.0, %v2991_v21  ;;  %v6093_v21 = vld [vmem:[#allocation47_spill] sm:$0xff] }
 0x363   :  { %2053 = vmatmul.mubr.f32.gmra.mrb[36].mxu0 %v3931_v13  ;;  %v302_v13 = vadd.f32 1.0, %v2987_v34  ;;  %v2995_v46 = vpop.eup %2994  ;;  %3014 = vpow2.f32 %v2658_v18  ;;  %v4908_v34 = vpop.xlane.xlu0 %1047  ;;  %v6092_v18 = vld [vmem:[#allocation45_spill] sm:$0xff] }
 0x364   :  { %2057 = vmatprep.mubr.f32.mxu0 %v3937_v22  ;;  %v2659_v22 = vmul.f32 -1.442695, %v4690_v0  ;;  %v4903_v10 = vpop.eup %2996  ;;  %3016 = vrcp.f32 %v299_v55  ;;  %v304_v4 = vadd.f32 1.0, %v2995_v46  ;;  %6090 = vst [vmem:[#allocation41_spill] sm:$0xff] %v4908_v34  ;;  %v2660_v55 = vmul.f32 -1.442695, %v4711_v53 }
 0x365   :  { %v2999_v54 = vpop.eup %2998  ;;  %3018 = vpow2.f32 %v2649_v7  ;;  %v6094_v46 = vld [vmem:[#allocation139_spill] sm:$0xff] }
 0x366   :  { %v4906_v39 = vpop.eup %3000  ;;  %3020 = vrcp.f32 %v302_v13  ;;  %v303_v7 = vadd.f32 1.0, %v2999_v54  ;;  %v2652_v60 = vmul.f32 -1.442695, %v6094_v46  ;;  %v6097_v54 = vld [vmem:[#allocation51_spill] sm:$0xff] }
 0x367   :  { %2058 = vmatmul.mubr.f32.gmra.mrb[38].mxu0 %v6087_v32  ;;  %v4910_v12 = vpop.xlane.xlu1 %1626  ;;  %v4913_v0 = vpop.eup %3002  ;;  %3022 = vpow2.f32 %v2659_v22  ;;  %v6096_v22 = vld [vmem:[#allocation49_spill] sm:$0xff] }
 0x368   :  { %2062 = vmatprep.mubr.f32.mxu0 %v6088_v25  ;;  %6091 = vst [vmem:[#allocation43_spill] sm:$0xff] %v4910_v12  ;;  %v4917_v32 = vpop.eup %3004  ;;  %3024 = vrcp.f32 %v301_v63 }
 0x369   :  { %v4919_v25 = vpop.eup %3006  ;;  %3026 = vpow2.f32 %v2650_v26  ;;  %v6098_v26 = vld [vmem:[#allocation138_spill] sm:$0xff] }
 0x36a   :  { %v4921_v13 = vpop.eup %3008  ;;  %3028 = vrcp.f32 %v304_v4  ;;  %v2651_v4 = vmul.f32 -1.442695, %v6098_v26 }
 0x36b   :  { %2063 = vmatmul.mubr.f32.gmra.mrb[40].mxu0 %v6092_v18  ;;  %v4924_v18 = vpop.xlane.xlu0 %1628  ;;  %v4927_v53 = vpop.eup %3010  ;;  %3030 = vpow2.f32 %v2660_v55 }
 0x36c   :  { %2067 = vmatprep.mubr.f32.mxu0 %v6093_v21  ;;  %6095 = vst [vmem:[#allocation136_spill] sm:$0xff] %v4924_v18  ;;  %v2661_v21 = vmul.f32 -1.442695, %v4718_v5  ;;  %v4931_v34 = vpop.eup %3012  ;;  %3032 = vrcp.f32 %v303_v7  ;;  %v6099_v18 = vld [vmem:[#allocation53_spill] sm:$0xff]  ;;  %v2662_v5 = vmul.f32 -1.442695, %v4741_v58 }
 0x36d   :  { %v3015_v19 = vpop.eup %3014  ;;  %v2663_v58 = vmul.f32 -1.442695, %v4755_v1 }
 0x36e   :  { %v4934_v46 = vpop.eup %3016  ;;  %v1147_v26 = vadd.f32 1.0, %v3015_v19 }
 0x36f   :  { %v1631_v38 = vpop.xlane.xlu1 %1630  ;;  %2068 = vmatmul.mubr.f32.gmra.mrb[42].mxu0 %v6096_v22  ;;  %v2653_v22 = vmul.f32 -1.442695, %v4629_v20  ;;  %v3019_v12 = vpop.eup %3018 }
 0x370   :  { %v2690_v63 = vmul.f32 -1.442695, %v1631_v38  ;;  %2072 = vmatprep.mubr.f32.mxu0 %v6097_v54  ;;  %v6100_v54 = vld [vmem:[#allocation55_spill] sm:$0xff]  ;;  %v4940_v7 = vpop.eup %3020 }
 0x372   :  { %3034 = vpow2.f32 %v2690_v63  ;;  %v3023_v63 = vpop.eup %3022 }
 0x373   :  { %3036 = vpow2.f32 %v2652_v60  ;;  %2073 = vmatmul.mubr.f32.gmra.mrb[44].mxu0 %v6099_v18  ;;  %v1633_v55 = vpop.xlane.xlu0 %1632  ;;  %v4942_v14 = vpop.eup %3024  ;;  %v305_v60 = vadd.f32 1.0, %v3019_v12  ;;  %v6101_v18 = vld [vmem:[#allocation57_spill] sm:$0xff]  ;;  %v1148_v19 = vadd.f32 1.0, %v3023_v63 }
 0x374   :  { %3038 = vpow2.f32 %v2661_v21  ;;  %v2691_v38 = vmul.f32 -1.442695, %v1633_v55  ;;  %2077 = vmatprep.mubr.f32.mxu0 %v6100_v54  ;;  %v4945_v15 = vpop.eup %3026  ;;  %v6102_v55 = vld [vmem:[#allocation59_spill] sm:$0xff]  ;;  %v6105_v12 = vld [vmem:[#allocation61_spill] sm:$0xff] }
 0x375   :  { %3040 = vpow2.f32 %v2651_v4  ;;  %v4949_v54 = vpop.eup %3028 }
 0x376   :  { %3042 = vpow2.f32 %v2691_v38  ;;  %6103 = vst [vmem:[#allocation45_spill] sm:$0xff] %v4949_v54  ;;  %v3031_v4 = vpop.eup %3030 }
 0x377   :  { %3044 = vpow2.f32 %v2653_v22  ;;  %v1635_v20 = vpop.xlane.xlu1 %1634  ;;  %2078 = vmatmul.mubr.f32.gmra.mrb[46].mxu0 %v6101_v18  ;;  %v4951_v38 = vpop.eup %3032 }
 0x378   :  { %3046 = vpow2.f32 %v2662_v5  ;;  %v2692_v21 = vmul.f32 -1.442695, %v1635_v20  ;;  %2082 = vmatprep.mubr.f32.mxu0 %v6102_v55  ;;  %6104 = vst [vmem:[#allocation47_spill] sm:$0xff] %v4951_v38  ;;  %v2664_v5 = vmul.f32 -1.442695, %v4778_v45  ;;  %v6106_v20 = vld [vmem:[#allocation63_spill] sm:$0xff] }
 0x379   :  { %3048 = vrcp.f32 %v1147_v26  ;;  %v1149_v26 = vadd.f32 1.0, %v3031_v4  ;;  %v2665_v45 = vmul.f32 -1.442695, %v4787_v17  ;;  %v2668_v38 = vmul.f32 -1.442695, %v4862_v42  ;;  %v6122_v42 = vld [vmem:[#allocation128_spill] sm:$0xff] }
 0x37a   :  { %3050 = vpow2.f32 %v2692_v21 }
 0x37b   :  { %3052 = vrcp.f32 %v305_v60  ;;  %2083 = vmatmul.mubr.f32.gmra.mrb[48].mxu0 %v6105_v12  ;;  %v1637_v22 = vpop.xlane.xlu0 %1636  ;;  %v6108_v12 = vld [vmem:[#allocation65_spill] sm:$0xff] }
 0x37c   :  { %v3035_v18 = vpop.eup %3034  ;;  %3054 = vpow2.f32 %v2663_v58  ;;  %v2693_v1 = vmul.f32 -1.442695, %v1637_v22  ;;  %2087 = vmatprep.mubr.f32.mxu0 %v6106_v20  ;;  %v6109_v22 = vld [vmem:[#allocation67_spill] sm:$0xff] }
 0x37d   :  { %v4956_v55 = vpop.eup %3036  ;;  %3056 = vrcp.f32 %v1148_v19  ;;  %v1788_v63 = vadd.f32 1.0, %v3035_v18 }
 0x37e   :  { %6107 = vst [vmem:[#allocation139_spill] sm:$0xff] %v4956_v55  ;;  %v3039_v36 = vpop.eup %3038  ;;  %3058 = vpow2.f32 %v2693_v1 }
 0x37f   :  { %v4958_v21 = vpop.eup %3040  ;;  %3060 = vrcp.f32 %v1788_v63  ;;  %v1639_v60 = vpop.xlane.xlu1 %1638  ;;  %2088 = vmatmul.mubr.f32.gmra.mrb[50].mxu0 %v6108_v12  ;;  %v1150_v19 = vadd.f32 1.0, %v3039_v36  ;;  %v6111_v63 = vld [vmem:[#allocation69_spill] sm:$0xff] }
 0x380   :  { %v3043_v8 = vpop.eup %3042  ;;  %3062 = vpow2.f32 %v2664_v5  ;;  %v2694_v58 = vmul.f32 -1.442695, %v1639_v60  ;;  %2092 = vmatprep.mubr.f32.mxu0 %v6109_v22  ;;  %v2666_v5 = vmul.f32 -1.442695, %v4811_v59  ;;  %v6112_v60 = vld [vmem:[#allocation71_spill] sm:$0xff]  ;;  %v6115_v59 = vld [vmem:[#allocation73_spill] sm:$0xff] }
 0x381   :  { %v4963_v20 = vpop.eup %3044  ;;  %3064 = vrcp.f32 %v1149_v26  ;;  %v1789_v4 = vadd.f32 1.0, %v3043_v8 }
 0x382   :  { %6110 = vst [vmem:[#allocation49_spill] sm:$0xff] %v4963_v20  ;;  %v3047_v18 = vpop.eup %3046  ;;  %3066 = vpow2.f32 %v2694_v58  ;;  %v3446_v58 = vld [vmem:[%s5613_s1 + $0x10] sm:$0xff] }
 0x383   :  { %v3049_v1 = vpop.eup %3048  ;;  %3068 = vrcp.f32 %v1789_v4  ;;  %2093 = vmatmul.mubr.f32.gmra.mrb[52].mxu0 %v6111_v63  ;;  %v1641_v40 = vpop.xlane.xlu0 %1640  ;;  %v1151_v26 = vadd.f32 1.0, %v3047_v18  ;;  %v378_v4 = vmul.f32 %v3446_v58, %v4825_v30  ;;  %v6114_v63 = vld [vmem:[#allocation95_spill] sm:$0xff]  ;;  %v3447_v30 = vld [vmem:[%s5613_s1 + $0x18] sm:$0xff] }
 0x384   :  { %v3051_v12 = vpop.eup %3050  ;;  %3070 = vpow2.f32 %v2665_v45  ;;  %v2695_v17 = vmul.f32 -1.442695, %v1641_v40  ;;  %2097 = vmatprep.mubr.f32.mxu0 %v6112_v60  ;;  %v1243_v20 = vmul.f32 %v3049_v1, %v6114_v63  ;;  %v379_v1 = vmul.f32 %v3447_v30, %v4841_v28 }
 0x385   :  { %v4968_v22 = vpop.eup %3052  ;;  %3072 = vrcp.f32 %v1150_v19  ;;  %v1790_v36 = vadd.f32 1.0, %v3051_v12  ;;  %v2667_v19 = vmul.f32 -1.442695, %v4828_v41  ;;  %v6116_v12 = vld [vmem:[#allocation75_spill] sm:$0xff] }
 0x386   :  { %6113 = vst [vmem:[#allocation51_spill] sm:$0xff] %v4968_v22  ;;  %v3055_v8 = vpop.eup %3054  ;;  %3074 = vpow2.f32 %v2695_v17  ;;  %v1275_v63 = vadd.f32 %v1243_v20, %v378_v4 }
 0x387   :  { %v3057_v45 = vpop.eup %3056  ;;  %3076 = vrcp.f32 %v1790_v36  ;;  %v1643_v40 = vpop.xlane.xlu1 %1642  ;;  %2098 = vmatmul.mubr.f32.gmra.mrb[54].mxu0 %v6115_v59  ;;  %v1152_v17 = vadd.f32 1.0, %v3055_v8  ;;  %v6117_v59 = vld [vmem:[#allocation97_spill] sm:$0xff]  ;;  %v6120_v8 = vld [vmem:[#allocation79_spill] sm:$0xff] }
 0x388   :  { %v3059_v60 = vpop.eup %3058  ;;  %3078 = vpow2.f32 %v2666_v5  ;;  %v2696_v18 = vmul.f32 -1.442695, %v1643_v40  ;;  %2102 = vmatprep.mubr.f32.mxu0 %v6116_v12  ;;  %v1244_v54 = vmul.f32 %v3057_v45, %v6117_v59  ;;  %v6118_v5 = vld [vmem:[#allocation127_spill] sm:$0xff]  ;;  %v6119_v40 = vld [vmem:[#allocation77_spill] sm:$0xff] }
 0x389   :  { %v3061_v22 = vpop.eup %3060  ;;  %3080 = vrcp.f32 %v1151_v26  ;;  %v1791_v36 = vadd.f32 1.0, %v3059_v60 }
 0x38a   :  { %v3063_v58 = vpop.eup %3062  ;;  %v1884_v55 = vmul.f32 %v3061_v22, %v6118_v5  ;;  %3082 = vpow2.f32 %v2696_v18  ;;  %v3448_v22 = vld [vmem:[%s5613_s1 + $0x20] sm:$0xff]  ;;  %v1276_v30 = vadd.f32 %v1244_v54, %v379_v1  ;;  %v6123_v5 = vld [vmem:[#allocation81_spill] sm:$0xff]  ;;  %v3449_v1 = vld [vmem:[%s5613_s1 + $0x28] sm:$0xff] }
 0x38b   :  { %v3065_v41 = vpop.eup %3064  ;;  %3084 = vrcp.f32 %v1791_v36  ;;  %2103 = vmatmul.mubr.f32.gmra.mrb[56].mxu0 %v6119_v40  ;;  %v1645_v12 = vpop.xlane.xlu0 %1644  ;;  %v380_v4 = vmul.f32 %v3448_v22, %v4837_v52  ;;  %v1153_v45 = vadd.f32 1.0, %v3063_v58  ;;  %v381_v58 = vmul.f32 %v3449_v1, %v4865_v37 }
 0x38c   :  { %v3067_v29 = vpop.eup %3066  ;;  %3086 = vpow2.f32 %v2667_v19  ;;  %v4986_v28 = vadd.f32 %v1884_v55, %v1275_v63  ;;  %v2697_v26 = vmul.f32 -1.442695, %v1645_v12  ;;  %2107 = vmatprep.mubr.f32.mxu0 %v6120_v8  ;;  %v6121_v19 = vld [vmem:[#allocation99_spill] sm:$0xff]  ;;  %v2669_v12 = vmul.f32 -1.442695, %v4870_v27  ;;  %v6126_v27 = vld [vmem:[#allocation129_spill] sm:$0xff] }
 0x38d   :  { %v3069_v20 = vpop.eup %3068  ;;  %3088 = vrcp.f32 %v1152_v17  ;;  %v1792_v60 = vadd.f32 1.0, %v3067_v29  ;;  %v1245_v36 = vmul.f32 %v3065_v41, %v6121_v19  ;;  %v6124_v29 = vld [vmem:[#allocation83_spill] sm:$0xff]  ;;  %v6127_v19 = vld [vmem:[#allocation85_spill] sm:$0xff] }
 0x38e   :  { %v3071_v18 = vpop.eup %3070  ;;  %v1885_v55 = vmul.f32 %v3069_v20, %v6122_v42  ;;  %3090 = vpow2.f32 %v2697_v26 }
 0x38f   :  { %v3073_v63 = vpop.eup %3072  ;;  %3092 = vrcp.f32 %v1792_v60  ;;  %v1647_v59 = vpop.xlane.xlu1 %1646  ;;  %2108 = vmatmul.mubr.f32.gmra.mrb[58].mxu0 %v6123_v5  ;;  %v1154_v41 = vadd.f32 1.0, %v3071_v18  ;;  %v1277_v20 = vadd.f32 %v1245_v36, %v380_v4  ;;  %v6128_v18 = vld [vmem:[#allocation87_spill] sm:$0xff]  ;;  %v3450_v36 = vld [vmem:[%s5613_s1 + $0x30] sm:$0xff] }
 0x390   :  { %v3075_v40 = vpop.eup %3074  ;;  %3094 = vpow2.f32 %v2668_v38  ;;  %v4997_v52 = vadd.f32 %v1885_v55, %v1276_v30  ;;  %v2698_v17 = vmul.f32 -1.442695, %v1647_v59  ;;  %2112 = vmatprep.mubr.f32.mxu0 %v6124_v29  ;;  %v6125_v38 = vld [vmem:[#allocation101_spill] sm:$0xff]  ;;  %v2670_v59 = vmul.f32 -1.442695, %v4884_v61  ;;  %v6130_v61 = vld [vmem:[#allocation130_spill] sm:$0xff] }
 0x391   :  { %v3077_v54 = vpop.eup %3076  ;;  %3096 = vrcp.f32 %v1153_v45  ;;  %v1793_v26 = vadd.f32 1.0, %v3075_v40  ;;  %v1246_v22 = vmul.f32 %v3073_v63, %v6125_v38  ;;  %v382_v63 = vmul.f32 %v3450_v36, %v4851_v35  ;;  %v6131_v38 = vld [vmem:[#allocation89_spill] sm:$0xff] }
 0x392   :  { %v3079_v8 = vpop.eup %3078  ;;  %v1886_v60 = vmul.f32 %v3077_v54, %v6126_v27  ;;  %3098 = vpow2.f32 %v2698_v17 }
 0x393   :  { %v3081_v30 = vpop.eup %3080  ;;  %3100 = vrcp.f32 %v1793_v26  ;;  %2113 = vmatmul.mubr.f32.gmra.mrb[60].mxu0 %v6127_v19  ;;  %v1649_v42 = vpop.xlane.xlu0 %1648  ;;  %v1155_v5 = vadd.f32 1.0, %v3079_v8  ;;  %v1278_v29 = vadd.f32 %v1246_v22, %v381_v58  ;;  %v6132_v8 = vld [vmem:[#allocation2_spill] sm:$0xff]  ;;  %v3451_v22 = vld [vmem:[%s5613_s1 + $0x38] sm:$0xff] }
 0x394   :  { %v3083_v55 = vpop.eup %3082  ;;  %3102 = vpow2.f32 %v2669_v12  ;;  %v5008_v37 = vadd.f32 %v1886_v60, %v1277_v20  ;;  %v2699_v45 = vmul.f32 -1.442695, %v1649_v42  ;;  %2117 = vmatprep.mubr.f32.mxu0 %v6128_v18  ;;  %v6129_v12 = vld [vmem:[#allocation103_spill] sm:$0xff]  ;;  %v2671_v60 = vmul.f32 -1.442695, %v4893_v2 }
 0x395   :  { %v3085_v4 = vpop.eup %3084  ;;  %3104 = vrcp.f32 %v1154_v41  ;;  %v1794_v40 = vadd.f32 1.0, %v3083_v55  ;;  %v1247_v54 = vmul.f32 %v3081_v30, %v6129_v12  ;;  %v383_v30 = vmul.f32 %v3451_v22, %v4882_v31  ;;  %v6134_v2 = vld [vmem:[#allocation131_spill] sm:$0xff] }
 0x396   :  { %v3087_v17 = vpop.eup %3086  ;;  %v1887_v1 = vmul.f32 %v3085_v4, %v6130_v61  ;;  %3106 = vpow2.f32 %v2699_v45  ;;  %v2672_v61 = vmul.f32 -1.442695, %v4663_v51 }
 0x397   :  { %v3089_v26 = vpop.eup %3088  ;;  %3108 = vrcp.f32 %v1794_v40  ;;  %v1651_v20 = vpop.xlane.xlu1 %1650  ;;  %2118 = vmatmul.mubr.f32.gmra.mrb[62].mxu0 %v6131_v38  ;;  %v1156_v19 = vadd.f32 1.0, %v3087_v17  ;;  %v1279_v45 = vadd.f32 %v1247_v54, %v382_v63  ;;  %v6135_v40 = vld [vmem:[#allocation35_spill] sm:$0xff]  ;;  %v6136_v17 = vld [vmem:[#allocation36_spill] sm:$0xff]  ;;  %v3452_v54 = vld [vmem:[%s5613_s1 + $0x40] sm:$0xff] }
 0x398   :  { %v3091_v27 = vpop.eup %3090  ;;  %3110 = vpow2.f32 %v2670_v59  ;;  %v5019_v35 = vadd.f32 %v1887_v1, %v1278_v29  ;;  %v2700_v41 = vmul.f32 -1.442695, %v1651_v20  ;;  %2122 = vmatprep.mubr.f32.mxu0 %v6132_v8  ;;  %v6133_v59 = vld [vmem:[#allocation105_spill] sm:$0xff]  ;;  %v384_v1 = vmul.f32 %v3452_v54, %v4868_v11 }
 0x399   :  { %v3093_v58 = vpop.eup %3092  ;;  %3112 = vrcp.f32 %v1155_v5  ;;  %v1795_v42 = vadd.f32 1.0, %v3091_v27  ;;  %v1248_v18 = vmul.f32 %v3089_v26, %v6133_v59  ;;  %v2673_v59 = vmul.f32 -1.442695, %v4674_v47  ;;  %v6142_v47 = vld [vmem:[#allocation133_spill] sm:$0xff] }
 0x39a   :  { %v3095_v55 = vpop.eup %3094  ;;  %v1888_v4 = vmul.f32 %v3093_v58, %v6134_v2  ;;  %3114 = vpow2.f32 %v2700_v41  ;;  %v6137_v41 = vld [vmem:[#allocation107_spill] sm:$0xff] }
 0x39b   :  { %v3097_v36 = vpop.eup %3096  ;;  %3116 = vrcp.f32 %v1795_v42  ;;  %2123 = vmatmul.mubr.f32.gmra.mrb[64].mxu0 %v6135_v40  ;;  %v1653_v29 = vpop.xlane.xlu0 %1652  ;;  %v1157_v26 = vadd.f32 1.0, %v3095_v55  ;;  %v1280_v27 = vadd.f32 %v1248_v18, %v383_v30  ;;  %v6139_v42 = vld [vmem:[#allocation37_spill] sm:$0xff]  ;;  %v6140_v55 = vld [vmem:[#allocation38_spill] sm:$0xff]  ;;  %v3453_v18 = vld [vmem:[%s5613_s1 + $0x48] sm:$0xff] }
 0x39c   :  { %v3099_v12 = vpop.eup %3098  ;;  %3118 = vpow2.f32 %v2671_v60  ;;  %v5030_v31 = vadd.f32 %v1888_v4, %v1279_v45  ;;  %v2701_v5 = vmul.f32 -1.442695, %v1653_v29  ;;  %2127 = vmatprep.mubr.f32.mxu0 %v6136_v17  ;;  %v1249_v51 = vmul.f32 %v3097_v36, %v6137_v41  ;;  %v6138_v60 = vld [vmem:[#allocation132_spill] sm:$0xff] }
 0x39d   :  { %v3101_v63 = vpop.eup %3100  ;;  %3120 = vrcp.f32 %v1156_v19  ;;  %v1796_v20 = vadd.f32 1.0, %v3099_v12  ;;  %v385_v2 = vmul.f32 %v3453_v18, %v4891_v6  ;;  %v6141_v12 = vld [vmem:[#allocation109_spill] sm:$0xff]  ;;  %v3454_v41 = vld [vmem:[%s5613_s1 + $0x50] sm:$0xff] }
 0x39e   :  { %v3103_v38 = vpop.eup %3102  ;;  %v1889_v8 = vmul.f32 %v3101_v63, %v6138_v60  ;;  %3122 = vpow2.f32 %v2701_v5  ;;  %v1281_v29 = vadd.f32 %v1249_v51, %v384_v1  ;;  %v6143_v63 = vld [vmem:[#allocation39_spill] sm:$0xff]  ;;  %v386_v51 = vmul.f32 %v3454_v41, %v4886_v49 }
 0x39f   :  { %v3105_v58 = vpop.eup %3104  ;;  %3124 = vrcp.f32 %v1796_v20  ;;  %v1655_v22 = vpop.xlane.xlu1 %1654  ;;  %2128 = vmatmul.mubr.f32.gmra.mrb[66].mxu0 %v6139_v42  ;;  %v1158_v4 = vadd.f32 1.0, %v3103_v38  ;;  %v6144_v38 = vld [vmem:[#allocation40_spill] sm:$0xff]  ;;  %v6145_v42 = vld [vmem:[#allocation111_spill] sm:$0xff]  ;;  %v2676_v41 = vmul.f32 -1.442695, %v4724_v9 }
 0x3a0   :  { %v3107_v45 = vpop.eup %3106  ;;  %3126 = vpow2.f32 %v2672_v61  ;;  %v5041_v11 = vadd.f32 %v1889_v8, %v1280_v27  ;;  %v2702_v19 = vmul.f32 -1.442695, %v1655_v22  ;;  %2132 = vmatprep.mubr.f32.mxu0 %v6140_v55  ;;  %v1250_v61 = vmul.f32 %v3105_v58, %v6141_v12  ;;  %v6154_v9 = vld [vmem:[#allocation140_spill] sm:$0xff] }
 0x3a1   :  { %v3109_v30 = vpop.eup %3108  ;;  %3128 = vrcp.f32 %v1157_v26  ;;  %v1797_v36 = vadd.f32 1.0, %v3107_v45  ;;  %v2674_v27 = vmul.f32 -1.442695, %v4695_v24  ;;  %v6146_v24 = vld [vmem:[#allocation135_spill] sm:$0xff] }
 0x3a2   :  { %v3111_v40 = vpop.eup %3110  ;;  %v1890_v5 = vmul.f32 %v3109_v30, %v6142_v47  ;;  %3130 = vpow2.f32 %v2702_v19  ;;  %v1282_v22 = vadd.f32 %v1250_v61, %v385_v2  ;;  %v6147_v30 = vld [vmem:[#allocation42_spill] sm:$0xff] }
 0x3a3   :  { %v3113_v17 = vpop.eup %3112  ;;  %3132 = vrcp.f32 %v1797_v36  ;;  %2133 = vmatmul.mubr.f32.gmra.mrb[68].mxu0 %v6143_v63  ;;  %v1657_v54 = vpop.xlane.xlu0 %1656  ;;  %v1159_v60 = vadd.f32 1.0, %v3111_v40  ;;  %v2675_v36 = vmul.f32 -1.442695, %v4703_v44  ;;  %v6148_v40 = vld [vmem:[#allocation44_spill] sm:$0xff]  ;;  %v6149_v63 = vld [vmem:[#allocation113_spill] sm:$0xff] }
 0x3a4   :  { %v3115_v20 = vpop.eup %3114  ;;  %3134 = vpow2.f32 %v2673_v59  ;;  %v5052_v6 = vadd.f32 %v1890_v5, %v1281_v29  ;;  %v2703_v26 = vmul.f32 -1.442695, %v1657_v54  ;;  %2137 = vmatprep.mubr.f32.mxu0 %v6144_v38  ;;  %v1251_v45 = vmul.f32 %v3113_v17, %v6145_v42  ;;  %v3455_v29 = vld [vmem:[%s5613_s1 + $0x58] sm:$0xff] }
 0x3a5   :  { %v3117_v1 = vpop.eup %3116  ;;  %3136 = vrcp.f32 %v1158_v4  ;;  %v1798_v8 = vadd.f32 1.0, %v3115_v20  ;;  %v387_v12 = vmul.f32 %v3455_v29, %v4903_v10  ;;  %v6150_v44 = vld [vmem:[#allocation137_spill] sm:$0xff] }
 0x3a6   :  { %v3119_v58 = vpop.eup %3118  ;;  %v1891_v59 = vmul.f32 %v3117_v1, %v6146_v24  ;;  %3138 = vpow2.f32 %v2703_v26  ;;  %v1283_v17 = vadd.f32 %v1251_v45, %v386_v51  ;;  %v6151_v26 = vld [vmem:[#allocation46_spill] sm:$0xff] }
 0x3a7   :  { %v3121_v19 = vpop.eup %3120  ;;  %3140 = vrcp.f32 %v1798_v8  ;;  %v1659_v55 = vpop.xlane.xlu1 %1658  ;;  %2138 = vmatmul.mubr.f32.gmra.mrb[70].mxu0 %v6147_v30  ;;  %v1160_v61 = vadd.f32 1.0, %v3119_v58  ;;  %v6152_v8 = vld [vmem:[#allocation48_spill] sm:$0xff]  ;;  %v3456_v58 = vld [vmem:[%s5613_s1 + $0x60] sm:$0xff] }
 0x3a8   :  { %v3123_v18 = vpop.eup %3122  ;;  %3142 = vpow2.f32 %v2674_v27  ;;  %v5063_v49 = vadd.f32 %v1891_v59, %v1282_v22  ;;  %v2704_v4 = vmul.f32 -1.442695, %v1659_v55  ;;  %2142 = vmatprep.mubr.f32.mxu0 %v6148_v40  ;;  %v1252_v54 = vmul.f32 %v3121_v19, %v6149_v63  ;;  %v6153_v19 = vld [vmem:[#allocation115_spill] sm:$0xff] }
 0x3a9   :  { %v3125_v2 = vpop.eup %3124  ;;  %3144 = vrcp.f32 %v1159_v60  ;;  %v1799_v47 = vadd.f32 1.0, %v3123_v18  ;;  %v388_v22 = vmul.f32 %v3456_v58, %v4896_v16  ;;  %v6160_v58 = vld [vmem:[#allocation56_spill] sm:$0xff] }
 0x3aa   :  { %v3127_v5 = vpop.eup %3126  ;;  %v1892_v20 = vmul.f32 %v3125_v2, %v6150_v44  ;;  %3146 = vpow2.f32 %v2704_v4  ;;  %v1284_v59 = vadd.f32 %v1252_v54, %v387_v12  ;;  %v6155_v4 = vld [vmem:[#allocation50_spill] sm:$0xff]  ;;  %v2677_v2 = vmul.f32 -1.442695, %v4736_v57  ;;  %v6158_v57 = vld [vmem:[#allocation141_spill] sm:$0xff] }
 0x3ab   :  { %v3129_v27 = vpop.eup %3128  ;;  %3148 = vrcp.f32 %v1799_v47  ;;  %2143 = vmatmul.mubr.f32.gmra.mrb[72].mxu0 %v6151_v26  ;;  %v1661_v38 = vpop.xlane.xlu0 %1660  ;;  %v1161_v42 = vadd.f32 1.0, %v3127_v5  ;;  %v3457_v47 = vld [vmem:[%s5613_s1 + $0x68] sm:$0xff] }
 0x3ac   :  { %v3131_v1 = vpop.eup %3130  ;;  %3150 = vpow2.f32 %v2675_v36  ;;  %v5074_v10 = vadd.f32 %v1892_v20, %v1283_v17  ;;  %v2705_v60 = vmul.f32 -1.442695, %v1661_v38  ;;  %2147 = vmatprep.mubr.f32.mxu0 %v6152_v8  ;;  %v1253_v55 = vmul.f32 %v3129_v27, %v6153_v19  ;;  %v6157_v20 = vld [vmem:[#allocation117_spill] sm:$0xff] }
 0x3ad   :  { %v3133_v51 = vpop.eup %3132  ;;  %3152 = vrcp.f32 %v1160_v61  ;;  %v1800_v45 = vadd.f32 1.0, %v3131_v1  ;;  %v6156_v61 = vld [vmem:[#allocation52_spill] sm:$0xff]  ;;  %v389_v5 = vmul.f32 %v3457_v47, %v4913_v0  ;;  %v6159_v1 = vld [vmem:[#allocation54_spill] sm:$0xff]  ;;  %v2678_v8 = vmul.f32 -1.442695, %v4760_v3  ;;  %v6162_v3 = vld [vmem:[#allocation143_spill] sm:$0xff] }
 0x3ae   :  { %v3135_v24 = vpop.eup %3134  ;;  %v1893_v30 = vmul.f32 %v3133_v51, %v6154_v9  ;;  %3154 = vpow2.f32 %v2705_v60  ;;  %v1285_v44 = vadd.f32 %v1253_v55, %v388_v22  ;;  %v6161_v9 = vld [vmem:[#allocation119_spill] sm:$0xff] }
 0x3af   :  { %v3137_v18 = vpop.eup %3136  ;;  %3156 = vrcp.f32 %v1800_v45  ;;  %v1663_v36 = vpop.xlane.xlu1 %1662  ;;  %2148 = vmatmul.mubr.f32.gmra.mrb[74].mxu0 %v6155_v4  ;;  %v1162_v17 = vadd.f32 1.0, %v3135_v24 }
 0x3b0   :  { %v3139_v40 = vpop.eup %3138  ;;  %3158 = vpow2.f32 %v2676_v41  ;;  %v5085_v16 = vadd.f32 %v1893_v30, %v1284_v59  ;;  %v2706_v29 = vmul.f32 -1.442695, %v1663_v36  ;;  %2152 = vmatprep.mubr.f32.mxu0 %v6156_v61  ;;  %v1254_v27 = vmul.f32 %v3137_v18, %v6157_v20 }
 0x3b1   :  { %v3141_v12 = vpop.eup %3140  ;;  %3160 = vrcp.f32 %v1161_v42  ;;  %v1801_v63 = vadd.f32 1.0, %v3139_v40  ;;  %v3458_v42 = vld [vmem:[%s5613_s1 + $0x70] sm:$0xff]  ;;  %v6163_v40 = vld [vmem:[#allocation58_spill] sm:$0xff] }
 0x3b2   :  { %v3143_v54 = vpop.eup %3142  ;;  %v1894_v26 = vmul.f32 %v3141_v12, %v6158_v57  ;;  %3162 = vpow2.f32 %v2706_v29  ;;  %v390_v45 = vmul.f32 %v3458_v42, %v4906_v39  ;;  %v1286_v55 = vadd.f32 %v1254_v27, %v389_v5  ;;  %v6164_v12 = vld [vmem:[#allocation60_spill] sm:$0xff]  ;;  %v3459_v5 = vld [vmem:[%s5613_s1 + $0x78] sm:$0xff]  ;;  %v3460_v42 = vld [vmem:[%s5613_s1 + $0x80] sm:$0xff] }
 0x3b3   :  { %v3145_v38 = vpop.eup %3144  ;;  %3164 = vrcp.f32 %v1801_v63  ;;  %2153 = vmatmul.mubr.f32.gmra.mrb[76].mxu0 %v6159_v1  ;;  %v1665_v41 = vpop.xlane.xlu0 %1664  ;;  %v1163_v24 = vadd.f32 1.0, %v3143_v54  ;;  %v2679_v29 = vmul.f32 -1.442695, %v4770_v33  ;;  %v6165_v27 = vld [vmem:[#allocation121_spill] sm:$0xff]  ;;  %v6166_v33 = vld [vmem:[#allocation146_spill] sm:$0xff] }
 0x3b4   :  { %v3147_v60 = vpop.eup %3146  ;;  %3166 = vpow2.f32 %v2677_v2  ;;  %v5096_v0 = vadd.f32 %v1894_v26, %v1285_v44  ;;  %v2707_v51 = vmul.f32 -1.442695, %v1665_v41  ;;  %2157 = vmatprep.mubr.f32.mxu0 %v6160_v58  ;;  %v1255_v30 = vmul.f32 %v3145_v38, %v6161_v9  ;;  %v6167_v1 = vld [vmem:[#allocation62_spill] sm:$0xff]  ;;  %v6168_v58 = vld [vmem:[#allocation64_spill] sm:$0xff] }
 0x3b5   :  { %v3149_v22 = vpop.eup %3148  ;;  %3168 = vrcp.f32 %v1162_v17  ;;  %v1802_v59 = vadd.f32 1.0, %v3147_v60  ;;  %v391_v17 = vmul.f32 %v3459_v5, %v4919_v25 }
 0x3b6   :  { %v3151_v19 = vpop.eup %3150  ;;  %v1895_v18 = vmul.f32 %v3149_v22, %v6162_v3  ;;  %3170 = vpow2.f32 %v2707_v51  ;;  %v1287_v20 = vadd.f32 %v1255_v30, %v390_v45  ;;  %v392_v45 = vmul.f32 %v3460_v42, %v4917_v32 }
 0x3b7   :  { %v3153_v36 = vpop.eup %3152  ;;  %3172 = vrcp.f32 %v1802_v59  ;;  %v1667_v4 = vpop.xlane.xlu1 %1666  ;;  %2158 = vmatmul.mubr.f32.gmra.mrb[78].mxu0 %v6163_v40  ;;  %v1164_v63 = vadd.f32 1.0, %v3151_v19 }
 0x3b8   :  { %v3155_v2 = vpop.eup %3154  ;;  %3174 = vpow2.f32 %v2678_v8  ;;  %v5107_v39 = vadd.f32 %v1895_v18, %v1286_v55  ;;  %v2708_v61 = vmul.f32 -1.442695, %v1667_v4  ;;  %2162 = vmatprep.mubr.f32.mxu0 %v6164_v12  ;;  %v1256_v57 = vmul.f32 %v3153_v36, %v6165_v27  ;;  %v6169_v55 = vld [vmem:[#allocation92_spill] sm:$0xff]  ;;  %v6171_v4 = vld [vmem:[#allocation66_spill] sm:$0xff] }
 0x3b9   :  { %v3157_v47 = vpop.eup %3156  ;;  %3176 = vrcp.f32 %v1163_v24  ;;  %v1803_v54 = vadd.f32 1.0, %v3155_v2  ;;  %v2680_v8 = vmul.f32 -1.442695, %v4794_v23  ;;  %v6170_v23 = vld [vmem:[#allocation148_spill] sm:$0xff]  ;;  %v2681_v2 = vmul.f32 -1.442695, %v4807_v62 }
 0x3ba   :  { %v3159_v44 = vpop.eup %3158  ;;  %v1896_v26 = vmul.f32 %v3157_v47, %v6166_v33  ;;  %3178 = vpow2.f32 %v2708_v61  ;;  %v1288_v30 = vadd.f32 %v1256_v57, %v391_v17  ;;  %v6172_v61 = vld [vmem:[#allocation68_spill] sm:$0xff]  ;;  %v3461_v47 = vld [vmem:[%s5613_s1 + $0x88] sm:$0xff]  ;;  %v6174_v62 = vld [vmem:[#allocation149_spill] sm:$0xff] }
 0x3bb   :  { %v3161_v38 = vpop.eup %3160  ;;  %3180 = vrcp.f32 %v1803_v54  ;;  %2163 = vmatmul.mubr.f32.gmra.mrb[80].mxu0 %v6167_v1  ;;  %v1669_v41 = vpop.xlane.xlu0 %1668  ;;  %v1165_v24 = vadd.f32 1.0, %v3159_v44  ;;  %v393_v5 = vmul.f32 %v3461_v47, %v4927_v53 }
 0x3bc   :  { %v3163_v60 = vpop.eup %3162  ;;  %3182 = vpow2.f32 %v2679_v29  ;;  %v5118_v25 = vadd.f32 %v1896_v26, %v1287_v20  ;;  %v2709_v51 = vmul.f32 -1.442695, %v1669_v41  ;;  %2167 = vmatprep.mubr.f32.mxu0 %v6168_v58  ;;  %v1257_v9 = vmul.f32 %v3161_v38, %v6169_v55  ;;  %v6173_v20 = vld [vmem:[#allocation94_spill] sm:$0xff]  ;;  %v3462_v58 = vld [vmem:[%s5613_s1 + $0x90] sm:$0xff] }
 0x3bd   :  { %v3165_v22 = vpop.eup %3164  ;;  %3184 = vrcp.f32 %v1164_v63  ;;  %v1804_v59 = vadd.f32 1.0, %v3163_v60  ;;  %v6175_v26 = vld [vmem:[#allocation70_spill] sm:$0xff]  ;;  %v2682_v41 = vmul.f32 -1.442695, %v4835_v56 }
 0x3be   :  { %v3167_v19 = vpop.eup %3166  ;;  %v1897_v3 = vmul.f32 %v3165_v22, %v6170_v23  ;;  %3186 = vpow2.f32 %v2709_v51  ;;  %v1289_v44 = vadd.f32 %v1257_v9, %v392_v45  ;;  %v394_v22 = vmul.f32 %v3462_v58, %v4921_v13  ;;  %v6178_v56 = vld [vmem:[#allocation150_spill] sm:$0xff] }
 0x3bf   :  { %v3169_v18 = vpop.eup %3168  ;;  %3188 = vrcp.f32 %v1804_v59  ;;  %v1671_v36 = vpop.xlane.xlu1 %1670  ;;  %2168 = vmatmul.mubr.f32.gmra.mrb[82].mxu0 %v6171_v4  ;;  %v1166_v17 = vadd.f32 1.0, %v3167_v19  ;;  %v6177_v19 = vld [vmem:[#allocation96_spill] sm:$0xff] }
 0x3c0   :  { %v3171_v40 = vpop.eup %3170  ;;  %3190 = vpow2.f32 %v2680_v8  ;;  %v5129_v32 = vadd.f32 %v1897_v3, %v1288_v30  ;;  %v2710_v29 = vmul.f32 -1.442695, %v1671_v36  ;;  %2172 = vmatprep.mubr.f32.mxu0 %v6172_v61  ;;  %v1258_v27 = vmul.f32 %v3169_v18, %v6173_v20  ;;  %v6176_v8 = vld [vmem:[#allocation72_spill] sm:$0xff]  ;;  %v6179_v3 = vld [vmem:[#allocation74_spill] sm:$0xff] }
 0x3c1   :  { %v3173_v12 = vpop.eup %3172  ;;  %3192 = vrcp.f32 %v1165_v24  ;;  %v1805_v63 = vadd.f32 1.0, %v3171_v40  ;;  %v2683_v36 = vmul.f32 -1.442695, %v4849_v48  ;;  %v6180_v40 = vld [vmem:[#allocation76_spill] sm:$0xff]  ;;  %v6182_v48 = vld [vmem:[#allocation151_spill] sm:$0xff] }
 0x3c2   :  { %v3175_v54 = vpop.eup %3174  ;;  %v1898_v57 = vmul.f32 %v3173_v12, %v6174_v62  ;;  %3194 = vpow2.f32 %v2710_v29  ;;  %v1290_v59 = vadd.f32 %v1258_v27, %v393_v5  ;;  %v3463_v29 = vld [vmem:[%s5613_s1 + $0x98] sm:$0xff]  ;;  %v6183_v27 = vld [vmem:[#allocation78_spill] sm:$0xff] }
 0x3c3   :  { %v3177_v33 = vpop.eup %3176  ;;  %3196 = vrcp.f32 %v1805_v63  ;;  %2173 = vmatmul.mubr.f32.gmra.mrb[84].mxu0 %v6175_v26  ;;  %v1673_v38 = vpop.xlane.xlu0 %1672  ;;  %v1167_v42 = vadd.f32 1.0, %v3175_v54  ;;  %v395_v61 = vmul.f32 %v3463_v29, %v4934_v46  ;;  %v6181_v63 = vld [vmem:[#allocation98_spill] sm:$0xff] }
 0x3c4   :  { %v3179_v1 = vpop.eup %3178  ;;  %3198 = vpow2.f32 %v2681_v2  ;;  %v5140_v53 = vadd.f32 %v1898_v57, %v1289_v44  ;;  %v2711_v60 = vmul.f32 -1.442695, %v1673_v38  ;;  %2177 = vmatprep.mubr.f32.mxu0 %v6176_v8  ;;  %v1259_v55 = vmul.f32 %v3177_v33, %v6177_v19  ;;  %v6184_v38 = vld [vmem:[#allocation80_spill] sm:$0xff] }
 0x3c5   :  { %v3181_v51 = vpop.eup %3180  ;;  %3200 = vrcp.f32 %v1166_v17  ;;  %v1806_v45 = vadd.f32 1.0, %v3179_v1  ;;  %v2684_v33 = vmul.f32 -1.442695, %v4873_v43  ;;  %v6186_v43 = vld [vmem:[#allocation152_spill] sm:$0xff] }
 0x3c6   :  { %v3183_v24 = vpop.eup %3182  ;;  %v1899_v9 = vmul.f32 %v3181_v51, %v6178_v56  ;;  %3202 = vpow2.f32 %v2711_v60  ;;  %v1291_v17 = vadd.f32 %v1259_v55, %v394_v22  ;;  %v6187_v55 = vld [vmem:[#allocation82_spill] sm:$0xff] }
 0x3c7   :  { %v3185_v30 = vpop.eup %3184  ;;  %3204 = vrcp.f32 %v1806_v45  ;;  %v1675_v23 = vpop.xlane.xlu1 %1674  ;;  %2178 = vmatmul.mubr.f32.gmra.mrb[86].mxu0 %v6179_v3  ;;  %v1168_v12 = vadd.f32 1.0, %v3183_v24 }
 0x3c8   :  { %v3187_v18 = vpop.eup %3186  ;;  %3206 = vpow2.f32 %v2682_v41  ;;  %v5151_v13 = vadd.f32 %v1899_v9, %v1290_v59  ;;  %v2712_v4 = vmul.f32 -1.442695, %v1675_v23  ;;  %2182 = vmatprep.mubr.f32.mxu0 %v6180_v40  ;;  %v1260_v54 = vmul.f32 %v3185_v30, %v6181_v63  ;;  %v3464_v41 = vld [vmem:[%s5613_s1 + $0xa0] sm:$0xff]  ;;  %v6188_v23 = vld [vmem:[#allocation84_spill] sm:$0xff] }
 0x3c9   :  { %v3189_v2 = vpop.eup %3188  ;;  %3208 = vrcp.f32 %v1167_v42  ;;  %v1807_v47 = vadd.f32 1.0, %v3187_v18  ;;  %v396_v60 = vmul.f32 %v3464_v41, %v4931_v34  ;;  %v6185_v42 = vld [vmem:[#allocation100_spill] sm:$0xff]  ;;  %v2685_v9 = vmul.f32 -1.442695, %v4878_v50  ;;  %v3465_v18 = vld [vmem:[%s5613_s1 + $0xa8] sm:$0xff]  ;;  %v6190_v50 = vld [vmem:[#allocation153_spill] sm:$0xff] }
 0x3ca   :  { %v3191_v5 = vpop.eup %3190  ;;  %v1900_v44 = vmul.f32 %v3189_v2, %v6182_v48  ;;  %3210 = vpow2.f32 %v2712_v4  ;;  %v1292_v22 = vadd.f32 %v1260_v54, %v395_v61  ;;  %v6189_v61 = vld [vmem:[#allocation102_spill] sm:$0xff]  ;;  %v306_v48 = vadd.f32 1.0, %v4945_v15  ;;  %v6194_v41 = vld [vmem:[#allocation104_spill] sm:$0xff] }
 0x3cb   :  { %v3193_v20 = vpop.eup %3192  ;;  %3212 = vrcp.f32 %v1807_v47  ;;  %2183 = vmatmul.mubr.f32.gmra.mrb[88].mxu0 %v6183_v27  ;;  %v1677_v62 = vpop.xlane.xlu0 %1676  ;;  %v1169_v8 = vadd.f32 1.0, %v3191_v5 }
 0x3cc   :  { %v3195_v57 = vpop.eup %3194  ;;  %3214 = vpow2.f32 %v2683_v36  ;;  %v5162_v46 = vadd.f32 %v1900_v44, %v1291_v17  ;;  %v2713_v26 = vmul.f32 -1.442695, %v1677_v62  ;;  %2187 = vmatprep.mubr.f32.mxu0 %v6184_v38  ;;  %v1261_v45 = vmul.f32 %v3193_v20, %v6185_v42  ;;  %v6191_v17 = vld [vmem:[#allocation86_spill] sm:$0xff]  ;;  %v6193_v20 = vld [vmem:[#allocation88_spill] sm:$0xff] }
 0x3cd   :  { %v3197_v1 = vpop.eup %3196  ;;  %3216 = vrcp.f32 %v1168_v12  ;;  %v1808_v51 = vadd.f32 1.0, %v3195_v57  ;;  %v397_v36 = vmul.f32 %v3465_v18, %v4942_v14  ;;  %v3466_v62 = vld [vmem:[%s5613_s1 + $0xb0] sm:$0xff] }
 0x3ce   :  { %v3199_v58 = vpop.eup %3198  ;;  %v1901_v24 = vmul.f32 %v3197_v1, %v6186_v43  ;;  %3218 = vpow2.f32 %v2713_v26  ;;  %v1293_v29 = vadd.f32 %v1261_v45, %v396_v60  ;;  %v398_v57 = vmul.f32 %v3466_v62, %v4940_v7  ;;  %v6195_v60 = vld [vmem:[#allocation154_spill] sm:$0xff] }
 0x3cf   :  { %v3201_v59 = vpop.eup %3200  ;;  %3220 = vrcp.f32 %v1808_v51  ;;  %v1679_v19 = vpop.xlane.xlu1 %1678  ;;  %2188 = vmatmul.mubr.f32.gmra.mrb[90].mxu0 %v6187_v55  ;;  %v1170_v4 = vadd.f32 1.0, %v3199_v58  ;;  %v307_v45 = vadd.f32 1.0, %v4958_v21 }
 0x3d0   :  { %v3203_v56 = vpop.eup %3202  ;;  %3222 = vpow2.f32 %v2684_v33  ;;  %v5173_v34 = vadd.f32 %v1901_v24, %v1292_v22  ;;  %v2714_v30 = vmul.f32 -1.442695, %v1679_v19  ;;  %2192 = vmatprep.mubr.f32.mxu0 %v6188_v23  ;;  %v1262_v12 = vmul.f32 %v3201_v59, %v6189_v61  ;;  %v6196_v22 = vld [vmem:[#allocation90_spill] sm:$0xff]  ;;  %v3467_v59 = vld [vmem:[%s5613_s1 + $0xb8] sm:$0xff]  ;;  %v6198_v19 = vld [vmem:[#allocation47_spill] sm:$0xff] }
 0x3d1   :  { %v3205_v3 = vpop.eup %3204  ;;  %3224 = vrcp.f32 %v1169_v8  ;;  %v1809_v40 = vadd.f32 1.0, %v3203_v56  ;;  %v399_v55 = vmul.f32 %v3467_v59, %v6198_v19  ;;  %v6210_v19 = vld [vmem:[#allocation157_spill] sm:$0xff] }
 0x3d2   :  { %v3207_v2 = vpop.eup %3206  ;;  %v1902_v47 = vmul.f32 %v3205_v3, %v6190_v50  ;;  %3226 = vpow2.f32 %v2714_v30  ;;  %v1294_v1 = vadd.f32 %v1262_v12, %v397_v36  ;;  %v6199_v3 = vld [vmem:[#allocation106_spill] sm:$0xff]  ;;  %v6200_v36 = vld [vmem:[#allocation155_spill] sm:$0xff] }
 0x3d3   :  { %v3209_v5 = vpop.eup %3208  ;;  %3228 = vrcp.f32 %v1809_v40  ;;  %2193 = vmatmul.mubr.f32.gmra.mrb[92].mxu0 %v6191_v17  ;;  %v1681_v63 = vpop.xlane.xlu0 %1680  ;;  %v1171_v33 = vadd.f32 1.0, %v3207_v2  ;;  %v6203_v17 = vld [vmem:[#allocation45_spill] sm:$0xff] }
 0x3d4   :  { %v3211_v54 = vpop.eup %3210  ;;  %3230 = vpow2.f32 %v2685_v9  ;;  %v5184_v14 = vadd.f32 %v1902_v47, %v1293_v29  ;;  %v2715_v44 = vmul.f32 -1.442695, %v1681_v63  ;;  %2197 = vmatprep.mubr.f32.mxu0 %v6193_v20  ;;  %v1263_v15 = vmul.f32 %v3209_v5, %v6194_v41  ;;  %v6201_v29 = vld [vmem:[#allocation139_spill] sm:$0xff]  ;;  %v3468_v5 = vld [vmem:[%s5613_s1 + $0xc0] sm:$0xff] }
 0x3d5   :  { %v3213_v27 = vpop.eup %3212  ;;  %3232 = vrcp.f32 %v1170_v4  ;;  %v1810_v26 = vadd.f32 1.0, %v3211_v54  ;;  %v308_v61 = vadd.f32 1.0, %v6201_v29  ;;  %v400_v63 = vmul.f32 %v3468_v5, %v6203_v17  ;;  %v6213_v29 = vld [vmem:[#allocation158_spill] sm:$0xff] }
 0x3d6   :  { %6192 = vst [vmem:[#allocation138_spill] sm:$0xff] %v5184_v14  ;;  %v3215_v38 = vpop.eup %3214  ;;  %v1903_v8 = vmul.f32 %v3213_v27, %v6195_v60  ;;  %3234 = vpow2.f32 %v2715_v44  ;;  %v1295_v23 = vadd.f32 %v1263_v15, %v398_v57  ;;  %v6204_v27 = vld [vmem:[#allocation108_spill] sm:$0xff] }
 0x3d7   :  { %v3217_v51 = vpop.eup %3216  ;;  %3236 = vrcp.f32 %v1810_v26  ;;  %v1683_v58 = vpop.xlane.xlu1 %1682  ;;  %2198 = vmatmul.mubr.f32.gmra.mrb[94].mxu0 %v6196_v22  ;;  %v1172_v56 = vadd.f32 1.0, %v3215_v38  ;;  %v6205_v57 = vld [vmem:[#allocation156_spill] sm:$0xff]  ;;  %v3469_v22 = vld [vmem:[%s5613_s1 + $0xc8] sm:$0xff] }
 0x3d8   :  { %v3219_v42 = vpop.eup %3218  ;;  %3238 = vrcp.f32 %v306_v48  ;;  %v5195_v7 = vadd.f32 %v1903_v8, %v1294_v1  ;;  %v2716_v43 = vmul.f32 -1.442695, %v1683_v58  ;;  %v1264_v18 = vmul.f32 %v3217_v51, %v6199_v3  ;;  %v6206_v1 = vld [vmem:[#allocation49_spill] sm:$0xff] }
 0x3d9   :  { %v3221_v24 = vpop.eup %3220  ;;  %3240 = vrcp.f32 %v1171_v33  ;;  %v1811_v9 = vadd.f32 1.0, %v3219_v42  ;;  %v309_v41 = vadd.f32 1.0, %v6206_v1  ;;  %v6208_v42 = vld [vmem:[#allocation51_spill] sm:$0xff] }
 0x3da   :  { %6197 = vst [vmem:[#allocation53_spill] sm:$0xff] %v5195_v7  ;;  %v3223_v30 = vpop.eup %3222  ;;  %v1904_v4 = vmul.f32 %v3221_v24, %v6200_v36  ;;  %3242 = vpow2.f32 %v2716_v43  ;;  %v1296_v20 = vadd.f32 %v1264_v18, %v399_v55  ;;  %v6209_v24 = vld [vmem:[#allocation110_spill] sm:$0xff]  ;;  %v3470_v36 = vld [vmem:[%s5613_s1 + $0xd0] sm:$0xff] }
 0x3db   :  { %v3225_v21 = vpop.eup %3224  ;;  %3244 = vrcp.f32 %v1811_v9  ;;  %v1685_v40 = vpop.xlane.xlu0 %1684  ;;  %v1173_v54 = vadd.f32 1.0, %v3223_v30 }
 0x3dc   :  { %v3227_v2 = vpop.eup %3226  ;;  %3246 = vrcp.f32 %v307_v45  ;;  %v5204_v12 = vadd.f32 %v1904_v4, %v1295_v23  ;;  %v2717_v50 = vmul.f32 -1.442695, %v1685_v40  ;;  %v1265_v62 = vmul.f32 %v3225_v21, %v6204_v27  ;;  %v6212_v40 = vld [vmem:[#allocation112_spill] sm:$0xff]  ;;  %v6215_v27 = vld [vmem:[#allocation114_spill] sm:$0xff] }
 0x3dd   :  { %v3229_v47 = vpop.eup %3228  ;;  %3248 = vrcp.f32 %v1172_v56  ;;  %v1812_v48 = vadd.f32 1.0, %v3227_v2  ;;  %v401_v45 = vmul.f32 %v3469_v22, %v6208_v42  ;;  %v6219_v42 = vld [vmem:[#allocation160_spill] sm:$0xff] }
 0x3de   :  { %6202 = vst [vmem:[#allocation55_spill] sm:$0xff] %v5204_v12  ;;  %v3231_v44 = vpop.eup %3230  ;;  %v1905_v33 = vmul.f32 %v3229_v47, %v6205_v57  ;;  %3250 = vpow2.f32 %v2717_v50  ;;  %v1297_v43 = vadd.f32 %v1265_v62, %v400_v63  ;;  %v6216_v57 = vld [vmem:[#allocation159_spill] sm:$0xff] }
 0x3df   :  { %v3233_v26 = vpop.eup %3232  ;;  %3252 = vrcp.f32 %v1812_v48  ;;  %v1174_v8 = vadd.f32 1.0, %v3231_v44  ;;  %v3471_v48 = vld [vmem:[%s5613_s1 + $0xd8] sm:$0xff] }
 0x3e0   :  { %v3235_v38 = vpop.eup %3234  ;;  %3254 = vrcp.f32 %v308_v61  ;;  %v5213_v15 = vadd.f32 %v1905_v33, %v1296_v20  ;;  %v1266_v59 = vmul.f32 %v3233_v26, %v6209_v24 }
 0x3e1   :  { %v3237_v60 = vpop.eup %3236  ;;  %3256 = vrcp.f32 %v1173_v54  ;;  %v1813_v51 = vadd.f32 1.0, %v3235_v38 }
 0x3e2   :  { %6207 = vst [vmem:[#allocation57_spill] sm:$0xff] %v5213_v15  ;;  %v3239_v58 = vpop.eup %3238  ;;  %v1906_v55 = vmul.f32 %v3237_v60, %v6210_v19  ;;  %v1298_v21 = vadd.f32 %v1266_v59, %v401_v45  ;;  %v3472_v60 = vld [vmem:[%s5613_s1 + $0xe0] sm:$0xff]  ;;  %v3473_v19 = vld [vmem:[%s5613_s1 + $0xe8] sm:$0xff] }
 0x3e3   :  { %v3241_v56 = vpop.eup %3240  ;;  %3258 = vrcp.f32 %v1813_v51  ;;  %v402_v4 = vmul.f32 %v3470_v36, %v3239_v58  ;;  %v6218_v58 = vld [vmem:[#allocation116_spill] sm:$0xff] }
 0x3e4   :  { %v3243_v9 = vpop.eup %3242  ;;  %3260 = vrcp.f32 %v309_v41  ;;  %v5221_v30 = vadd.f32 %v1906_v55, %v1297_v43  ;;  %v1267_v2 = vmul.f32 %v3241_v56, %v6212_v40  ;;  %v6224_v40 = vld [vmem:[#allocation162_spill] sm:$0xff] }
 0x3e5   :  { %v3245_v23 = vpop.eup %3244  ;;  %3262 = vrcp.f32 %v1174_v8  ;;  %v1814_v3 = vadd.f32 1.0, %v3243_v9  ;;  %v6221_v9 = vld [vmem:[#allocation118_spill] sm:$0xff] }
 0x3e6   :  { %6211 = vst [vmem:[#allocation59_spill] sm:$0xff] %v5221_v30  ;;  %v3247_v18 = vpop.eup %3246  ;;  %v1907_v61 = vmul.f32 %v3245_v23, %v6213_v29  ;;  %v1299_v20 = vadd.f32 %v1267_v2, %v402_v4 }
 0x3e7   :  { %v3249_v50 = vpop.eup %3248  ;;  %3264 = vrcp.f32 %v1814_v3  ;;  %v403_v44 = vmul.f32 %v3471_v48, %v3247_v18  ;;  %v6222_v3 = vld [vmem:[#allocation161_spill] sm:$0xff] }
 0x3e8   :  { %v3251_v47 = vpop.eup %3250  ;;  %v5228_v5 = vadd.f32 %v1907_v61, %v1298_v21  ;;  %v1268_v62 = vmul.f32 %v3249_v50, %v6215_v27  ;;  %v6226_v50 = vld [vmem:[#allocation4_spill] sm:$0xff] }
 0x3e9   :  { %v3253_v17 = vpop.eup %3252  ;;  %v1815_v63 = vadd.f32 1.0, %v3251_v47 }
 0x3ea   :  { %6214 = vst [vmem:[#allocation61_spill] sm:$0xff] %v5228_v5  ;;  %v3255_v54 = vpop.eup %3254  ;;  %v1908_v33 = vmul.f32 %v3253_v17, %v6216_v57  ;;  %v1300_v51 = vadd.f32 %v1268_v62, %v403_v44  ;;  %v6227_v44 = vld [vmem:[#allocation6_spill] sm:$0xff] }
 0x3eb   :  { %v3257_v26 = vpop.eup %3256  ;;  %3266 = vrcp.f32 %v1815_v63  ;;  %v404_v8 = vmul.f32 %v3472_v60, %v3255_v54  ;;  %v5260_v63 = vld [vmem:[%s5614_s3] ss:$0 sm:$0xff] }
 0x3ec   :  { %v5235_v38 = vadd.f32 %v1908_v33, %v1299_v20  ;;  %v1269_v22 = vmul.f32 %v3257_v26, %v6218_v58  ;;  %v6228_v33 = vld [vmem:[#allocation3_spill] sm:$0xff] }
 0x3ed   :  { %v3259_v1 = vpop.eup %3258 }
 0x3ee   :  { %6217 = vst [vmem:[#allocation63_spill] sm:$0xff] %v5235_v38  ;;  %v3261_v41 = vpop.eup %3260  ;;  %v1909_v45 = vmul.f32 %v3259_v1, %v6219_v42  ;;  %v1301_v56 = vadd.f32 %v1269_v22, %v404_v8  ;;  %v6229_v8 = vld [vmem:[#allocation5_spill] sm:$0xff] }
 0x3ef   :  { %v3263_v43 = vpop.eup %3262  ;;  %v405_v55 = vmul.f32 %v3473_v19, %v3261_v41 }
 0x3f0   :  { %v5242_v24 = vadd.f32 %v1909_v45, %v1300_v51  ;;  %v1270_v23 = vmul.f32 %v3263_v43, %v6221_v9  ;;  %v6230_v45 = vld [vmem:[#allocation8_spill] sm:$0xff] }
 0x3f1   :  { %v3265_v59 = vpop.eup %3264 }
 0x3f2   :  { %6220 = vst [vmem:[#allocation65_spill] sm:$0xff] %v5242_v24  ;;  %v1910_v18 = vmul.f32 %v3265_v59, %v6222_v3  ;;  %v1302_v21 = vadd.f32 %v1270_v23, %v405_v55 }
 0x3f4   :  { %v5249_v36 = vadd.f32 %v1910_v18, %v1301_v56  ;;  %v6231_v56 = vld [vmem:[#allocation7_spill] sm:$0xff] }
 0x3f5   :  { %v3267_v4 = vpop.eup %3266 }
 0x3f6   :  { %6223 = vst [vmem:[#allocation67_spill] sm:$0xff] %v5249_v36  ;;  %v1911_v2 = vmul.f32 %v3267_v4, %v6224_v40  ;;  %v6232_v4 = vld [vmem:[#allocation10_spill] sm:$0xff] }
 0x3f8   :  { %v5252_v29 = vadd.f32 %v1911_v2, %v1302_v21 }
 0x3fa   :  { %6225 = vst [vmem:[#allocation69_spill] sm:$0xff] %v5252_v29 }
 0x42e   :  { %v2044_v61 = vpop.f32.mrb[32].mxu0 }
 0x42f   :  { %v5255_v47 = vmul.f32 %v2044_v61, %v6226_v50  ;;  %v2046_v17 = vpop.f32.mrb[33].mxu0  ;;  %v6233_v50 = vld [vmem:[#allocation9_spill] sm:$0xff] }
 0x431   :  { %v2235_v54 = vmul.f32 %v5260_v63, %v5255_v47 }
 0x432   :  { %v2049_v48 = vpop.f32.mrb[34].mxu0 }
 0x433   :  { %v5265_v20 = vmul.f32 %v2049_v48, %v6227_v44  ;;  %2267 = vadd.xlane.f32.xlu1 %v2235_v54  ;;  %v2051_v27 = vpop.f32.mrb[35].mxu0 }
 0x434   :  { %v6234_v27 = vld [vmem:[#allocation12_spill] sm:$0xff] }
 0x435   :  { %v2236_v62 = vmul.f32 %v5260_v63, %v5265_v20 }
 0x436   :  { %v2054_v57 = vpop.f32.mrb[36].mxu0 }
 0x437   :  { %v5270_v26 = vmul.f32 %v2054_v57, %v6228_v33  ;;  %2269 = vadd.xlane.f32.xlu0 %v2236_v62  ;;  %v2056_v1 = vpop.f32.mrb[37].mxu0 }
 0x439   :  { %v2237_v41 = vmul.f32 %v5260_v63, %v5270_v26 }
 0x43a   :  { %v2059_v60 = vpop.f32.mrb[38].mxu0 }
 0x43b   :  { %v5275_v51 = vmul.f32 %v2059_v60, %v6229_v8  ;;  %2271 = vadd.xlane.f32.xlu1 %v2237_v41  ;;  %v2061_v58 = vpop.f32.mrb[39].mxu0  ;;  %v6235_v41 = vld [vmem:[#allocation11_spill] sm:$0xff] }
 0x43d   :  { %v2238_v22 = vmul.f32 %v5260_v63, %v5275_v51 }
 0x43e   :  { %v2064_v42 = vpop.f32.mrb[40].mxu0 }
 0x43f   :  { %v5280_v43 = vmul.f32 %v2064_v42, %v6230_v45  ;;  %2273 = vadd.xlane.f32.xlu0 %v2238_v22  ;;  %v2066_v59 = vpop.f32.mrb[41].mxu0  ;;  %v6236_v42 = vld [vmem:[#allocation14_spill] sm:$0xff] }
 0x441   :  { %v2239_v19 = vmul.f32 %v5260_v63, %v5280_v43 }
 0x442   :  { %v2069_v55 = vpop.f32.mrb[42].mxu0 }
 0x443   :  { %v5285_v9 = vmul.f32 %v2069_v55, %v6231_v56  ;;  %2275 = vadd.xlane.f32.xlu1 %v2239_v19  ;;  %v2071_v23 = vpop.f32.mrb[43].mxu0  ;;  %v6237_v56 = vld [vmem:[#allocation13_spill] sm:$0xff] }
 0x445   :  { %v2240_v3 = vmul.f32 %v5260_v63, %v5285_v9 }
 0x446   :  { %v2074_v18 = vpop.f32.mrb[44].mxu0 }
 0x447   :  { %v5290_v21 = vmul.f32 %v2074_v18, %v6232_v4  ;;  %2277 = vadd.xlane.f32.xlu0 %v2240_v3  ;;  %v2076_v40 = vpop.f32.mrb[45].mxu0 }
 0x448   :  { %v6238_v40 = vld [vmem:[#allocation16_spill] sm:$0xff] }
 0x449   :  { %v2241_v2 = vmul.f32 %v5260_v63, %v5290_v21 }
 0x44a   :  { %v2079_v61 = vpop.f32.mrb[46].mxu0 }
 0x44b   :  { %v5295_v17 = vmul.f32 %v2079_v61, %v6233_v50  ;;  %2279 = vadd.xlane.f32.xlu1 %v2241_v2  ;;  %v2081_v54 = vpop.f32.mrb[47].mxu0 }
 0x44d   :  { %v2242_v48 = vmul.f32 %v5260_v63, %v5295_v17 }
 0x44e   :  { %v2084_v44 = vpop.f32.mrb[48].mxu0 }
 0x44f   :  { %v5300_v62 = vmul.f32 %v2084_v44, %v6234_v27  ;;  %2281 = vadd.xlane.f32.xlu0 %v2242_v48  ;;  %v2086_v57 = vpop.f32.mrb[49].mxu0  ;;  %v6239_v48 = vld [vmem:[#allocation15_spill] sm:$0xff] }
 0x451   :  { %v2243_v33 = vmul.f32 %v5260_v63, %v5300_v62 }
 0x452   :  { %v2089_v1 = vpop.f32.mrb[50].mxu0 }
 0x453   :  { %v5305_v60 = vmul.f32 %v2089_v1, %v6235_v41  ;;  %2283 = vadd.xlane.f32.xlu1 %v2243_v33  ;;  %v2091_v8 = vpop.f32.mrb[51].mxu0  ;;  %v6240_v1 = vld [vmem:[#allocation18_spill] sm:$0xff] }
 0x455   :  { %v2244_v58 = vmul.f32 %v5260_v63, %v5305_v60 }
 0x456   :  { %v2094_v22 = vpop.f32.mrb[52].mxu0 }
 0x457   :  { %v5310_v45 = vmul.f32 %v2094_v22, %v6236_v42  ;;  %2285 = vadd.xlane.f32.xlu0 %v2244_v58  ;;  %v2096_v59 = vpop.f32.mrb[53].mxu0  ;;  %v6241_v42 = vld [vmem:[#allocation17_spill] sm:$0xff] }
 0x459   :  { %v2245_v19 = vmul.f32 %v5260_v63, %v5310_v45 }
 0x45a   :  { %v2099_v55 = vpop.f32.mrb[54].mxu0 }
 0x45b   :  { %v5315_v23 = vmul.f32 %v2099_v55, %v6237_v56  ;;  %2287 = vadd.xlane.f32.xlu1 %v2245_v19  ;;  %v2101_v3 = vpop.f32.mrb[55].mxu0 }
 0x45c   :  { %v6242_v3 = vld [vmem:[#allocation20_spill] sm:$0xff] }
 0x45d   :  { %v2246_v18 = vmul.f32 %v5260_v63, %v5315_v23 }
 0x45e   :  { %v2104_v4 = vpop.f32.mrb[56].mxu0 }
 0x45f   :  { %v5320_v2 = vmul.f32 %v2104_v4, %v6238_v40  ;;  %2289 = vadd.xlane.f32.xlu0 %v2246_v18  ;;  %v2106_v61 = vpop.f32.mrb[57].mxu0 }
 0x461   :  { %v2247_v50 = vmul.f32 %v5260_v63, %v5320_v2 }
 0x462   :  { %v2109_v54 = vpop.f32.mrb[58].mxu0 }
 0x463   :  { %v5325_v44 = vmul.f32 %v2109_v54, %v6239_v48  ;;  %2291 = vadd.xlane.f32.xlu1 %v2247_v50  ;;  %v2111_v27 = vpop.f32.mrb[59].mxu0  ;;  %v6243_v50 = vld [vmem:[#allocation19_spill] sm:$0xff] }
 0x465   :  { %v2248_v57 = vmul.f32 %v5260_v63, %v5325_v44 }
 0x466   :  { %v2114_v33 = vpop.f32.mrb[60].mxu0 }
 0x467   :  { %v5330_v41 = vmul.f32 %v2114_v33, %v6240_v1  ;;  %2293 = vadd.xlane.f32.xlu0 %v2248_v57  ;;  %v2116_v8 = vpop.f32.mrb[61].mxu0  ;;  %v6244_v33 = vld [vmem:[#allocation22_spill] sm:$0xff] }
 0x469   :  { %v2249_v58 = vmul.f32 %v5260_v63, %v5330_v41 }
 0x46a   :  { %v2119_v22 = vpop.f32.mrb[62].mxu0 }
 0x46b   :  { %v5335_v59 = vmul.f32 %v2119_v22, %v6241_v42  ;;  %2295 = vadd.xlane.f32.xlu1 %v2249_v58  ;;  %v2121_v19 = vpop.f32.mrb[63].mxu0  ;;  %v6245_v42 = vld [vmem:[#allocation21_spill] sm:$0xff] }
 0x46d   :  { %v2250_v55 = vmul.f32 %v5260_v63, %v5335_v59 }
 0x46e   :  { %v2124_v56 = vpop.f32.mrb[64].mxu0 }
 0x46f   :  { %v5340_v18 = vmul.f32 %v2124_v56, %v6242_v3  ;;  %2297 = vadd.xlane.f32.xlu0 %v2250_v55  ;;  %v2126_v4 = vpop.f32.mrb[65].mxu0 }
 0x470   :  { %v6246_v4 = vld [vmem:[#allocation24_spill] sm:$0xff] }
 0x471   :  { %v2251_v40 = vmul.f32 %v5260_v63, %v5340_v18 }
 0x472   :  { %v2129_v61 = vpop.f32.mrb[66].mxu0 }
 0x473   :  { %v5345_v54 = vmul.f32 %v2129_v61, %v6243_v50  ;;  %2299 = vadd.xlane.f32.xlu1 %v2251_v40  ;;  %v2131_v48 = vpop.f32.mrb[67].mxu0 }
 0x475   :  { %v2252_v27 = vmul.f32 %v5260_v63, %v5345_v54 }
 0x476   :  { %v2134_v57 = vpop.f32.mrb[68].mxu0 }
 0x477   :  { %v5350_v1 = vmul.f32 %v2134_v57, %v6244_v33  ;;  %2301 = vadd.xlane.f32.xlu0 %v2252_v27  ;;  %v2136_v8 = vpop.f32.mrb[69].mxu0  ;;  %v6248_v27 = vld [vmem:[#allocation23_spill] sm:$0xff] }
 0x479   :  { %v2253_v58 = vmul.f32 %v5260_v63, %v5350_v1 }
 0x47a   :  { %v2139_v22 = vpop.f32.mrb[70].mxu0 }
 0x47b   :  { %v5355_v19 = vmul.f32 %v2139_v22, %v6245_v42  ;;  %2303 = vadd.xlane.f32.xlu1 %v2253_v58  ;;  %v2141_v55 = vpop.f32.mrb[71].mxu0  ;;  %v6250_v22 = vld [vmem:[#allocation26_spill] sm:$0xff] }
 0x47d   :  { %v2254_v56 = vmul.f32 %v5260_v63, %v5355_v19 }
 0x47e   :  { %v2144_v3 = vpop.f32.mrb[72].mxu0 }
 0x47f   :  { %v5360_v40 = vmul.f32 %v2144_v3, %v6246_v4  ;;  %2305 = vadd.xlane.f32.xlu0 %v2254_v56  ;;  %v2146_v61 = vpop.f32.mrb[73].mxu0  ;;  %v6252_v4 = vld [vmem:[#allocation25_spill] sm:$0xff] }
 0x481   :  { %6247 = vst [vmem:[#allocation71_spill] sm:$0xff] %v5360_v40  ;;  %v2255_v50 = vmul.f32 %v5260_v63, %v5360_v40 }
 0x482   :  { %v2149_v48 = vpop.f32.mrb[74].mxu0 }
 0x483   :  { %v5365_v57 = vmul.f32 %v2149_v48, %v6248_v27  ;;  %2307 = vadd.xlane.f32.xlu1 %v2255_v50  ;;  %v2151_v33 = vpop.f32.mrb[75].mxu0 }
 0x484   :  { %v6254_v33 = vld [vmem:[#allocation28_spill] sm:$0xff] }
 0x485   :  { %6249 = vst [vmem:[#allocation95_spill] sm:$0xff] %v5365_v57  ;;  %v2256_v8 = vmul.f32 %v5260_v63, %v5365_v57 }
 0x486   :  { %v2154_v58 = vpop.f32.mrb[76].mxu0 }
 0x487   :  { %v5370_v42 = vmul.f32 %v2154_v58, %v6250_v22  ;;  %2309 = vadd.xlane.f32.xlu0 %v2256_v8  ;;  %v2156_v55 = vpop.f32.mrb[77].mxu0 }
 0x488   :  { %v6256_v55 = vld [vmem:[#allocation27_spill] sm:$0xff] }
 0x489   :  { %6251 = vst [vmem:[#allocation73_spill] sm:$0xff] %v5370_v42  ;;  %v2257_v56 = vmul.f32 %v5260_v63, %v5370_v42 }
 0x48a   :  { %v2159_v3 = vpop.f32.mrb[78].mxu0 }
 0x48b   :  { %v5375_v61 = vmul.f32 %v2159_v3, %v6252_v4  ;;  %2311 = vadd.xlane.f32.xlu1 %v2257_v56  ;;  %v2161_v48 = vpop.f32.mrb[79].mxu0 }
 0x48c   :  { %v6258_v48 = vld [vmem:[#allocation30_spill] sm:$0xff] }
 0x48d   :  { %6253 = vst [vmem:[#allocation75_spill] sm:$0xff] %v5375_v61  ;;  %v2258_v50 = vmul.f32 %v5260_v63, %v5375_v61 }
 0x48e   :  { %v2164_v27 = vpop.f32.mrb[80].mxu0 }
 0x48f   :  { %v5380_v29 = vmul.f32 %v2164_v27, %v6254_v33  ;;  %2313 = vadd.xlane.f32.xlu0 %v2258_v50  ;;  %v2166_v58 = vpop.f32.mrb[81].mxu0 }
 0x490   :  { %v6260_v58 = vld [vmem:[#allocation29_spill] sm:$0xff] }
 0x491   :  { %6255 = vst [vmem:[#allocation97_spill] sm:$0xff] %v5380_v29  ;;  %v2259_v8 = vmul.f32 %v5260_v63, %v5380_v29 }
 0x492   :  { %v2169_v22 = vpop.f32.mrb[82].mxu0 }
 0x493   :  { %v5385_v36 = vmul.f32 %v2169_v22, %v6256_v55  ;;  %2315 = vadd.xlane.f32.xlu1 %v2259_v8  ;;  %v2171_v3 = vpop.f32.mrb[83].mxu0 }
 0x494   :  { %v6262_v3 = vld [vmem:[#allocation32_spill] sm:$0xff] }
 0x495   :  { %6257 = vst [vmem:[#allocation127_spill] sm:$0xff] %v5385_v36  ;;  %v2260_v56 = vmul.f32 %v5260_v63, %v5385_v36 }
 0x496   :  { %v2174_v4 = vpop.f32.mrb[84].mxu0 }
 0x497   :  { %v5390_v24 = vmul.f32 %v2174_v4, %v6258_v48  ;;  %2317 = vadd.xlane.f32.xlu0 %v2260_v56  ;;  %v2176_v27 = vpop.f32.mrb[85].mxu0 }
 0x498   :  { %v6264_v27 = vld [vmem:[#allocation31_spill] sm:$0xff] }
 0x499   :  { %6259 = vst [vmem:[#allocation77_spill] sm:$0xff] %v5390_v24  ;;  %v2261_v50 = vmul.f32 %v5260_v63, %v5390_v24 }
 0x49a   :  { %v2179_v33 = vpop.f32.mrb[86].mxu0 }
 0x49b   :  { %v5395_v38 = vmul.f32 %v2179_v33, %v6260_v58  ;;  %2319 = vadd.xlane.f32.xlu1 %v2261_v50  ;;  %v2181_v22 = vpop.f32.mrb[87].mxu0 }
 0x49c   :  { %v6266_v22 = vld [vmem:[#allocation34_spill] sm:$0xff] }
 0x49d   :  { %6261 = vst [vmem:[#allocation79_spill] sm:$0xff] %v5395_v38  ;;  %v2262_v8 = vmul.f32 %v5260_v63, %v5395_v38 }
 0x49e   :  { %v2184_v55 = vpop.f32.mrb[88].mxu0 }
 0x49f   :  { %v5400_v5 = vmul.f32 %v2184_v55, %v6262_v3  ;;  %2321 = vadd.xlane.f32.xlu0 %v2262_v8  ;;  %v2186_v4 = vpop.f32.mrb[89].mxu0 }
 0x4a0   :  { %v6268_v4 = vld [vmem:[#allocation33_spill] sm:$0xff] }
 0x4a1   :  { %6263 = vst [vmem:[#allocation99_spill] sm:$0xff] %v5400_v5  ;;  %v2263_v56 = vmul.f32 %v5260_v63, %v5400_v5 }
 0x4a2   :  { %v2189_v48 = vpop.f32.mrb[90].mxu0 }
 0x4a3   :  { %v5405_v24 = vmul.f32 %v2189_v48, %v6264_v27  ;;  %2323 = vadd.xlane.f32.xlu1 %v2263_v56  ;;  %v2191_v33 = vpop.f32.mrb[91].mxu0  ;;  %v6270_v27 = vld [vmem:[#allocation123_spill] sm:$0xff] }
 0x4a4   :  { %v2624_v33 = vmul.f32 -1.442695, %v6270_v27 }
 0x4a5   :  { %6265 = vst [vmem:[#allocation128_spill] sm:$0xff] %v5405_v24  ;;  %v2264_v50 = vmul.f32 %v5260_v63, %v5405_v24  ;;  %v6271_v24 = vld [vmem:[#allocation145_spill] sm:$0xff] }
 0x4a6   :  { %v2194_v58 = vpop.f32.mrb[92].mxu0  ;;  %3268 = vpow2.f32 %v2624_v33 }
 0x4a7   :  { %v5410_v38 = vmul.f32 %v2194_v58, %v6266_v22  ;;  %2325 = vadd.xlane.f32.xlu0 %v2264_v50  ;;  %v2196_v55 = vpop.f32.mrb[93].mxu0  ;;  %v2656_v58 = vmul.f32 -1.442695, %v6271_v24  ;;  %v6272_v22 = vld [vmem:[#allocation124_spill] sm:$0xff] }
 0x4a8   :  { %v2625_v50 = vmul.f32 -1.442695, %v6272_v22  ;;  %v6273_v55 = vld [vmem:[#allocation43_spill] sm:$0xff] }
 0x4a9   :  { %6267 = vst [vmem:[#allocation81_spill] sm:$0xff] %v5410_v38  ;;  %v2265_v8 = vmul.f32 %v5260_v63, %v5410_v38  ;;  %v2688_v36 = vmul.f32 -1.442695, %v6273_v55  ;;  %3270 = vpow2.f32 %v2656_v58  ;;  %v6274_v38 = vld [vmem:[#allocation147_spill] sm:$0xff] }
 0x4aa   :  { %v2199_v3 = vpop.f32.mrb[94].mxu0  ;;  %v2657_v30 = vmul.f32 -1.442695, %v6274_v38  ;;  %3272 = vpow2.f32 %v2625_v50 }
 0x4ab   :  { %v5415_v5 = vmul.f32 %v2199_v3, %v6268_v4  ;;  %2327 = vadd.xlane.f32.xlu1 %v2265_v8  ;;  %v2201_v48 = vpop.f32.mrb[95].mxu0  ;;  %3274 = vpow2.f32 %v2688_v36  ;;  %v6275_v8 = vld [vmem:[#allocation136_spill] sm:$0xff]  ;;  %v5425_v4 = vpop.xlane.xlu1 %1686 }
 0x4ac   :  { %v2689_v3 = vmul.f32 -1.442695, %v6275_v8  ;;  %3276 = vpow2.f32 %v2657_v30  ;;  %6276 = vst [vmem:[#allocation101_spill] sm:$0xff] %v5425_v4  ;;  %v5427_v48 = vpop.xlane.xlu0 %1688 }
 0x4ad   :  { %6269 = vst [vmem:[#allocation83_spill] sm:$0xff] %v5415_v5  ;;  %v2266_v56 = vmul.f32 %v5260_v63, %v5415_v5  ;;  %6277 = vst [vmem:[#allocation129_spill] sm:$0xff] %v5427_v48  ;;  %v6280_v48 = vld [vmem:[#allocation93_spill] sm:$0xff] }
 0x4ae   :  { %3278 = vpow2.f32 %v2689_v3 }
 0x4af   :  { %2329 = vadd.xlane.f32.xlu0 %v2266_v56 }
 0x4b0   :  { %v3269_v63 = vpop.eup %3268 }
 0x4b1   :  { %v280_v22 = vadd.f32 1.0, %v3269_v63 }
 0x4b3   :  { %v3271_v56 = vpop.eup %3270 }
 0x4b4   :  { %v3273_v33 = vpop.eup %3272  ;;  %v1145_v58 = vadd.f32 1.0, %v3271_v56 }
 0x4b5   :  { %v3275_v55 = vpop.eup %3274  ;;  %v281_v36 = vadd.f32 1.0, %v3273_v33 }
 0x4b6   :  { %v3277_v50 = vpop.eup %3276  ;;  %v1786_v30 = vadd.f32 1.0, %v3275_v55 }
 0x4b7   :  { %v1146_v3 = vadd.f32 1.0, %v3277_v50 }
 0x4b8   :  { %v3279_v8 = vpop.eup %3278 }
 0x4c0   :  { %v2268_v24 = vpop.xlane.xlu1 %2267 }
 0x4c1   :  { %v2720_v27 = vmul.f32 -1.442695, %v2268_v24  ;;  %v1787_v24 = vadd.f32 1.0, %v3279_v8 }
 0x4c3   :  { %3280 = vpow2.f32 %v2720_v27 }
 0x4c4   :  { %v2270_v38 = vpop.xlane.xlu0 %2269  ;;  %3282 = vrcp.f32 %v280_v22 }
 0x4c5   :  { %v2721_v5 = vmul.f32 -1.442695, %v2270_v38 }
 0x4c7   :  { %3284 = vpow2.f32 %v2721_v5 }
 0x4c8   :  { %3286 = vrcp.f32 %v1145_v58  ;;  %v2272_v29 = vpop.xlane.xlu1 %2271 }
 0x4c9   :  { %3288 = vrcp.f32 %v281_v36  ;;  %v2722_v15 = vmul.f32 -1.442695, %v2272_v29 }
 0x4ca   :  { %3290 = vrcp.f32 %v1786_v30  ;;  %v3475_v30 = vld [vmem:[%s5613_s1] sm:$0xff] }
 0x4cb   :  { %3292 = vpow2.f32 %v2722_v15 }
 0x4cc   :  { %3294 = vrcp.f32 %v1146_v3  ;;  %v2274_v63 = vpop.xlane.xlu0 %2273  ;;  %v6278_v3 = vld [vmem:[#allocation91_spill] sm:$0xff] }
 0x4cd   :  { %v3281_v27 = vpop.eup %3280  ;;  %v2723_v56 = vmul.f32 -1.442695, %v2274_v63  ;;  %3296 = vrcp.f32 %v1787_v24 }
 0x4ce   :  { %v2427_v61 = vadd.f32 1.0, %v3281_v27  ;;  %v3283_v33 = vpop.eup %3282 }
 0x4cf   :  { %3298 = vpow2.f32 %v2723_v56  ;;  %v376_v8 = vmul.f32 %v3475_v30, %v3283_v33  ;;  %v6279_v56 = vld [vmem:[#allocation125_spill] sm:$0xff] }
 0x4d0   :  { %3300 = vrcp.f32 %v2427_v61  ;;  %v2276_v22 = vpop.xlane.xlu1 %2275 }
 0x4d1   :  { %v3285_v55 = vpop.eup %3284  ;;  %v2724_v5 = vmul.f32 -1.442695, %v2276_v22 }
 0x4d2   :  { %v3287_v58 = vpop.eup %3286  ;;  %v2428_v38 = vadd.f32 1.0, %v3285_v55 }
 0x4d3   :  { %v3289_v50 = vpop.eup %3288  ;;  %3302 = vpow2.f32 %v2724_v5  ;;  %v1241_v24 = vmul.f32 %v3287_v58, %v6278_v3 }
 0x4d4   :  { %v3291_v29 = vpop.eup %3290  ;;  %3304 = vrcp.f32 %v2428_v38  ;;  %v2278_v36 = vpop.xlane.xlu0 %2277  ;;  %v3476_v38 = vld [vmem:[%s5613_s1 + $0x8] sm:$0xff] }
 0x4d5   :  { %v3293_v15 = vpop.eup %3292  ;;  %v2725_v63 = vmul.f32 -1.442695, %v2278_v36  ;;  %v1882_v22 = vmul.f32 %v3291_v29, %v6279_v56  ;;  %v377_v42 = vmul.f32 %v3476_v38, %v3289_v50  ;;  %v1273_v7 = vadd.f32 %v1241_v24, %v376_v8 }
 0x4d6   :  { %v3295_v61 = vpop.eup %3294  ;;  %v2429_v27 = vadd.f32 1.0, %v3293_v15  ;;  %v6281_v15 = vld [vmem:[#allocation126_spill] sm:$0xff] }
 0x4d7   :  { %3306 = vpow2.f32 %v2725_v63  ;;  %v3297_v55 = vpop.eup %3296  ;;  %v1242_v33 = vmul.f32 %v3295_v61, %v6280_v48  ;;  %v1914_v3 = vadd.f32 %v1882_v22, %v1273_v7 }
 0x4d8   :  { %3308 = vrcp.f32 %v2429_v27  ;;  %v2280_v5 = vpop.xlane.xlu1 %2279  ;;  %v1883_v57 = vmul.f32 %v3297_v55, %v6281_v15 }
 0x4d9   :  { %v3299_v12 = vpop.eup %3298  ;;  %v2726_v30 = vmul.f32 -1.442695, %v2280_v5  ;;  %v1274_v56 = vadd.f32 %v1242_v33, %v377_v42 }
 0x4da   :  { %v3301_v58 = vpop.eup %3300  ;;  %v2430_v36 = vadd.f32 1.0, %v3299_v12 }
 0x4db   :  { %v2523_v29 = vmul.f32 %v3301_v58, %v5255_v47  ;;  %3310 = vpow2.f32 %v2726_v30  ;;  %v1915_v8 = vadd.f32 %v1883_v57, %v1274_v56 }
 0x4dc   :  { %3312 = vrcp.f32 %v2430_v36  ;;  %v2282_v63 = vpop.xlane.xlu0 %2281 }
 0x4dd   :  { %v3303_v27 = vpop.eup %3302  ;;  %v2555_v14 = vadd.f32 %v2523_v29, %v1914_v3  ;;  %v2727_v4 = vmul.f32 -1.442695, %v2282_v63 }
 0x4de   :  { %v3305_v40 = vpop.eup %3304  ;;  %v2431_v50 = vadd.f32 1.0, %v3303_v27 }
 0x4df   :  { %2587 = vst [vmem:[%s5615_s4] sm:$0xff] %v2555_v14  ;;  %v2524_v7 = vmul.f32 %v3305_v40, %v5265_v20  ;;  %3314 = vpow2.f32 %v2727_v4 }
 0x4e0   :  { %3316 = vrcp.f32 %v2431_v50  ;;  %v2284_v12 = vpop.xlane.xlu1 %2283 }
 0x4e1   :  { %v3307_v47 = vpop.eup %3306  ;;  %v2556_v48 = vadd.f32 %v2524_v7, %v1915_v8  ;;  %v2728_v24 = vmul.f32 -1.442695, %v2284_v12 }
 0x4e2   :  { %v3309_v61 = vpop.eup %3308  ;;  %v2432_v22 = vadd.f32 1.0, %v3307_v47 }
 0x4e3   :  { %2588 = vst [vmem:[%s5615_s4 + $0x8] sm:$0xff] %v2556_v48  ;;  %v2525_v57 = vmul.f32 %v3309_v61, %v5270_v26  ;;  %3318 = vpow2.f32 %v2728_v24 }
 0x4e4   :  { %3320 = vrcp.f32 %v2432_v22  ;;  %v2286_v42 = vpop.xlane.xlu0 %2285 }
 0x4e5   :  { %v3311_v14 = vpop.eup %3310  ;;  %v2557_v20 = vadd.f32 %v2525_v57, %v4986_v28  ;;  %v2729_v40 = vmul.f32 -1.442695, %v2286_v42 }
 0x4e6   :  { %v3313_v4 = vpop.eup %3312  ;;  %v2433_v55 = vadd.f32 1.0, %v3311_v14 }
 0x4e7   :  { %2589 = vst [vmem:[%s5615_s4 + $0x10] sm:$0xff] %v2557_v20  ;;  %v2526_v5 = vmul.f32 %v3313_v4, %v5275_v51  ;;  %3322 = vpow2.f32 %v2729_v40 }
 0x4e8   :  { %3324 = vrcp.f32 %v2433_v55  ;;  %v2288_v38 = vpop.xlane.xlu1 %2287 }
 0x4e9   :  { %v3315_v33 = vpop.eup %3314  ;;  %v2558_v26 = vadd.f32 %v2526_v5, %v4997_v52  ;;  %v2730_v30 = vmul.f32 -1.442695, %v2288_v38 }
 0x4ea   :  { %v3317_v58 = vpop.eup %3316  ;;  %v2434_v36 = vadd.f32 1.0, %v3315_v33 }
 0x4eb   :  { %2590 = vst [vmem:[%s5615_s4 + $0x18] sm:$0xff] %v2558_v26  ;;  %v2527_v28 = vmul.f32 %v3317_v58, %v5280_v43  ;;  %3326 = vpow2.f32 %v2730_v30 }
 0x4ec   :  { %3328 = vrcp.f32 %v2434_v36  ;;  %v2290_v3 = vpop.xlane.xlu0 %2289 }
 0x4ed   :  { %v3319_v15 = vpop.eup %3318  ;;  %v2559_v51 = vadd.f32 %v2527_v28, %v5008_v37  ;;  %v2731_v29 = vmul.f32 -1.442695, %v2290_v3 }
 0x4ee   :  { %v3321_v63 = vpop.eup %3320  ;;  %v2435_v27 = vadd.f32 1.0, %v3319_v15 }
 0x4ef   :  { %2591 = vst [vmem:[%s5615_s4 + $0x20] sm:$0xff] %v2559_v51  ;;  %v2528_v52 = vmul.f32 %v3321_v63, %v5285_v9  ;;  %3330 = vpow2.f32 %v2731_v29 }
 0x4f0   :  { %3332 = vrcp.f32 %v2435_v27  ;;  %v2292_v56 = vpop.xlane.xlu1 %2291 }
 0x4f1   :  { %v3323_v50 = vpop.eup %3322  ;;  %v2560_v43 = vadd.f32 %v2528_v52, %v5019_v35  ;;  %v2732_v8 = vmul.f32 -1.442695, %v2292_v56 }
 0x4f2   :  { %v3325_v7 = vpop.eup %3324  ;;  %v2436_v12 = vadd.f32 1.0, %v3323_v50 }
 0x4f3   :  { %2592 = vst [vmem:[%s5615_s4 + $0x28] sm:$0xff] %v2560_v43  ;;  %v2529_v37 = vmul.f32 %v3325_v7, %v5290_v21  ;;  %3334 = vpow2.f32 %v2732_v8 }
 0x4f4   :  { %3336 = vrcp.f32 %v2436_v12  ;;  %v2294_v47 = vpop.xlane.xlu0 %2293 }
 0x4f5   :  { %v3327_v48 = vpop.eup %3326  ;;  %v2561_v9 = vadd.f32 %v2529_v37, %v5030_v31  ;;  %v2733_v24 = vmul.f32 -1.442695, %v2294_v47 }
 0x4f6   :  { %v3329_v61 = vpop.eup %3328  ;;  %v2437_v22 = vadd.f32 1.0, %v3327_v48 }
 0x4f7   :  { %2593 = vst [vmem:[%s5615_s4 + $0x30] sm:$0xff] %v2561_v9  ;;  %v2530_v35 = vmul.f32 %v3329_v61, %v5295_v17  ;;  %3338 = vpow2.f32 %v2733_v24 }
 0x4f8   :  { %3340 = vrcp.f32 %v2437_v22  ;;  %v2296_v57 = vpop.xlane.xlu1 %2295 }
 0x4f9   :  { %v3331_v42 = vpop.eup %3330  ;;  %v2562_v21 = vadd.f32 %v2530_v35, %v5041_v11  ;;  %v2734_v14 = vmul.f32 -1.442695, %v2296_v57 }
 0x4fa   :  { %v3333_v20 = vpop.eup %3332  ;;  %v2438_v40 = vadd.f32 1.0, %v3331_v42 }
 0x4fb   :  { %2594 = vst [vmem:[%s5615_s4 + $0x38] sm:$0xff] %v2562_v21  ;;  %v2531_v31 = vmul.f32 %v3333_v20, %v5300_v62  ;;  %3342 = vpow2.f32 %v2734_v14 }
 0x4fc   :  { %3344 = vrcp.f32 %v2438_v40  ;;  %v2298_v4 = vpop.xlane.xlu0 %2297 }
 0x4fd   :  { %v3335_v55 = vpop.eup %3334  ;;  %v2563_v17 = vadd.f32 %v2531_v31, %v5052_v6  ;;  %v2735_v5 = vmul.f32 -1.442695, %v2298_v4 }
 0x4fe   :  { %v3337_v38 = vpop.eup %3336  ;;  %v2439_v33 = vadd.f32 1.0, %v3335_v55 }
 0x4ff   :  { %2595 = vst [vmem:[%s5615_s4 + $0x40] sm:$0xff] %v2563_v17  ;;  %v2532_v11 = vmul.f32 %v3337_v38, %v5305_v60  ;;  %3346 = vpow2.f32 %v2735_v5 }
 0x500   :  { %3348 = vrcp.f32 %v2439_v33  ;;  %v2300_v26 = vpop.xlane.xlu1 %2299 }
 0x501   :  { %v3339_v30 = vpop.eup %3338  ;;  %v2564_v62 = vadd.f32 %v2532_v11, %v5063_v49  ;;  %v2736_v58 = vmul.f32 -1.442695, %v2300_v26 }
 0x502   :  { %v3341_v36 = vpop.eup %3340  ;;  %v2440_v28 = vadd.f32 1.0, %v3339_v30 }
 0x503   :  { %2596 = vst [vmem:[%s5615_s4 + $0x48] sm:$0xff] %v2564_v62  ;;  %v2533_v6 = vmul.f32 %v3341_v36, %v5310_v45  ;;  %3350 = vpow2.f32 %v2736_v58 }
 0x504   :  { %3352 = vrcp.f32 %v2440_v28  ;;  %v2302_v3 = vpop.xlane.xlu0 %2301 }
 0x505   :  { %v3343_v15 = vpop.eup %3342  ;;  %v2565_v60 = vadd.f32 %v2533_v6, %v5074_v10  ;;  %v2737_v51 = vmul.f32 -1.442695, %v2302_v3 }
 0x506   :  { %v3345_v29 = vpop.eup %3344  ;;  %v2441_v63 = vadd.f32 1.0, %v3343_v15 }
 0x507   :  { %2597 = vst [vmem:[%s5615_s4 + $0x50] sm:$0xff] %v2565_v60  ;;  %v2534_v49 = vmul.f32 %v3345_v29, %v5315_v23  ;;  %3354 = vpow2.f32 %v2737_v51  ;;  %v6282_v60 = vld [vmem:[#allocation142_spill] sm:$0xff] }
 0x508   :  { %3356 = vrcp.f32 %v2441_v63  ;;  %v2304_v27 = vpop.xlane.xlu1 %2303  ;;  %v2654_v51 = vmul.f32 -1.442695, %v6282_v60 }
 0x509   :  { %v3347_v52 = vpop.eup %3346  ;;  %v2566_v45 = vadd.f32 %v2534_v49, %v5085_v16  ;;  %v2738_v56 = vmul.f32 -1.442695, %v2304_v27  ;;  %v6283_v49 = vld [vmem:[#allocation134_spill] sm:$0xff] }
 0x50a   :  { %v3349_v50 = vpop.eup %3348  ;;  %v2442_v43 = vadd.f32 1.0, %v3347_v52  ;;  %v2686_v27 = vmul.f32 -1.442695, %v6283_v49 }
 0x50b   :  { %2598 = vst [vmem:[%s5615_s4 + $0x58] sm:$0xff] %v2566_v45  ;;  %v2535_v10 = vmul.f32 %v3349_v50, %v5320_v2  ;;  %3358 = vpow2.f32 %v2738_v56  ;;  %v6284_v56 = vld [vmem:[#allocation144_spill] sm:$0xff] }
 0x50c   :  { %3360 = vrcp.f32 %v2442_v43  ;;  %v2306_v8 = vpop.xlane.xlu0 %2305  ;;  %v2655_v50 = vmul.f32 -1.442695, %v6284_v56 }
 0x50d   :  { %v3351_v7 = vpop.eup %3350  ;;  %v2567_v23 = vadd.f32 %v2535_v10, %v5096_v0  ;;  %v2739_v12 = vmul.f32 -1.442695, %v2306_v8  ;;  %v6285_v10 = vld [vmem:[#allocation71_spill] sm:$0xff] }
 0x50e   :  { %v3353_v37 = vpop.eup %3352  ;;  %v2443_v47 = vadd.f32 1.0, %v3351_v7 }
 0x50f   :  { %2599 = vst [vmem:[%s5615_s4 + $0x60] sm:$0xff] %v2567_v23  ;;  %v2536_v16 = vmul.f32 %v3353_v37, %v5325_v44  ;;  %3362 = vpow2.f32 %v2739_v12  ;;  %v6286_v23 = vld [vmem:[#allocation101_spill] sm:$0xff] }
 0x510   :  { %3364 = vrcp.f32 %v2443_v47  ;;  %v2308_v48 = vpop.xlane.xlu1 %2307  ;;  %v2718_v12 = vmul.f32 -1.442695, %v6286_v23 }
 0x511   :  { %v3355_v9 = vpop.eup %3354  ;;  %v2568_v2 = vadd.f32 %v2536_v16, %v5107_v39  ;;  %v2740_v24 = vmul.f32 -1.442695, %v2308_v48  ;;  %v6288_v48 = vld [vmem:[#allocation41_spill] sm:$0xff] }
 0x512   :  { %v3357_v61 = vpop.eup %3356  ;;  %v2444_v22 = vadd.f32 1.0, %v3355_v9  ;;  %v2687_v9 = vmul.f32 -1.442695, %v6288_v48 }
 0x513   :  { %2600 = vst [vmem:[%s5615_s4 + $0x68] sm:$0xff] %v2568_v2  ;;  %v2537_v0 = vmul.f32 %v3357_v61, %v5330_v41  ;;  %3366 = vpow2.f32 %v2740_v24  ;;  %v6289_v24 = vld [vmem:[#allocation95_spill] sm:$0xff] }
 0x514   :  { %3368 = vrcp.f32 %v2444_v22  ;;  %v2310_v35 = vpop.xlane.xlu0 %2309 }
 0x515   :  { %v3359_v57 = vpop.eup %3358  ;;  %v2569_v44 = vadd.f32 %v2537_v0, %v5118_v25  ;;  %v2741_v42 = vmul.f32 -1.442695, %v2310_v35  ;;  %v6290_v35 = vld [vmem:[#allocation129_spill] sm:$0xff] }
 0x516   :  { %v3361_v21 = vpop.eup %3360  ;;  %v2445_v14 = vadd.f32 1.0, %v3359_v57  ;;  %v2719_v57 = vmul.f32 -1.442695, %v6290_v35 }
 0x517   :  { %2601 = vst [vmem:[%s5615_s4 + $0x70] sm:$0xff] %v2569_v44  ;;  %v2538_v39 = vmul.f32 %v3361_v21, %v5335_v59  ;;  %3370 = vpow2.f32 %v2741_v42  ;;  %v6291_v44 = vld [vmem:[#allocation53_spill] sm:$0xff] }
 0x518   :  { %3372 = vrcp.f32 %v2445_v14  ;;  %v2312_v20 = vpop.xlane.xlu1 %2311 }
 0x519   :  { %v3363_v40 = vpop.eup %3362  ;;  %v2570_v41 = vadd.f32 %v2538_v39, %v5129_v32  ;;  %v2742_v31 = vmul.f32 -1.442695, %v2312_v20  ;;  %v6292_v20 = vld [vmem:[#allocation73_spill] sm:$0xff] }
 0x51a   :  { %v3365_v4 = vpop.eup %3364  ;;  %v2446_v55 = vadd.f32 1.0, %v3363_v40 }
 0x51b   :  { %2602 = vst [vmem:[%s5615_s4 + $0x78] sm:$0xff] %v2570_v41  ;;  %v2539_v25 = vmul.f32 %v3365_v4, %v5340_v18  ;;  %3374 = vpow2.f32 %v2742_v31 }
 0x51c   :  { %3376 = vrcp.f32 %v2446_v55  ;;  %v2314_v17 = vpop.xlane.xlu0 %2313  ;;  %v6293_v55 = vld [vmem:[#allocation55_spill] sm:$0xff] }
 0x51d   :  { %v3367_v5 = vpop.eup %3366  ;;  %v2571_v59 = vadd.f32 %v2539_v25, %v5140_v53  ;;  %v2743_v38 = vmul.f32 -1.442695, %v2314_v17 }
 0x51e   :  { %v3369_v33 = vpop.eup %3368  ;;  %v2447_v11 = vadd.f32 1.0, %v3367_v5 }
 0x51f   :  { %2603 = vst [vmem:[%s5615_s4 + $0x80] sm:$0xff] %v2571_v59  ;;  %v2540_v32 = vmul.f32 %v3369_v33, %v5345_v54  ;;  %3378 = vpow2.f32 %v2743_v38  ;;  %v6294_v33 = vld [vmem:[#allocation75_spill] sm:$0xff] }
 0x520   :  { %3380 = vrcp.f32 %v2447_v11  ;;  %v2316_v26 = vpop.xlane.xlu1 %2315 }
 0x521   :  { %v3371_v30 = vpop.eup %3370  ;;  %v2572_v18 = vadd.f32 %v2540_v32, %v5151_v13  ;;  %v2744_v62 = vmul.f32 -1.442695, %v2316_v26 }
 0x522   :  { %v3373_v58 = vpop.eup %3372  ;;  %v2448_v36 = vadd.f32 1.0, %v3371_v30 }
 0x523   :  { %2604 = vst [vmem:[%s5615_s4 + $0x88] sm:$0xff] %v2572_v18  ;;  %v2541_v53 = vmul.f32 %v3373_v58, %v5350_v1  ;;  %3382 = vpow2.f32 %v2744_v62  ;;  %v6295_v62 = vld [vmem:[#allocation57_spill] sm:$0xff] }
 0x524   :  { %3384 = vrcp.f32 %v2448_v36  ;;  %v2318_v28 = vpop.xlane.xlu0 %2317 }
 0x525   :  { %v3375_v6 = vpop.eup %3374  ;;  %v2573_v54 = vadd.f32 %v2541_v53, %v5162_v46  ;;  %v2745_v3 = vmul.f32 -1.442695, %v2318_v28 }
 0x526   :  { %v3377_v15 = vpop.eup %3376  ;;  %v2449_v13 = vadd.f32 1.0, %v3375_v6 }
 0x527   :  { %2605 = vst [vmem:[%s5615_s4 + $0x90] sm:$0xff] %v2573_v54  ;;  %v2542_v29 = vmul.f32 %v3377_v15, %v5355_v19  ;;  %3386 = vpow2.f32 %v2745_v3  ;;  %v6296_v3 = vld [vmem:[#allocation97_spill] sm:$0xff] }
 0x528   :  { %3388 = vrcp.f32 %v2449_v13  ;;  %v2320_v1 = vpop.xlane.xlu1 %2319 }
 0x529   :  { %v3379_v63 = vpop.eup %3378  ;;  %v2574_v52 = vadd.f32 %v2542_v29, %v5173_v34  ;;  %v2746_v46 = vmul.f32 -1.442695, %v2320_v1  ;;  %3390 = vpow2.f32 %v2654_v51  ;;  %v6287_v34 = vld [vmem:[#allocation138_spill] sm:$0xff]  ;;  %v6297_v1 = vld [vmem:[#allocation59_spill] sm:$0xff] }
 0x52a   :  { %v3381_v45 = vpop.eup %3380  ;;  %v2450_v43 = vadd.f32 1.0, %v3379_v63 }
 0x52b   :  { %2606 = vst [vmem:[%s5615_s4 + $0x98] sm:$0xff] %v2574_v52  ;;  %v2543_v19 = vmul.f32 %v3381_v45, %v6285_v10  ;;  %3392 = vpow2.f32 %v2746_v46 }
 0x52c   :  { %3394 = vrcp.f32 %v2450_v43  ;;  %v2322_v8 = vpop.xlane.xlu0 %2321 }
 0x52d   :  { %v3383_v7 = vpop.eup %3382  ;;  %3396 = vpow2.f32 %v2686_v27  ;;  %v2575_v37 = vadd.f32 %v2543_v19, %v6287_v34  ;;  %v2747_v47 = vmul.f32 -1.442695, %v2322_v8  ;;  %v6299_v19 = vld [vmem:[#allocation61_spill] sm:$0xff] }
 0x52e   :  { %v3385_v16 = vpop.eup %3384  ;;  %3398 = vpow2.f32 %v2655_v50  ;;  %v2451_v2 = vadd.f32 1.0, %v3383_v7  ;;  %v6298_v50 = vld [vmem:[#allocation127_spill] sm:$0xff]  ;;  %v6300_v34 = vld [vmem:[#allocation77_spill] sm:$0xff] }
 0x52f   :  { %2607 = vst [vmem:[%s5615_s4 + $0xa0] sm:$0xff] %v2575_v37  ;;  %v2544_v61 = vmul.f32 %v3385_v16, %v6289_v24  ;;  %3400 = vpow2.f32 %v2747_v47  ;;  %v6301_v16 = vld [vmem:[#allocation63_spill] sm:$0xff] }
 0x530   :  { %3402 = vrcp.f32 %v2451_v2  ;;  %v2324_v22 = vpop.xlane.xlu1 %2323 }
 0x531   :  { %v3387_v0 = vpop.eup %3386  ;;  %3404 = vpow2.f32 %v2718_v12  ;;  %v2576_v42 = vadd.f32 %v2544_v61, %v6291_v44  ;;  %v2748_v21 = vmul.f32 -1.442695, %v2324_v22  ;;  %v6302_v61 = vld [vmem:[#allocation79_spill] sm:$0xff] }
 0x532   :  { %v3389_v14 = vpop.eup %3388  ;;  %3406 = vpow2.f32 %v2687_v9  ;;  %v2452_v39 = vadd.f32 1.0, %v3387_v0 }
 0x533   :  { %2608 = vst [vmem:[%s5615_s4 + $0xa8] sm:$0xff] %v2576_v42  ;;  %v2545_v40 = vmul.f32 %v3389_v14, %v6292_v20  ;;  %3408 = vpow2.f32 %v2748_v21  ;;  %v3391_v41 = vpop.eup %3390 }
 0x534   :  { %3410 = vrcp.f32 %v2452_v39  ;;  %v2326_v31 = vpop.xlane.xlu0 %2325  ;;  %v310_v18 = vadd.f32 1.0, %v3391_v41  ;;  %v6304_v39 = vld [vmem:[#allocation99_spill] sm:$0xff] }
 0x535   :  { %v3393_v4 = vpop.eup %3392  ;;  %3412 = vpow2.f32 %v2719_v57  ;;  %v2577_v25 = vadd.f32 %v2545_v40, %v6293_v55  ;;  %v2749_v17 = vmul.f32 -1.442695, %v2326_v31  ;;  %v6303_v57 = vld [vmem:[#allocation65_spill] sm:$0xff]  ;;  %v3477_v31 = vld [vmem:[%s5613_s1 + $0xf0] sm:$0xff] }
 0x536   :  { %v3395_v5 = vpop.eup %3394  ;;  %v2453_v59 = vadd.f32 1.0, %v3393_v4  ;;  %v6305_v55 = vld [vmem:[#allocation120_spill] sm:$0xff] }
 0x537   :  { %v3397_v38 = vpop.eup %3396  ;;  %2609 = vst [vmem:[%s5615_s4 + $0xb0] sm:$0xff] %v2577_v25  ;;  %v2546_v11 = vmul.f32 %v3395_v5, %v6294_v33  ;;  %3414 = vpow2.f32 %v2749_v17  ;;  %v6306_v17 = vld [vmem:[#allocation67_spill] sm:$0xff] }
 0x538   :  { %v3399_v32 = vpop.eup %3398  ;;  %3416 = vrcp.f32 %v2453_v59  ;;  %v2328_v26 = vpop.xlane.xlu1 %2327  ;;  %v1175_v28 = vadd.f32 1.0, %v3397_v38  ;;  %v6307_v38 = vld [vmem:[#allocation163_spill] sm:$0xff] }
 0x539   :  { %v3401_v30 = vpop.eup %3400  ;;  %v2578_v58 = vadd.f32 %v2546_v11, %v6295_v62  ;;  %v2750_v36 = vmul.f32 -1.442695, %v2328_v26  ;;  %v311_v29 = vadd.f32 1.0, %v3399_v32  ;;  %v6308_v11 = vld [vmem:[#allocation128_spill] sm:$0xff] }
 0x53a   :  { %v3403_v53 = vpop.eup %3402  ;;  %v2454_v6 = vadd.f32 1.0, %v3401_v30  ;;  %v3478_v30 = vld [vmem:[%s5613_s1 + $0xf8] sm:$0xff] }
 0x53b   :  { %v3405_v54 = vpop.eup %3404  ;;  %2610 = vst [vmem:[%s5615_s4 + $0xb8] sm:$0xff] %v2578_v58  ;;  %v2547_v15 = vmul.f32 %v3403_v53, %v6296_v3  ;;  %3418 = vpow2.f32 %v2750_v36  ;;  %v6309_v58 = vld [vmem:[#allocation122_spill] sm:$0xff]  ;;  %v6310_v53 = vld [vmem:[#allocation69_spill] sm:$0xff]  ;;  %v6311_v3 = vld [vmem:[#allocation164_spill] sm:$0xff] }
 0x53c   :  { %v3407_v60 = vpop.eup %3406  ;;  %3420 = vrcp.f32 %v2454_v6  ;;  %v2330_v51 = vpop.xlane.xlu0 %2329  ;;  %v1816_v52 = vadd.f32 1.0, %v3405_v54 }
 0x53d   :  { %v3409_v13 = vpop.eup %3408  ;;  %3422 = vrcp.f32 %v310_v18  ;;  %v2579_v63 = vadd.f32 %v2547_v15, %v6297_v1  ;;  %v2751_v49 = vmul.f32 -1.442695, %v2330_v51  ;;  %v1176_v56 = vadd.f32 1.0, %v3407_v60  ;;  %v6312_v60 = vld [vmem:[#allocation81_spill] sm:$0xff] }
 0x53e   :  { %v3411_v27 = vpop.eup %3410  ;;  %3424 = vrcp.f32 %v1175_v28  ;;  %v2455_v46 = vadd.f32 1.0, %v3409_v13 }
 0x53f   :  { %v3413_v45 = vpop.eup %3412  ;;  %2611 = vst [vmem:[%s5615_s4 + $0xc0] sm:$0xff] %v2579_v63  ;;  %v2548_v43 = vmul.f32 %v3411_v27, %v6298_v50  ;;  %3426 = vpow2.f32 %v2751_v49  ;;  %v6313_v49 = vld [vmem:[#allocation83_spill] sm:$0xff] }
 0x540   :  { %3428 = vrcp.f32 %v2455_v46  ;;  %v1817_v23 = vadd.f32 1.0, %v3413_v45 }
 0x541   :  { %v3415_v10 = vpop.eup %3414  ;;  %3430 = vrcp.f32 %v311_v29  ;;  %v2580_v8 = vadd.f32 %v2548_v43, %v6299_v19 }
 0x542   :  { %v3417_v7 = vpop.eup %3416  ;;  %3432 = vrcp.f32 %v1816_v52  ;;  %v2456_v12 = vadd.f32 1.0, %v3415_v10 }
 0x543   :  { %3434 = vrcp.f32 %v1176_v56  ;;  %2612 = vst [vmem:[%s5615_s4 + $0xc8] sm:$0xff] %v2580_v8  ;;  %v2549_v37 = vmul.f32 %v3417_v7, %v6300_v34 }
 0x544   :  { %3436 = vrcp.f32 %v2456_v12 }
 0x545   :  { %v3419_v47 = vpop.eup %3418  ;;  %v2581_v48 = vadd.f32 %v2549_v37, %v6301_v16  ;;  %3438 = vrcp.f32 %v1817_v23 }
 0x546   :  { %v3421_v9 = vpop.eup %3420  ;;  %v2457_v2 = vadd.f32 1.0, %v3419_v47 }
 0x547   :  { %v3423_v24 = vpop.eup %3422  ;;  %2613 = vst [vmem:[%s5615_s4 + $0xd0] sm:$0xff] %v2581_v48  ;;  %v2550_v22 = vmul.f32 %v3421_v9, %v6302_v61 }
 0x548   :  { %v3425_v0 = vpop.eup %3424  ;;  %3440 = vrcp.f32 %v2457_v2  ;;  %v406_v4 = vmul.f32 %v3477_v31, %v3423_v24 }
 0x549   :  { %v3427_v35 = vpop.eup %3426  ;;  %v2582_v44 = vadd.f32 %v2550_v22, %v6303_v57  ;;  %v1271_v25 = vmul.f32 %v3425_v0, %v6305_v55 }
 0x54a   :  { %v3429_v42 = vpop.eup %3428  ;;  %v2458_v21 = vadd.f32 1.0, %v3427_v35 }
 0x54b   :  { %v3431_v14 = vpop.eup %3430  ;;  %2614 = vst [vmem:[%s5615_s4 + $0xd8] sm:$0xff] %v2582_v44  ;;  %v2551_v20 = vmul.f32 %v3429_v42, %v6304_v39  ;;  %v1303_v62 = vadd.f32 %v1271_v25, %v406_v4 }
 0x54c   :  { %v3433_v40 = vpop.eup %3432  ;;  %3442 = vrcp.f32 %v2458_v21  ;;  %v407_v18 = vmul.f32 %v3478_v30, %v3431_v14 }
 0x54d   :  { %v3435_v41 = vpop.eup %3434  ;;  %v2583_v5 = vadd.f32 %v2551_v20, %v6306_v17  ;;  %v1912_v33 = vmul.f32 %v3433_v40, %v6307_v38 }
 0x54e   :  { %v3437_v59 = vpop.eup %3436  ;;  %v1272_v36 = vmul.f32 %v3435_v41, %v6309_v58 }
 0x54f   :  { %2615 = vst [vmem:[%s5615_s4 + $0xe0] sm:$0xff] %v2583_v5  ;;  %v2552_v32 = vmul.f32 %v3437_v59, %v6308_v11  ;;  %v3439_v26 = vpop.eup %3438  ;;  %v1944_v54 = vadd.f32 %v1912_v33, %v1303_v62 }
 0x550   :  { %v1913_v15 = vmul.f32 %v3439_v26, %v6311_v3  ;;  %v1304_v13 = vadd.f32 %v1272_v36, %v407_v18 }
 0x551   :  { %v2584_v28 = vadd.f32 %v2552_v32, %v6310_v53 }
 0x552   :  { %v3441_v6 = vpop.eup %3440  ;;  %v1945_v63 = vadd.f32 %v1913_v15, %v1304_v13 }
 0x553   :  { %2616 = vst [vmem:[%s5615_s4 + $0xe8] sm:$0xff] %v2584_v28  ;;  %v2553_v51 = vmul.f32 %v3441_v6, %v6312_v60 }
 0x555   :  { %v2585_v29 = vadd.f32 %v2553_v51, %v1944_v54 }
 0x556   :  { %v3443_v1 = vpop.eup %3442 }
 0x557   :  { %2617 = vst [vmem:[%s5615_s4 + $0xf0] sm:$0xff] %v2585_v29  ;;  %v2554_v27 = vmul.f32 %v3443_v1, %v6313_v49 }
 0x559   :  { %v2586_v52 = vadd.f32 %v2554_v27, %v1945_v63 }
 0x55b   :  { %2618 = vst [vmem:[%s5615_s4 + $0xf8] sm:$0xff] %v2586_v52 }

</bundles_post_ra>
